<compile_context>
chip_gen: v5e
topology: v5e:2x2
jax: 0.10.0
libtpu: 0.0.40
codegen_flags: <defaults>
</compile_context>

<pallas_src>
import jax
import jax.numpy as jnp
from jax.experimental import pallas as pl
from jax.experimental.pallas import tpu as pltpu

EMB_DIM = 128
OUT_DIM = 80
TIME_STEPS = 50
KSIZE = 5
PAD = 2

N_OUT = OUT_DIM * TIME_STEPS      # 4000
N_PAD = 4096                      # padded to a multiple of 128 lanes
TN = 1024                         # output / wf2 tile width


def voice_cloner_kernel(cols1_ref,          # (B*T, 5*80)  bf16  im2col of mel
                        w1c_ref, b1_ref,    # (400, 128) bf16, (1, 128) f32
                        w2c_ref, b2_ref,    # (640, 256) bf16, (1, 256) f32
                        wl_ref, bl_ref,     # (256, 128) bf16, (1, 128) f32
                        wf1_ref, bf1_ref,   # (128, 512) bf16, (1, 512) f32
                        wf2_ref, bf2_ref,   # (512, TN)  bf16, (1, TN)  f32  (tiled)
                        out_ref,            # (B, TN) f32 (tiled)
                        hid_ref):           # scratch: (B, 512) bf16, persists across grid
    # ---- Encoder + decoder FC1: computed once, cached in VMEM scratch ------
    @pl.when(pl.program_id(0) == 0)
    def _encoder():
        BT = cols1_ref.shape[0]
        B = hid_ref.shape[0]
        T = BT // B

        # Conv1d(80 -> 128, k=5, pad=2) + ReLU as one im2col matmul.
        h1 = jnp.dot(cols1_ref[...], w1c_ref[...],
                     preferred_element_type=jnp.float32)
        h1 = jnp.maximum(h1 + b1_ref[...], 0.0)                   # (B*T, 128) f32

        # Conv1d(128 -> 256, k=5, pad=2) + ReLU: build im2col windows
        # in-register (no padded scratch buffer, 128-lane-aligned concat).
        h1b = h1.astype(jnp.bfloat16).reshape(B, T, 128)
        zpad = jnp.zeros((B, PAD, 128), jnp.bfloat16)
        h1p = jnp.concatenate([zpad, h1b, zpad], axis=1)          # (B, T+4, 128)
        cols2 = jnp.concatenate([h1p[:, k:k + T, :] for k in range(KSIZE)],
                                axis=-1)                          # (B, T, 640)
        cols2 = cols2.reshape(BT, KSIZE * 128)
        h2 = jnp.dot(cols2, w2c_ref[...],
                     preferred_element_type=jnp.float32)
        h2 = jnp.maximum(h2 + b2_ref[...], 0.0)                   # (B*T, 256) f32

        # AdaptiveAvgPool1d(1) over time + Linear(256 -> 128).
        pooled = jnp.mean(h2.reshape(B, T, 256), axis=1)          # (B, 256)
        emb = jnp.dot(pooled.astype(jnp.bfloat16), wl_ref[...],
                      preferred_element_type=jnp.float32) + bl_ref[...]

        # MelDecoder FC1: Linear(128 -> 512) + ReLU, cached for all tiles.
        hid = jnp.dot(emb.astype(jnp.bfloat16), wf1_ref[...],
                      preferred_element_type=jnp.float32) + bf1_ref[...]
        hid_ref[...] = jnp.maximum(hid, 0.0).astype(jnp.bfloat16)  # (B, 512)

    # ---- MelDecoder FC2, one lane-dense output tile per grid step -----------
    out = jnp.dot(hid_ref[...], wf2_ref[...],
                  preferred_element_type=jnp.float32)             # (B, TN)
    out_ref[...] = (out + bf2_ref[...]).astype(out_ref.dtype)


def init_params(key):
    """Random params in torch-like layout (conv weights as (K, Cin, Cout))."""
    ks = jax.random.split(key, 5)

    def w(k, shape, fan_in):
        return jax.random.normal(k, shape, jnp.float32) / jnp.sqrt(fan_in)

    return dict(
        w1=w(ks[0], (KSIZE, 80, 128), 80 * KSIZE),
        b1=jnp.zeros((1, 128), jnp.float32),
        w2=w(ks[1], (KSIZE, 128, 256), 128 * KSIZE),
        b2=jnp.zeros((1, 256), jnp.float32),
        wl=w(ks[2], (256, EMB_DIM), 256),
        bl=jnp.zeros((1, EMB_DIM), jnp.float32),
        wf1=w(ks[3], (EMB_DIM, 512), EMB_DIM),
        bf1=jnp.zeros((1, 512), jnp.float32),
        wf2=w(ks[4], (512, N_OUT), 512),
        bf2=jnp.zeros((1, N_OUT), jnp.float32),
    )


def pack_params(p):
    """One-time host-side repack: im2col-folded conv weights, bf16 matmul
    operands, wf2/bf2 zero-padded to 4096 output columns.
    (torch Conv1d weight (Cout, Cin, K) maps here as transpose(2,1,0) before
    the reshape.)"""
    pad_n = N_PAD - N_OUT
    return dict(
        w1c=p['w1'].reshape(KSIZE * 80, 128).astype(jnp.bfloat16),
        b1=p['b1'].astype(jnp.float32),
        w2c=p['w2'].reshape(KSIZE * 128, 256).astype(jnp.bfloat16),
        b2=p['b2'].astype(jnp.float32),
        wl=p['wl'].astype(jnp.bfloat16),
        bl=p['bl'].astype(jnp.float32),
        wf1=p['wf1'].astype(jnp.bfloat16),
        bf1=p['bf1'].astype(jnp.float32),
        wf2p=jnp.pad(p['wf2'], ((0, 0), (0, pad_n))).astype(jnp.bfloat16),
        bf2p=jnp.pad(p['bf2'], ((0, 0), (0, pad_n))).astype(jnp.float32),
    )


def _const_spec(shape):
    """Full-array block, fetched once (block index constant across the grid)."""
    nd = len(shape)
    return pl.BlockSpec(shape, lambda j, _nd=nd: (0,) * _nd)


@jax.jit
def voice_cloner_forward(mel, packed):
    """mel: (B, 80, T) float32 (PyTorch NCW). Returns (B, 80, 50)."""
    B, C, T = mel.shape
    assert C == 80
    BT = B * T

    # Host-side layout plumbing: channels-last, zero-pad time, im2col windows.
    x = jnp.transpose(mel, (0, 2, 1))                       # (B, T, 80)
    x_pad = jnp.pad(x, ((0, 0), (PAD, PAD), (0, 0)))        # (B, T+4, 80)
    cols1 = jnp.concatenate([x_pad[:, k:k + T, :] for k in range(KSIZE)],
                            axis=-1)                        # (B, T, 400)
    cols1 = cols1.reshape(BT, KSIZE * 80).astype(jnp.bfloat16)

    n_tiles = N_PAD // TN
    out_flat = pl.pallas_call(
        voice_cloner_kernel,
        out_shape=jax.ShapeDtypeStruct((B, N_PAD), jnp.float32),
        grid_spec=pltpu.PrefetchScalarGridSpec(
            num_scalar_prefetch=0,
            grid=(n_tiles,),
            in_specs=[
                _const_spec((BT, KSIZE * 80)),          # cols1
                _const_spec((KSIZE * 80, 128)),         # w1c
                _const_spec((1, 128)),                  # b1
                _const_spec((KSIZE * 128, 256)),        # w2c
                _const_spec((1, 256)),                  # b2
                _const_spec((256, EMB_DIM)),            # wl
                _const_spec((1, EMB_DIM)),              # bl
                _const_spec((EMB_DIM, 512)),            # wf1
                _const_spec((1, 512)),                  # bf1
                pl.BlockSpec((512, TN), lambda j: (0, j)),   # wf2 (tiled, pipelined)
                pl.BlockSpec((1, TN), lambda j: (0, j)),     # bf2 (tiled)
            ],
            out_specs=pl.BlockSpec((B, TN), lambda j: (0, j)),
            scratch_shapes=[pltpu.VMEM((B, 512), jnp.bfloat16)],
        ),
        compiler_params=pltpu.CompilerParams(
            # Encoder runs under program_id==0 into scratch -> sequential axis.
            dimension_semantics=("arbitrary",),
            vmem_limit_bytes=32 * 1024 * 1024,
        ),
    )(cols1,
      packed['w1c'], packed['b1'],
      packed['w2c'], packed['b2'],
      packed['wl'], packed['bl'],
      packed['wf1'], packed['bf1'],
      packed['wf2p'], packed['bf2p'])

    # torch: out.view(-1, output_dim, time_steps) ; drop the 4096-padding.
    return out_flat[:, :N_OUT].reshape(B, OUT_DIM, TIME_STEPS)


if __name__ == "__main__":
    key = jax.random.PRNGKey(0)
    k_param, k_in = jax.random.split(key)
    params = init_params(k_param)
    packed = pack_params(params)

    B, T = 2, 16
    mel = jax.random.normal(k_in, (B, 80, T), jnp.float32)   # (B, C=80, T) NCW

    out = voice_cloner_forward(mel, packed)
    out = jax.block_until_ready(out)
    assert out.shape == (B, OUT_DIM, TIME_STEPS), out.shape
    print("KERNEL_OK")
</pallas_src>

<mosaic_0001>
module attributes {stable_mosaic.version = 11 : i64} {
  func.func @voice_cloner_kernel(%arg0: i32, %arg1: memref<32x400xbf16, #tpu.memory_space<vmem>>, %arg2: memref<400x128xbf16, #tpu.memory_space<vmem>>, %arg3: memref<1x128xf32, #tpu.memory_space<vmem>>, %arg4: memref<640x256xbf16, #tpu.memory_space<vmem>>, %arg5: memref<1x256xf32, #tpu.memory_space<vmem>>, %arg6: memref<256x128xbf16, #tpu.memory_space<vmem>>, %arg7: memref<1x128xf32, #tpu.memory_space<vmem>>, %arg8: memref<128x512xbf16, #tpu.memory_space<vmem>>, %arg9: memref<1x512xf32, #tpu.memory_space<vmem>>, %arg10: memref<512x1024xbf16, #tpu.memory_space<vmem>>, %arg11: memref<1x1024xf32, #tpu.memory_space<vmem>>, %arg12: memref<2x1024xf32, #tpu.memory_space<vmem>>, %arg13: memref<2x512xbf16, #tpu.memory_space<vmem>>) attributes {dimension_semantics = [#tpu.dimension_semantics<arbitrary>], iteration_bounds = array<i64: 4>, scalar_prefetch = 0 : i64, scratch_operands = 1 : i64, tpu.core_type = #tpu.core_type<tc>, window_params = [{pipeline_mode = #tpu.pipeline_mode<synchronous>, transform_indices = @transform_0, window_bounds = array<i64: 32, 400>}, {pipeline_mode = #tpu.pipeline_mode<synchronous>, transform_indices = @transform_1, window_bounds = array<i64: 400, 128>}, {pipeline_mode = #tpu.pipeline_mode<synchronous>, transform_indices = @transform_2, window_bounds = array<i64: 1, 128>}, {pipeline_mode = #tpu.pipeline_mode<synchronous>, transform_indices = @transform_3, window_bounds = array<i64: 640, 256>}, {pipeline_mode = #tpu.pipeline_mode<synchronous>, transform_indices = @transform_4, window_bounds = array<i64: 1, 256>}, {pipeline_mode = #tpu.pipeline_mode<synchronous>, transform_indices = @transform_5, window_bounds = array<i64: 256, 128>}, {pipeline_mode = #tpu.pipeline_mode<synchronous>, transform_indices = @transform_6, window_bounds = array<i64: 1, 128>}, {pipeline_mode = #tpu.pipeline_mode<synchronous>, transform_indices = @transform_7, window_bounds = array<i64: 128, 512>}, {pipeline_mode = #tpu.pipeline_mode<synchronous>, transform_indices = @transform_8, window_bounds = array<i64: 1, 512>}, {transform_indices = @transform_9, window_bounds = array<i64: 512, 1024>}, {transform_indices = @transform_10, window_bounds = array<i64: 1, 1024>}, {transform_indices = @transform_11, window_bounds = array<i64: 2, 1024>}]} {
    %c0_i32 = arith.constant 0 : i32
    %0 = arith.cmpi eq, %arg0, %c0_i32 : i32
    %1 = arith.extui %0 : i1 to i32
    %c0_i32_0 = arith.constant 0 : i32
    %2 = arith.cmpi ne, %1, %c0_i32_0 : i32
    scf.if %2 {
      %c0_8 = arith.constant 0 : index
      %c0_9 = arith.constant 0 : index
      %10 = vector.load %arg1[%c0_8, %c0_9] : memref<32x400xbf16, #tpu.memory_space<vmem>>, vector<32x400xbf16>
      %c0_10 = arith.constant 0 : index
      %c0_11 = arith.constant 0 : index
      %11 = vector.load %arg2[%c0_10, %c0_11] : memref<400x128xbf16, #tpu.memory_space<vmem>>, vector<400x128xbf16>
      %cst_12 = arith.constant dense<0.000000e+00> : vector<32x128xf32>
      %12 = tpu.matmul %10, %11, %cst_12 {dimension_numbers = #tpu.dot_dimension_numbers<[1], [0], [0], [1], [0, 0, 1, 1], [], []>} : vector<32x400xbf16>, vector<400x128xbf16>, vector<32x128xf32> -> vector<32x128xf32>
      %c0_13 = arith.constant 0 : index
      %c0_14 = arith.constant 0 : index
      %13 = vector.load %arg3[%c0_13, %c0_14] : memref<1x128xf32, #tpu.memory_space<vmem>>, vector<1x128xf32>
      %14 = vector.broadcast %13 : vector<1x128xf32> to vector<32x128xf32>
      %15 = arith.addf %12, %14 : vector<32x128xf32>
      %cst_15 = arith.constant 0.000000e+00 : f32
      %16 = vector.broadcast %cst_15 : f32 to vector<32x128xf32>
      %17 = arith.maximumf %15, %16 : vector<32x128xf32>
      %18 = arith.truncf %17 : vector<32x128xf32> to vector<32x128xbf16>
      %19 = vector.shape_cast %18 : vector<32x128xbf16> to vector<2x16x128xbf16>
      %cst_16 = arith.constant 0.000000e+00 : bf16
      %20 = vector.broadcast %cst_16 : bf16 to vector<2x2x128xbf16>
      %21 = tpu.concatenate %20, %19, %20 in 1 : vector<2x2x128xbf16>, vector<2x16x128xbf16>, vector<2x2x128xbf16> -> vector<2x20x128xbf16>
      %22 = vector.extract_strided_slice %21 {offsets = [0, 0, 0], sizes = [2, 16, 128], strides = [1, 1, 1]} : vector<2x20x128xbf16> to vector<2x16x128xbf16>
      %23 = vector.extract_strided_slice %21 {offsets = [0, 1, 0], sizes = [2, 16, 128], strides = [1, 1, 1]} : vector<2x20x128xbf16> to vector<2x16x128xbf16>
      %24 = vector.extract_strided_slice %21 {offsets = [0, 2, 0], sizes = [2, 16, 128], strides = [1, 1, 1]} : vector<2x20x128xbf16> to vector<2x16x128xbf16>
      %25 = vector.extract_strided_slice %21 {offsets = [0, 3, 0], sizes = [2, 16, 128], strides = [1, 1, 1]} : vector<2x20x128xbf16> to vector<2x16x128xbf16>
      %26 = vector.extract_strided_slice %21 {offsets = [0, 4, 0], sizes = [2, 16, 128], strides = [1, 1, 1]} : vector<2x20x128xbf16> to vector<2x16x128xbf16>
      %27 = tpu.concatenate %22, %23, %24, %25, %26 in 2 : vector<2x16x128xbf16>, vector<2x16x128xbf16>, vector<2x16x128xbf16>, vector<2x16x128xbf16>, vector<2x16x128xbf16> -> vector<2x16x640xbf16>
      %28 = vector.shape_cast %27 : vector<2x16x640xbf16> to vector<32x640xbf16>
      %c0_17 = arith.constant 0 : index
      %c0_18 = arith.constant 0 : index
      %29 = vector.load %arg4[%c0_17, %c0_18] : memref<640x256xbf16, #tpu.memory_space<vmem>>, vector<640x256xbf16>
      %cst_19 = arith.constant dense<0.000000e+00> : vector<32x256xf32>
      %30 = tpu.matmul %28, %29, %cst_19 {dimension_numbers = #tpu.dot_dimension_numbers<[1], [0], [0], [1], [0, 0, 1, 1], [], []>} : vector<32x640xbf16>, vector<640x256xbf16>, vector<32x256xf32> -> vector<32x256xf32>
      %c0_20 = arith.constant 0 : index
      %c0_21 = arith.constant 0 : index
      %31 = vector.load %arg5[%c0_20, %c0_21] : memref<1x256xf32, #tpu.memory_space<vmem>>, vector<1x256xf32>
      %32 = vector.broadcast %31 : vector<1x256xf32> to vector<32x256xf32>
      %33 = arith.addf %30, %32 : vector<32x256xf32>
      %cst_22 = arith.constant 0.000000e+00 : f32
      %34 = vector.broadcast %cst_22 : f32 to vector<32x256xf32>
      %35 = arith.maximumf %33, %34 : vector<32x256xf32>
      %36 = vector.shape_cast %35 : vector<32x256xf32> to vector<2x16x256xf32>
      %cst_23 = arith.constant dense<0.000000e+00> : vector<2x256xf32>
      %37 = vector.multi_reduction <add>, %36, %cst_23 [1] : vector<2x16x256xf32> to vector<2x256xf32>
      %cst_24 = arith.constant 1.600000e+01 : f32
      %38 = vector.broadcast %cst_24 : f32 to vector<2x256xf32>
      %39 = arith.divf %37, %38 : vector<2x256xf32>
      %40 = arith.truncf %39 : vector<2x256xf32> to vector<2x256xbf16>
      %c0_25 = arith.constant 0 : index
      %c0_26 = arith.constant 0 : index
      %41 = vector.load %arg6[%c0_25, %c0_26] : memref<256x128xbf16, #tpu.memory_space<vmem>>, vector<256x128xbf16>
      %cst_27 = arith.constant dense<0.000000e+00> : vector<2x128xf32>
      %42 = tpu.matmul %40, %41, %cst_27 {dimension_numbers = #tpu.dot_dimension_numbers<[1], [0], [0], [1], [0, 0, 1, 1], [], []>} : vector<2x256xbf16>, vector<256x128xbf16>, vector<2x128xf32> -> vector<2x128xf32>
      %c0_28 = arith.constant 0 : index
      %c0_29 = arith.constant 0 : index
      %43 = vector.load %arg7[%c0_28, %c0_29] : memref<1x128xf32, #tpu.memory_space<vmem>>, vector<1x128xf32>
      %44 = vector.broadcast %43 : vector<1x128xf32> to vector<2x128xf32>
      %45 = arith.addf %42, %44 : vector<2x128xf32>
      %46 = arith.truncf %45 : vector<2x128xf32> to vector<2x128xbf16>
      %c0_30 = arith.constant 0 : index
      %c0_31 = arith.constant 0 : index
      %47 = vector.load %arg8[%c0_30, %c0_31] : memref<128x512xbf16, #tpu.memory_space<vmem>>, vector<128x512xbf16>
      %cst_32 = arith.constant dense<0.000000e+00> : vector<2x512xf32>
      %48 = tpu.matmul %46, %47, %cst_32 {dimension_numbers = #tpu.dot_dimension_numbers<[1], [0], [0], [1], [0, 0, 1, 1], [], []>} : vector<2x128xbf16>, vector<128x512xbf16>, vector<2x512xf32> -> vector<2x512xf32>
      %c0_33 = arith.constant 0 : index
      %c0_34 = arith.constant 0 : index
      %49 = vector.load %arg9[%c0_33, %c0_34] : memref<1x512xf32, #tpu.memory_space<vmem>>, vector<1x512xf32>
      %50 = vector.broadcast %49 : vector<1x512xf32> to vector<2x512xf32>
      %51 = arith.addf %48, %50 : vector<2x512xf32>
      %cst_35 = arith.constant 0.000000e+00 : f32
      %52 = vector.broadcast %cst_35 : f32 to vector<2x512xf32>
      %53 = arith.maximumf %51, %52 : vector<2x512xf32>
      %54 = arith.truncf %53 : vector<2x512xf32> to vector<2x512xbf16>
      %c0_36 = arith.constant 0 : index
      %c0_37 = arith.constant 0 : index
      %55 = vector.load %arg13[%c0_36, %c0_37] : memref<2x512xbf16, #tpu.memory_space<vmem>>, vector<2x512xbf16>
      tpu.vector_store %arg13[%c0_36, %c0_37], %54 {strides = array<i32>} : memref<2x512xbf16, #tpu.memory_space<vmem>>, vector<2x512xbf16>,
    } else {
    }
    %c0 = arith.constant 0 : index
    %c0_1 = arith.constant 0 : index
    %3 = vector.load %arg13[%c0, %c0_1] : memref<2x512xbf16, #tpu.memory_space<vmem>>, vector<2x512xbf16>
    %c0_2 = arith.constant 0 : index
    %c0_3 = arith.constant 0 : index
    %4 = vector.load %arg10[%c0_2, %c0_3] : memref<512x1024xbf16, #tpu.memory_space<vmem>>, vector<512x1024xbf16>
    %cst = arith.constant dense<0.000000e+00> : vector<2x1024xf32>
    %5 = tpu.matmul %3, %4, %cst {dimension_numbers = #tpu.dot_dimension_numbers<[1], [0], [0], [1], [0, 0, 1, 1], [], []>} : vector<2x512xbf16>, vector<512x1024xbf16>, vector<2x1024xf32> -> vector<2x1024xf32>
    %c0_4 = arith.constant 0 : index
    %c0_5 = arith.constant 0 : index
    %6 = vector.load %arg11[%c0_4, %c0_5] : memref<1x1024xf32, #tpu.memory_space<vmem>>, vector<1x1024xf32>
    %7 = vector.broadcast %6 : vector<1x1024xf32> to vector<2x1024xf32>
    %8 = arith.addf %5, %7 : vector<2x1024xf32>
    %c0_6 = arith.constant 0 : index
    %c0_7 = arith.constant 0 : index
    %9 = vector.load %arg12[%c0_6, %c0_7] : memref<2x1024xf32, #tpu.memory_space<vmem>>, vector<2x1024xf32>
    tpu.vector_store %arg12[%c0_6, %c0_7], %8 {strides = array<i32>} : memref<2x1024xf32, #tpu.memory_space<vmem>>, vector<2x1024xf32>,
    return
  }
  func.func @transform_0(%arg0: i32) -> (i32, i32) {
    %c0_i32 = arith.constant 0 : i32
    %c0_i32_0 = arith.constant 0 : i32
    %c0_i32_1 = arith.constant 0 : i32
    return %c0_i32, %c0_i32_0 : i32, i32
  }
  func.func @transform_1(%arg0: i32) -> (i32, i32) {
    %c0_i32 = arith.constant 0 : i32
    %c0_i32_0 = arith.constant 0 : i32
    %c0_i32_1 = arith.constant 0 : i32
    return %c0_i32, %c0_i32_0 : i32, i32
  }
  func.func @transform_2(%arg0: i32) -> (i32, i32) {
    %c0_i32 = arith.constant 0 : i32
    %c0_i32_0 = arith.constant 0 : i32
    %c0_i32_1 = arith.constant 0 : i32
    return %c0_i32, %c0_i32_0 : i32, i32
  }
  func.func @transform_3(%arg0: i32) -> (i32, i32) {
    %c0_i32 = arith.constant 0 : i32
    %c0_i32_0 = arith.constant 0 : i32
    %c0_i32_1 = arith.constant 0 : i32
    return %c0_i32, %c0_i32_0 : i32, i32
  }
  func.func @transform_4(%arg0: i32) -> (i32, i32) {
    %c0_i32 = arith.constant 0 : i32
    %c0_i32_0 = arith.constant 0 : i32
    %c0_i32_1 = arith.constant 0 : i32
    return %c0_i32, %c0_i32_0 : i32, i32
  }
  func.func @transform_5(%arg0: i32) -> (i32, i32) {
    %c0_i32 = arith.constant 0 : i32
    %c0_i32_0 = arith.constant 0 : i32
    %c0_i32_1 = arith.constant 0 : i32
    return %c0_i32, %c0_i32_0 : i32, i32
  }
  func.func @transform_6(%arg0: i32) -> (i32, i32) {
    %c0_i32 = arith.constant 0 : i32
    %c0_i32_0 = arith.constant 0 : i32
    %c0_i32_1 = arith.constant 0 : i32
    return %c0_i32, %c0_i32_0 : i32, i32
  }
  func.func @transform_7(%arg0: i32) -> (i32, i32) {
    %c0_i32 = arith.constant 0 : i32
    %c0_i32_0 = arith.constant 0 : i32
    %c0_i32_1 = arith.constant 0 : i32
    return %c0_i32, %c0_i32_0 : i32, i32
  }
  func.func @transform_8(%arg0: i32) -> (i32, i32) {
    %c0_i32 = arith.constant 0 : i32
    %c0_i32_0 = arith.constant 0 : i32
    %c0_i32_1 = arith.constant 0 : i32
    return %c0_i32, %c0_i32_0 : i32, i32
  }
  func.func @transform_9(%arg0: i32) -> (i32, i32) {
    %c0_i32 = arith.constant 0 : i32
    %c0_i32_0 = arith.constant 0 : i32
    return %c0_i32, %arg0 : i32, i32
  }
  func.func @transform_10(%arg0: i32) -> (i32, i32) {
    %c0_i32 = arith.constant 0 : i32
    %c0_i32_0 = arith.constant 0 : i32
    return %c0_i32, %arg0 : i32, i32
  }
  func.func @transform_11(%arg0: i32) -> (i32, i32) {
    %c0_i32 = arith.constant 0 : i32
    %c0_i32_0 = arith.constant 0 : i32
    return %c0_i32, %arg0 : i32, i32
  }
}

</mosaic_0001>

<bundles_post_ra>
// kernel: voice_cloner_forward.1
= control target key start
LH: loop header
LB: loop body
LE: loop exit
PB: predicated region body
PF: predicated region fallthrough
CT: control target
= control target key end

     0   :  { %s8022_s0 = inlined_call_operand.vmem [shape: bf16[32,400], index: 0, kind: input, shape index: {}]   ;;  %s8023_s1 = inlined_call_operand.hbm [shape: bf16[400,128], index: 1, kind: input, shape index: {}]   ;;  %s8024_s2 = inlined_call_operand.hbm [shape: f32[1,128], index: 2, kind: input, shape index: {}]   ;;  %s8025_s3 = inlined_call_operand.hbm [shape: bf16[640,256], index: 3, kind: input, shape index: {}]   ;;  %s8026_s4 = inlined_call_operand.hbm [shape: f32[1,256], index: 4, kind: input, shape index: {}]   ;;  %s8027_s5 = inlined_call_operand.hbm [shape: bf16[256,128], index: 5, kind: input, shape index: {}]   ;;  %s8028_s6 = inlined_call_operand.hbm [shape: f32[1,128], index: 6, kind: input, shape index: {}]   ;;  %s8029_s7 = inlined_call_operand.hbm [shape: bf16[128,512], index: 7, kind: input, shape index: {}]   ;;  %s8030_s8 = inlined_call_operand.hbm [shape: f32[1,512], index: 8, kind: input, shape index: {}]   ;;  %s8031_s9 = inlined_call_operand.hbm [shape: bf16[512,4096], index: 9, kind: input, shape index: {}]   ;;  %s8032_s10 = inlined_call_operand.hbm [shape: f32[1,4096], index: 10, kind: input, shape index: {}]   ;;  %s8033_s11 = inlined_call_operand.vmem [shape: f32[2,4096], index: 11, kind: output, shape index: {}]  }
   0x1   :  { %8039 = sst [smem:[#allocation26_spill]] %s8023_s1 }
   0x2   :  { %8040 = sst [smem:[#allocation27_spill]] %s8024_s2 }
   0x3   :  { %8041 = sst [smem:[#allocation28_spill]] %s8025_s3 }
   0x4   :  { %8042 = sst [smem:[#allocation29_spill]] %s8026_s4 }
   0x5   :  { %8043 = sst [smem:[#allocation30_spill]] %s8028_s6 }
   0x6   :  { %8044 = sst [smem:[#allocation31_spill]] %s8031_s9 }
   0x7   :  { %16 = vsyncpa [#allocation4], 0 }
   0x8   :  { %17 = vsyncpa [#allocation6], 0 }
   0x9   :  { %18 = vsyncpa [#allocation9], 0 }
   0xa   :  { %19 = vsyncpa [#allocation12], 0 }
   0xb   :  { %20 = vsyncpa [#allocation15], 0  ;;  %s7058_s17 = smov 0   ;;  %s7060_s18 = smov 0  }
   0xc   :  { %s7062_s19 = smov 0   ;;  %s7064_s20 = smov 0  }
   0xd LB: > { %s8045_s1 = sld [smem:[#allocation26_spill]]  ;;  %s7082_s24 = sadd.s32 4294967295, %s6978_s20   ;;  %s6978_s20 = sphi %s7064_s20, %s8062_s20   ;;  %s6974_s19 = sphi %s7062_s19, %s8066_s19   ;;  %s6970_s18 = sphi %s7060_s18, %s8065_s18   ;;  %s6966_s17 = sphi %s7058_s17, %s8064_s17  }
   0xe   : > { %p4354_p0 = scmp.ge.s32.totalorder %s6978_s20, 1  ;;  %p236_p1 = scmp.eq.s32.totalorder %s7082_s24, 0 }
   0xf   : > { %p298_p2 = scmp.lt.s32.totalorder %s6978_s20, 5  ;;  %p4355_p3 = scmp.ne.s32.totalorder %s7082_s24, 0 }
  0x10   : > { %s6980_s26 = smov [#allocation3]   ;;  %s8047_s2 = sld [smem:[#allocation27_spill]] }
  0x11   : > { %p7088_p4 = pnand %p4354_p0, %p298_p2  ;;  %s314_s27 = sshll.u32 %s6980_s26, 4  ;;  %s315_s27 = int_to_ptr.vmem [resolvable:$true] %s314_s27 }
  0x12   : > { %s8049_s4 = sld [smem:[#allocation29_spill]]  ;;  %s6981_s16 = smov [#allocation5]  }
  0x13   : > { %s312_s23 = sshll.u32 %s8045_s1, 4  ;;  %p6517_p5 = pneg %p7088_p4  ;;  %s313_s23 = int_to_ptr.hbm [resolvable:$true] %s312_s23 }
  0x14   : > { %s329_s21 = sshll.u32 %s6981_s16, 4  ;;  %s8034_s22 = smov 64   ;;  %s330_s21 = int_to_ptr.vmem [resolvable:$true] %s329_s21 }
  0x15   : > { %p7099_p6 = pnand %p6517_p5, %p236_p1  ;;  %s8035_s26 = smov 4  }
  0x16   : > { %s327_s30 = sshll.u32 %s8047_s2, 4  ;;  %s8050_s6 = sld [smem:[#allocation30_spill]]  ;;  %s328_s30 = int_to_ptr.hbm [resolvable:$true] %s327_s30 }
  0x17   : > { %6520 = dma.hbm_to_vmem [thread:$0]  (!%p7099_p6), %s313_s23, 3200, %s315_s27, [#allocation4], %s8034_s22, %s8034_s22, %s8035_s26  }
  0x18   : > { %s353_s15 = sshll.u32 %s8049_s4, 4  ;;  %s6984_s14 = smov [#allocation8]   ;;  %s354_s15 = int_to_ptr.hbm [resolvable:$true] %s353_s15 }
  0x19   : > { %6523 = dma.hbm_to_vmem [thread:$0]  (!%p7099_p6), %s328_s30, 16, %s330_s21, [#allocation6]  }
  0x1a   : > { %s355_s16 = sshll.u32 %s6984_s14, 4  ;;  %s6985_s23 = smov [#allocation11]   ;;  %s356_s16 = int_to_ptr.vmem [resolvable:$true] %s355_s16 }
  0x1b   : > { %6529 = dma.hbm_to_vmem [thread:$0]  (!%p7099_p6), %s354_s15, 32, %s356_s16, [#allocation9]  }
  0x1c   : > { %s379_s13 = sshll.u32 %s8050_s6, 4  ;;  %s381_s27 = sshll.u32 %s6985_s23, 4  ;;  %s380_s13 = int_to_ptr.hbm [resolvable:$true] %s379_s13  ;;  %s382_s27 = int_to_ptr.vmem [resolvable:$true] %s381_s27 }
  0x1d   : > { %6535 = dma.hbm_to_vmem [thread:$0]  (!%p7099_p6), %s380_s13, 16, %s382_s27, [#allocation12]  }
  0x1e   : > { %s7121_s30 = sadd.s32 1, %s6978_s20   ;;  %s222_s21 = sadd.s32 1, %s6974_s19 }
  0x1f   : > { %8051 = sst [smem:[#allocation24_spill]] %s7121_s30  ;;  %s219_s28 = ssub.s32 %s6978_s20, %s7121_s30 }
  0x20   : > { %p229_p7 = scmp.ne.s32.totalorder %s6974_s19, %s6970_s18  ;;  %p220_p8 = scmp.eq.s32.totalorder %s219_s28, 0 }
  0x21   : > { %p230_p9 = scmp.eq.s32.totalorder %s6978_s20, 0  ;;  %p235_p10 = scmp.ne.s32.totalorder %s6970_s18, %s6966_s17 }
  0x22   : > { %p6557_p11 = scmp.lt.s32.totalorder %s6978_s20, 4  ;;  %s418_s13 = sand.u32 1, %s6978_s20  }
  0x23   : > { %s7133_s15 = scalar_select %p220_p8, %s6974_s19, %s222_s21  }
  0x24   : > { %p231_p12 = por %p230_p9, %p229_p7  ;;  %p7137_p13 = por %p236_p1, %p235_p10 }
  0x25   : > { %8052 = sst [smem:[#allocation25_spill]] %s7133_s15  ;;  %s8036_s14 = sand.u32 1, %s6974_s19  }
  0x26   : > { %s4364_s16 = sshll.u32 %s8036_s14, 11  ;;  %s6063_s23 = sshll.u32 %s6978_s20, 5 }
  0x27   : > { %s8054_s9 = sld [smem:[#allocation31_spill]]  ;;  %s422_s26 = scalar_lea.vmem [#allocation16], %s4364_s16 }
  0x28   : > { %s430_s17 = sshll.u32 %s422_s26, 4  ;;  %p7151_p0 = pnand %p6557_p11, %p231_p12  ;;  %s431_s17 = int_to_ptr.vmem [resolvable:$true] %s430_s17 }
  0x29   : > { %s7155_s2 = scalar_lea.sflag [#allocation4], %s418_s13 }
  0x2a   : > { %p6748_p5 = pneg %p7151_p0 }
  0x2d   : > { %s427_s28 = scalar_lea.hbm %s8054_s9, %s6063_s23  ;;  %s6751_s16 = scalar_lea.hbm %s8054_s9, 8192 }
  0x2e   : > { %s428_s1 = sshll.u32 %s427_s28, 4  ;;  %s429_s1 = int_to_ptr.hbm [resolvable:$true] %s428_s1 }
  0x2f   : > { %s6744_s14 = sshra.s32 %s429_s1, 4  ;;  %s6745_s14 = int_to_ptr.hbm [resolvable:$true] %s6744_s14 }
  0x30   : > { %s6746_s4 = scalar_lea.hbm %s6745_s14, 2048  ;;  %p6752_p9 = scmp.lt.s32.totalorder %s6745_s14, %s8054_s9 }
  0x31   : > { %p6747_p2 = scmp.ne.s32.totalorder %s6745_s14, %s6746_s4  ;;  %p6753_p10 = scmp.lt.s32.totalorder %s6751_s16, %s6746_s4 }
  0x33   : > { %p6749_p7 = pnand %p6748_p5, %p6747_p2  ;;  %p6754_p11 = por %p6753_p10, %p6752_p9 }
  0x35   : > { %p6750_p8 = pneg %p6749_p7 }
  0x37   : > { %p6755_p12 = pnand %p6754_p11, %p6750_p8 }
  0x39   : > { %6758 = shalt.err (!%p6755_p12)
}
  0x3a   : > { %s6986_s13 = smov 2048   ;;  %s6987_s28 = smov 512  }
  0x3b   : > { %s6988_s6 = smov 32   ;;  %s8056_s3 = sld [smem:[#allocation28_spill]] }
  0x3c   : > { %6545 = dma.hbm_to_vmem [thread:$0]  (!%p7151_p0), %s429_s1, 32768, %s431_s17, %s7155_s2, %s6986_s13, %s6987_s28, %s6988_s6  }
  0x3d   : > { %s6989_s26 = smov [#allocation7]   ;;  %s364_s23 = sshll.u32 %s8027_s5, 4  ;;  %s365_s23 = int_to_ptr.hbm [resolvable:$true] %s364_s23 }
  0x3e   : > { %s340_s14 = sshll.u32 %s6989_s26, 4  ;;  %s6990_s27 = smov 128   ;;  %s341_s14 = int_to_ptr.vmem [resolvable:$true] %s340_s14 }
  0x3f   : > { %s6991_s9 = smov 8   ;;  %s6992_s1 = smov [#allocation10]  }
  0x40   : > { %s366_s6 = sshll.u32 %s6992_s1, 4  ;;  %s390_s17 = sshll.u32 %s8029_s7, 4  ;;  %s367_s6 = int_to_ptr.vmem [resolvable:$true] %s366_s6  ;;  %s391_s17 = int_to_ptr.hbm [resolvable:$true] %s390_s17 }
  0x41   : > { %s338_s22 = sshll.u32 %s8056_s3, 4  ;;  %s8057_s13 = smov 4   ;;  %s339_s22 = int_to_ptr.hbm [resolvable:$true] %s338_s22 }
  0x42   : > { %6526 = dma.hbm_to_vmem [thread:$0]  (!%p7099_p6), %s339_s22, 10240, %s341_s14, [#allocation6], %s6990_s27, %s6990_s27, %s6991_s9  }
  0x43   : > { %s8058_s28 = smov 64   ;;  %s6993_s26 = smov [#allocation13]  }
  0x44   : > { %6532 = dma.hbm_to_vmem [thread:$0]  (!%p7099_p6), %s365_s23, 2048, %s367_s6, [#allocation9], %s8058_s28, %s8058_s28, %s8057_s13  }
  0x45   : > { %s392_s4 = sshll.u32 %s6993_s26, 4  ;;  %s405_s14 = sshll.u32 %s8030_s8, 4  ;;  %s393_s4 = int_to_ptr.vmem [resolvable:$true] %s392_s4  ;;  %s406_s14 = int_to_ptr.hbm [resolvable:$true] %s405_s14 }
  0x46   : > { %s6994_s16 = smov 256   ;;  %s6995_s27 = smov 16  }
  0x47   : > { %6538 = dma.hbm_to_vmem [thread:$0]  (!%p7099_p6), %s391_s17, 4096, %s393_s4, [#allocation12], %s6994_s16, %s6994_s16, %s6995_s27  }
  0x48   : > { %s6996_s1 = smov [#allocation14]   ;;  %s8059_s15 = sand.u32 1, %s6974_s19  }
  0x49   : > { %s407_s30 = sshll.u32 %s6996_s1, 4  ;;  %s4367_s3 = sshll.u32 %s8059_s15, 3  ;;  %s408_s30 = int_to_ptr.vmem [resolvable:$true] %s407_s30 }
  0x4a   : > { %6541 = dma.hbm_to_vmem [thread:$0]  (!%p7099_p6), %s406_s14, 64, %s408_s30, [#allocation15]  }
  0x4b   : > { %s4368_s23 = sshll.u32 %s6978_s20, 3  ;;  %s444_s6 = scalar_lea.vmem [#allocation17], %s4367_s3 }
  0x4c   : > { %s452_s13 = sshll.u32 %s444_s6, 4  ;;  %s448_s9 = scalar_lea.hbm %s8032_s10, %s4368_s23  ;;  %s453_s13 = int_to_ptr.vmem [resolvable:$true] %s452_s13 }
  0x4d   : > { %s450_s22 = sshll.u32 %s448_s9, 4  ;;  %s6901_s3 = scalar_lea.hbm %s8032_s10, 32  ;;  %s451_s22 = int_to_ptr.hbm [resolvable:$true] %s450_s22 }
  0x4e   : > { %s6894_s17 = sshra.s32 %s451_s22, 4  ;;  %s6895_s17 = int_to_ptr.hbm [resolvable:$true] %s6894_s17 }
  0x4f   : > { %s6896_s4 = scalar_lea.hbm %s6895_s17, 8  ;;  %p6902_p6 = scmp.lt.s32.totalorder %s6895_s17, %s8032_s10 }
  0x50   : > { %p6897_p2 = scmp.ne.s32.totalorder %s6895_s17, %s6896_s4  ;;  %p6903_p9 = scmp.lt.s32.totalorder %s6901_s3, %s6896_s4 }
  0x52   : > { %p6899_p7 = pnand %p6897_p2, %p6748_p5  ;;  %p6904_p10 = por %p6903_p9, %p6902_p6 }
  0x54   : > { %p6900_p8 = pneg %p6899_p7 }
  0x56   : > { %p6905_p11 = pnand %p6904_p10, %p6900_p8 }
  0x58   : > { %6908 = shalt.err (!%p6905_p11)
}
  0x59   : > { %6548 = dma.hbm_to_vmem [thread:$0]  (!%p7151_p0), %s451_s22, 128, %s453_s13, %s7155_s2  }
  0x5a   : > { %461 = sbr.rel (%p7088_p4) target bundleno = 1265 (0x4f1), region = 64 }
  0x5f   : > { %6941 = dma.done.wait (%p236_p1), [#allocation4], 3200  }
  0x60   : > { %6943 = vsyncadd (%p236_p1), [#allocation4], 4294964096 }
  0x61   : > { %6945 = dma.done.wait (%p236_p1), [#allocation6], 10256  }
  0x62   : > { %6947 = vsyncadd (%p236_p1), [#allocation6], 4294957040 }
  0x63   : > { %6949 = dma.done.wait (%p236_p1), [#allocation9], 2080  }
  0x64   : > { %6951 = vsyncadd (%p236_p1), [#allocation9], 4294965216 }
  0x65   : > { %6953 = dma.done.wait (%p236_p1), [#allocation12], 4112  }
  0x66   : > { %6955 = vsyncadd (%p236_p1), [#allocation12], 4294963184 }
  0x67   : > { %6957 = dma.done.wait (%p236_p1), [#allocation15], 64  }
  0x68   : > { %6959 = vsyncadd (%p236_p1), [#allocation15], 4294967232  ;;  %s503_s2 = sand.u32 1, %s7082_s24   ;;  %s505_s25 = sand.u32 1, %s6970_s18  }
  0x69   : > { %s4378_s21 = sshll.u32 %s505_s25, 11  ;;  %s504_s27 = scalar_lea.sflag [#allocation4], %s503_s2 }
  0x6a   : > { %s7236_s1 = scalar_lea.vmem [#allocation16], %s4378_s21 }
  0x6b   : > { %6961 = dma.done.wait (%p7137_p13), %s504_s27, 32896  }
  0x6c   : > { %6963 = vsyncadd (%p7137_p13), %s504_s27, 4294934400  ;;  %s7242_s30 = sshll.u32 %s505_s25, 3  ;;  %s4380_s15 = sshll.u32 %s7082_s24, 3 }
  0x6d   : > { %p565_p1 = scmp.lt.s32.totalorder %s4380_s15, 31  ;;  %s517_s26 = scalar_lea.vmem [#allocation17], %s7242_s30 }
  0x6e   : > { %574 = sbr.rel (%p4355_p3) target bundleno = 832 (0x340), region = 108 }
  0x6f   : > { %s8068_s15 = smov (!%p565_p1, %s4380_s15), 31 }
  0x70   : > { %s4381_s23 = sshll.u32 %s8068_s15, 1 }
  0x71   : > { %s7248_s28 = scalar_lea.vmem %s8033_s11, %s4381_s23 }
  0x73   : > { %v6079_v0 = vld [vmem:[#allocation3 + $0x38] sm:$0xff]  ;;  %v6078_v3 = vld [vmem:[#allocation3 + $0x30] sm:$0xff]  ;;  %v6077_v6 = vld [vmem:[#allocation3 + $0x28] sm:$0xff]  ;;  %vm825_vm0 = vcmask 130048   ;;  %vm928_vm1 = vcmask 1040384   ;;  %vm965_vm3 = vcmask 1046528  }
  0x74   : > { %v6087_v1 = vld [vmem:[#allocation3 + $0x78] sm:$0xff]  ;;  %832 = vmatpush.bf16.msra.mxu0 %v6079_v0  ;;  %v6086_v4 = vld [vmem:[#allocation3 + $0x70] sm:$0xff]  ;;  %v6085_v7 = vld [vmem:[#allocation3 + $0x68] sm:$0xff]  ;;  %vm938_vm4 = vsmask.f32 7424  ;;  %vm995_vm6 = vcmask 1045504  }
  0x75   : > { %v6095_v2 = vld [vmem:[#allocation3 + $0xb8] sm:$0xff]  ;;  %851 = vmatpush.bf16.msra.mxu1 %v6087_v1  ;;  %v6094_v5 = vld [vmem:[#allocation3 + $0xb0] sm:$0xff]  ;;  %v6096_v8 = vld [vmem:[#allocation3 + $0xc0] sm:$0xff]  ;;  %vm974_vm5 = vsmask.f32 6400  ;;  %vm1775_vm8 = vcmask 1041409  }
  0x76   : > { %870 = vmatpush.bf16.msra.mxu2 %v6095_v2  ;;  %v6093_v9 = vld [vmem:[#allocation3 + $0xa8] sm:$0xff]  ;;  %v6065_v10 = vld [vmem:[%s8022_s0 + $0xc] sm:$0xf]  ;;  %v4395_v11 = vld [vmem:[%s8022_s0 + $0x18] sm:$0xf0]  ;;  %896 = vmatpush.bf16.msra.mxu3 %v6096_v8  ;;  %vm2173_vm9 = vcmask 1042434  }
  0x77   : > { %v4398_v12 = vor.u32 %v6065_v10, %v4395_v11  ;;  %v6076_v13 = vld [vmem:[#allocation3 + $0x20] sm:$0xff]  ;;  %v6075_v16 = vld [vmem:[#allocation3 + $0x18] sm:$0xff]  ;;  %v6074_v19 = vld [vmem:[#allocation3 + $0x10] sm:$0xff]  ;;  %vm2177_vm10 = vcmask 1041408  }
  0x78   : > { %833 = vmatpush.bf16.msra.mxu0 %v6078_v3  ;;  %v6084_v14 = vld [vmem:[#allocation3 + $0x60] sm:$0xff]  ;;  %v6083_v17 = vld [vmem:[#allocation3 + $0x58] sm:$0xff]  ;;  %v6082_v20 = vld [vmem:[#allocation3 + $0x50] sm:$0xff] }
  0x79   : > { %852 = vmatpush.bf16.msra.mxu1 %v6086_v4  ;;  %v6092_v15 = vld [vmem:[#allocation3 + $0xa0] sm:$0xff]  ;;  %4515 = vmatmul.msk.bf16.vlgmr.msra.gmra.mxu3 %vm825_vm0, %v4398_v12  ;;  %v6091_v18 = vld [vmem:[#allocation3 + $0x98] sm:$0xff]  ;;  %v6090_v23 = vld [vmem:[#allocation3 + $0x90] sm:$0xff] }
  0x7a   : > { %871 = vmatpush.bf16.msra.mxu2 %v6094_v5  ;;  %v4575_v21 = vld [vmem:[#allocation7 + $0x70] sm:$0xf]  ;;  %v6112_v22 = vld [vmem:[#allocation7 + $0x74] sm:$0xf0]  ;;  %v4411_v26 = vld [vmem:[%s8022_s0 + $0x38] sm:$0xf0] }
  0x7b   : > { %v4576_v24 = vor.u32 %v6112_v22, %v4575_v21  ;;  %v6069_v25 = vld [vmem:[%s8022_s0 + $0x2c] sm:$0xf]  ;;  %v6073_v27 = vld [vmem:[#allocation3 + $0x8] sm:$0xff]  ;;  %v4385_v33 = vld [vmem:[%s8022_s0] sm:$0xf] }
  0x7c   : > { %834 = vmatpush.bf16.msra.mxu0 %v6077_v6  ;;  %v6081_v28 = vld [vmem:[#allocation3 + $0x48] sm:$0xff]  ;;  %v4414_v30 = vor.u32 %v6069_v25, %v4411_v26  ;;  %v6072_v31 = vld [vmem:[#allocation3] sm:$0xff]  ;;  %v6064_v35 = vld [vmem:[%s8022_s0 + $0x4] sm:$0xf] }
  0x7d   : > { %853 = vmatpush.bf16.msra.mxu1 %v6085_v7  ;;  %1490 = vmatpush.bf16.msrb.mxu3 %v4576_v24  ;;  %v6089_v29 = vld [vmem:[#allocation3 + $0x88] sm:$0xff]  ;;  %v6080_v32 = vld [vmem:[#allocation3 + $0x40] sm:$0xff]  ;;  %v4393_v38 = vld [vmem:[%s8022_s0 + $0x8] sm:$0xf] }
  0x7e   : > { %872 = vmatpush.bf16.msra.mxu2 %v6093_v9  ;;  %v6066_v34 = vld [vmem:[%s8022_s0 + $0xc] sm:$0xf0]  ;;  %v4387_v36 = vld [vmem:[%s8022_s0 + $0x10] sm:$0xf0]  ;;  %v6067_v39 = vld [vmem:[%s8022_s0 + $0x14] sm:$0xf0] }
  0x7f   : > { %v6088_v37 = vld [vmem:[#allocation3 + $0x80] sm:$0xff]  ;;  %v4386_v40 = vor.u32 %v6066_v34, %v4385_v33  ;;  %v4390_v41 = vor.u32 %v6064_v35, %v4387_v36  ;;  %v4394_v42 = vor.u32 %v6067_v39, %v4393_v38  ;;  %v4401_v43 = vld [vmem:[%s8022_s0 + $0x20] sm:$0xf]  ;;  %v6068_v45 = vld [vmem:[%s8022_s0 + $0x24] sm:$0xf] }
  0x80   : > { %835 = vmatpush.bf16.msra.mxu0 %v6076_v13  ;;  %v6070_v44 = vld [vmem:[%s8022_s0 + $0x2c] sm:$0xf0]  ;;  %v4403_v46 = vld [vmem:[%s8022_s0 + $0x30] sm:$0xf0]  ;;  %v4409_v47 = vld [vmem:[%s8022_s0 + $0x28] sm:$0xf] }
  0x81   : > { %854 = vmatpush.bf16.msra.mxu1 %v6084_v14  ;;  %v6071_v48 = vld [vmem:[%s8022_s0 + $0x34] sm:$0xf0]  ;;  %v4402_v49 = vor.u32 %v6070_v44, %v4401_v43  ;;  %v4406_v50 = vor.u32 %v6068_v45, %v4403_v46  ;;  %v6110_v53 = vld [vmem:[#allocation7 + $0x64] sm:$0xf0]  ;;  %v4703_v54 = vld [vmem:[#allocation7 + $0x170] sm:$0xf] }
  0x82   : > { %873 = vmatpush.bf16.msra.mxu2 %v6092_v15  ;;  %v4410_v51 = vor.u32 %v6071_v48, %v4409_v47  ;;  %v4567_v52 = vld [vmem:[#allocation7 + $0x60] sm:$0xf]  ;;  %v6144_v56 = vld [vmem:[#allocation7 + $0x174] sm:$0xf0]  ;;  %v4559_v58 = vld [vmem:[#allocation7 + $0x50] sm:$0xf] }
  0x83   : > { %v4568_v55 = vor.u32 %v6110_v53, %v4567_v52  ;;  %v4704_v57 = vor.u32 %v6144_v56, %v4703_v54  ;;  %v6108_v59 = vld [vmem:[#allocation7 + $0x54] sm:$0xf0]  ;;  %v4639_v60 = vld [vmem:[#allocation7 + $0xf0] sm:$0xf]  ;;  %v4695_v63 = vld [vmem:[#allocation7 + $0x160] sm:$0xf] }
  0x84   : > { %836 = vmatpush.bf16.msra.mxu0 %v6075_v16  ;;  %v4560_v61 = vor.u32 %v6108_v59, %v4559_v58  ;;  %v6128_v62 = vld [vmem:[#allocation7 + $0xf4] sm:$0xf0]  ;;  %v6142_v0 = vld [vmem:[#allocation7 + $0x164] sm:$0xf0]  ;;  %v4767_v3 = vld [vmem:[#allocation7 + $0x1f0] sm:$0xf] }
  0x85   : > { %855 = vmatpush.bf16.msra.mxu1 %v6083_v17  ;;  %1491 = vmatpush.bf16.msrb.mxu3 %v4568_v55  ;;  %v4640_v1 = vor.u32 %v6128_v62, %v4639_v60  ;;  %v4696_v2 = vor.u32 %v6142_v0, %v4695_v63  ;;  %v6160_v4 = vld [vmem:[#allocation7 + $0x1f4] sm:$0xf0]  ;;  %v4551_v6 = vld [vmem:[#allocation7 + $0x40] sm:$0xf]  ;;  %v6106_v7 = vld [vmem:[#allocation7 + $0x44] sm:$0xf0] }
  0x86   : > { %874 = vmatpush.bf16.msra.mxu2 %v6091_v18  ;;  %v4768_v5 = vor.u32 %v6160_v4, %v4767_v3  ;;  %v4631_v8 = vld [vmem:[#allocation7 + $0xe0] sm:$0xf]  ;;  %v4552_v9 = vor.u32 %v6106_v7, %v4551_v6  ;;  %v6126_v10 = vld [vmem:[#allocation7 + $0xe4] sm:$0xf0]  ;;  %v4687_v11 = vld [vmem:[#allocation7 + $0x150] sm:$0xf] }
  0x87   : > { %v6140_v12 = vld [vmem:[#allocation7 + $0x154] sm:$0xf0]  ;;  %v4632_v13 = vor.u32 %v6126_v10, %v4631_v8  ;;  %v4759_v15 = vld [vmem:[#allocation7 + $0x1e0] sm:$0xf]  ;;  %v6158_v16 = vld [vmem:[#allocation7 + $0x1e4] sm:$0xf0] }
  0x88   : > { %837 = vmatpush.bf16.msra.mxu0 %v6074_v19  ;;  %v4688_v14 = vor.u32 %v6140_v12, %v4687_v11  ;;  %v4760_v17 = vor.u32 %v6158_v16, %v4759_v15  ;;  %v4543_v18 = vld [vmem:[#allocation7 + $0x30] sm:$0xf]  ;;  %v6104_v19 = vld [vmem:[#allocation7 + $0x34] sm:$0xf0]  ;;  %v6138_v24 = vld [vmem:[#allocation7 + $0x144] sm:$0xf0] }
  0x89   : > { %856 = vmatpush.bf16.msra.mxu1 %v6082_v20  ;;  %4516 = vmatmul.msk.bf16.gmra.mxu3 %vm825_vm0, %v4414_v30  ;;  %v4623_v20 = vld [vmem:[#allocation7 + $0xd0] sm:$0xf]  ;;  %v4544_v21 = vor.u32 %v6104_v19, %v4543_v18  ;;  %v6124_v22 = vld [vmem:[#allocation7 + $0xd4] sm:$0xf0]  ;;  %v4535_v30 = vld [vmem:[#allocation7 + $0x20] sm:$0xf] }
  0x8a   : > { %875 = vmatpush.bf16.msra.mxu2 %v6090_v23  ;;  %1492 = vmatpush.bf16.msrb.mxu3 %v4560_v61  ;;  %v4679_v23 = vld [vmem:[#allocation7 + $0x140] sm:$0xf]  ;;  %v4624_v25 = vor.u32 %v6124_v22, %v4623_v20  ;;  %v6122_v34 = vld [vmem:[#allocation7 + $0xc4] sm:$0xf0]  ;;  %v4671_v35 = vld [vmem:[#allocation7 + $0x130] sm:$0xf] }
  0x8b   : > { %v4680_v26 = vor.u32 %v6138_v24, %v4679_v23  ;;  %v6136_v36 = vld [vmem:[#allocation7 + $0x134] sm:$0xf0]  ;;  %v4743_v39 = vld [vmem:[#allocation7 + $0x1c0] sm:$0xf]  ;;  %v4607_v44 = vld [vmem:[#allocation7 + $0xb0] sm:$0xf] }
  0x8c   : > { %838 = vmatpush.bf16.msra.mxu0 %v6073_v27  ;;  %v4751_v27 = vld [vmem:[#allocation7 + $0x1d0] sm:$0xf]  ;;  %v4672_v38 = vor.u32 %v6136_v36, %v4671_v35  ;;  %v6100_v43 = vld [vmem:[#allocation7 + $0x14] sm:$0xf0]  ;;  %v4663_v47 = vld [vmem:[#allocation7 + $0x120] sm:$0xf] }
  0x8d   : > { %857 = vmatpush.bf16.msra.mxu1 %v6081_v28  ;;  %v6156_v28 = vld [vmem:[#allocation7 + $0x1d4] sm:$0xf0]  ;;  %v6134_v48 = vld [vmem:[#allocation7 + $0x124] sm:$0xf0]  ;;  %v4519_v54 = vld [vmem:[#allocation7] sm:$0xf] }
  0x8e   : > { %876 = vmatpush.bf16.msra.mxu2 %v6089_v29  ;;  %1493 = vmatpush.bf16.msrb.mxu3 %v4552_v9  ;;  %v4752_v29 = vor.u32 %v6156_v28, %v4751_v27  ;;  %v6120_v46 = vld [vmem:[#allocation7 + $0xb4] sm:$0xf0]  ;;  %v6098_v55 = vld [vmem:[#allocation7 + $0x4] sm:$0xf0]  ;;  %v4599_v56 = vld [vmem:[#allocation7 + $0xa0] sm:$0xf] }
  0x8f   : > { %v6152_v52 = vld [vmem:[#allocation7 + $0x1b4] sm:$0xf0]  ;;  %v6118_v58 = vld [vmem:[#allocation7 + $0xa4] sm:$0xf0]  ;;  %v4655_v59 = vld [vmem:[#allocation7 + $0x110] sm:$0xf] }
  0x90   : > { %839 = vmatpush.bf16.msra.mxu0 %v6072_v31  ;;  %v6102_v31 = vld [vmem:[#allocation7 + $0x24] sm:$0xf0]  ;;  %v6132_v60 = vld [vmem:[#allocation7 + $0x114] sm:$0xf0]  ;;  %v4600_v61 = vor.u32 %v6118_v58, %v4599_v56  ;;  %v4727_v63 = vld [vmem:[#allocation7 + $0x1a0] sm:$0xf] }
  0x91   : > { %858 = vmatpush.bf16.msra.mxu1 %v6080_v32  ;;  %v4615_v32 = vld [vmem:[#allocation7 + $0xc0] sm:$0xf]  ;;  %v4536_v33 = vor.u32 %v6102_v31, %v4535_v30  ;;  %v4656_v62 = vor.u32 %v6132_v60, %v4655_v59  ;;  %v6150_v0 = vld [vmem:[#allocation7 + $0x1a4] sm:$0xf0]  ;;  %v6116_v3 = vld [vmem:[#allocation7 + $0x94] sm:$0xf0] }
  0x92   : > { %877 = vmatpush.bf16.msra.mxu2 %v6088_v37  ;;  %1494 = vmatpush.bf16.msrb.mxu3 %v4544_v21  ;;  %v4616_v37 = vor.u32 %v6122_v34, %v4615_v32  ;;  %v7303_v4 = vld [vmem:[#allocation5] ss:$0 sm:$0xff]  ;;  %v4831_v6 = vld [vmem:[#allocation7 + $0x270] sm:$0xf]  ;;  %v6176_v7 = vld [vmem:[#allocation7 + $0x274] sm:$0xf0] }
  0x93   : > { %840 = vmatmul.bf16.vlgmr.msra.gmra.mxu0 %v4386_v40  ;;  %v6154_v40 = vld [vmem:[#allocation7 + $0x1c4] sm:$0xf0]  ;;  %v4832_v8 = vor.u32 %v6176_v7, %v4831_v6  ;;  %v4647_v9 = vld [vmem:[#allocation7 + $0x100] sm:$0xf]  ;;  %v4719_v11 = vld [vmem:[#allocation7 + $0x190] sm:$0xf] }
  0x94   : > { %859 = vmatmul.bf16.vlgmr.msra.gmra.mxu1 %v4390_v41  ;;  %1509 = vmatpush.bf16.msrb.mxu0 %v4640_v1  ;;  %v4744_v41 = vor.u32 %v6154_v40, %v4743_v39  ;;  %v4728_v1 = vor.u32 %v6150_v0, %v4727_v63  ;;  %v6130_v10 = vld [vmem:[#allocation7 + $0x104] sm:$0xf0]  ;;  %v4823_v21 = vld [vmem:[#allocation7 + $0x260] sm:$0xf]  ;;  %v4641_v27 = vld [vmem:[#allocation7 + $0xf8] sm:$0xf0] }
  0x95   : > { %878 = vmatmul.bf16.vlgmr.msra.gmra.mxu2 %v4394_v42  ;;  %1528 = vmatpush.bf16.msrb.mxu1 %v4704_v57  ;;  %v4527_v42 = vld [vmem:[#allocation7 + $0x10] sm:$0xf]  ;;  %v4520_v57 = vor.u32 %v6098_v55, %v4519_v54  ;;  %v4648_v12 = vor.u32 %v6130_v10, %v4647_v9  ;;  %v6114_v18 = vld [vmem:[#allocation7 + $0x84] sm:$0xf0]  ;;  %v4711_v23 = vld [vmem:[#allocation7 + $0x180] sm:$0xf] }
  0x96   : > { %1547 = vmatpush.bf16.msrb.mxu2 %v4768_v5  ;;  %1495 = vmatpush.bf16.msrb.mxu3 %v4536_v33  ;;  %v4528_v45 = vor.u32 %v6100_v43, %v4527_v42  ;;  %v6174_v22 = vld [vmem:[#allocation7 + $0x264] sm:$0xf0]  ;;  %v4815_v32 = vld [vmem:[#allocation7 + $0x250] sm:$0xf]  ;;  %v6172_v33 = vld [vmem:[#allocation7 + $0x254] sm:$0xf0] }
  0x97   : > { %v4824_v24 = vor.u32 %v6174_v22, %v4823_v21  ;;  %v4816_v34 = vor.u32 %v6172_v33, %v4815_v32  ;;  %v6111_v35 = vld [vmem:[#allocation7 + $0x74] sm:$0xf]  ;;  %v4577_v36 = vld [vmem:[#allocation7 + $0x78] sm:$0xf0]  ;;  %v4633_v40 = vld [vmem:[#allocation7 + $0xe8] sm:$0xf0] }
  0x98   : > { %1510 = vmatpush.bf16.msrb.mxu0 %v4632_v13  ;;  %v6148_v13 = vld [vmem:[#allocation7 + $0x194] sm:$0xf0]  ;;  %v4580_v39 = vor.u32 %v6111_v35, %v4577_v36  ;;  %v4705_v42 = vld [vmem:[#allocation7 + $0x178] sm:$0xf0]  ;;  %v6123_v54 = vld [vmem:[#allocation7 + $0xd4] sm:$0xf] }
  0x99   : > { %1529 = vmatpush.bf16.msrb.mxu1 %v4696_v2  ;;  %v4591_v2 = vld [vmem:[#allocation7 + $0x90] sm:$0xf]  ;;  %v4720_v16 = vor.u32 %v6148_v13, %v4719_v11  ;;  %v4625_v55 = vld [vmem:[#allocation7 + $0xd8] sm:$0xf0]  ;;  %v6141_v58 = vld [vmem:[#allocation7 + $0x164] sm:$0xf] }
  0x9a   : > { %1548 = vmatpush.bf16.msrb.mxu2 %v4760_v17  ;;  %1496 = vmatpush.bf16.msrb.mxu3 %v4528_v45  ;;  %v4592_v5 = vor.u32 %v6116_v3, %v4591_v2  ;;  %v4583_v17 = vld [vmem:[#allocation7 + $0x80] sm:$0xf]  ;;  %v4697_v59 = vld [vmem:[#allocation7 + $0x168] sm:$0xf0]  ;;  %v4799_v63 = vld [vmem:[#allocation7 + $0x230] sm:$0xf] }
  0x9b   : > { %v4584_v20 = vor.u32 %v6114_v18, %v4583_v17  ;;  %v6168_v0 = vld [vmem:[#allocation7 + $0x234] sm:$0xf0]  ;;  %v6121_v6 = vld [vmem:[#allocation7 + $0xc4] sm:$0xf]  ;;  %v4617_v7 = vld [vmem:[#allocation7 + $0xc8] sm:$0xf0] }
  0x9c   : > { %1511 = vmatpush.bf16.msrb.mxu0 %v4624_v25  ;;  %v6146_v25 = vld [vmem:[#allocation7 + $0x184] sm:$0xf0]  ;;  %v4800_v3 = vor.u32 %v6168_v0, %v4799_v63  ;;  %v4620_v10 = vor.u32 %v6121_v6, %v4617_v7  ;;  %v6139_v11 = vld [vmem:[#allocation7 + $0x154] sm:$0xf]  ;;  %v4791_v18 = vld [vmem:[#allocation7 + $0x220] sm:$0xf] }
  0x9d   : > { %1530 = vmatpush.bf16.msrb.mxu1 %v4688_v14  ;;  %v4783_v35 = vld [vmem:[#allocation7 + $0x210] sm:$0xf]  ;;  %v6164_v36 = vld [vmem:[#allocation7 + $0x214] sm:$0xf0]  ;;  %v6133_v63 = vld [vmem:[#allocation7 + $0x124] sm:$0xf] }
  0x9e   : > { %1549 = vmatpush.bf16.msrb.mxu2 %v4752_v29  ;;  %1497 = vmatpush.bf16.msrb.mxu3 %v4520_v57  ;;  %v4712_v29 = vor.u32 %v6146_v25, %v4711_v23  ;;  %v4628_v57 = vor.u32 %v6123_v54, %v4625_v55  ;;  %v4553_v23 = vld [vmem:[#allocation7 + $0x48] sm:$0xf0]  ;;  %v4609_v25 = vld [vmem:[#allocation7 + $0xb8] sm:$0xf0]  ;;  %v6162_v55 = vld [vmem:[#allocation7 + $0x204] sm:$0xf0] }
  0x9f   : > { %vm7310_vm2 = vmneg %vm928_vm1 }
  0xa0   : > { %1512 = vmatpush.bf16.msrb.mxu0 %v4616_v37  ;;  %v6125_v37 = vld [vmem:[#allocation7 + $0xe4] sm:$0xf] }
  0xa1   : > { %1531 = vmatpush.bf16.msrb.mxu1 %v4680_v26  ;;  %v6127_v26 = vld [vmem:[#allocation7 + $0xf4] sm:$0xf]  ;;  %v4636_v45 = vor.u32 %v6125_v37, %v4633_v40  ;;  %v4545_v40 = vld [vmem:[#allocation7 + $0x38] sm:$0xf0] }
  0xa2   : > { %1550 = vmatpush.bf16.msrb.mxu2 %v4744_v41  ;;  %1566 = vmatpush.bf16.msra.mxu3 %v4832_v8  ;;  %v4644_v30 = vor.u32 %v6127_v26, %v4641_v27  ;;  %v6143_v41 = vld [vmem:[#allocation7 + $0x174] sm:$0xf] }
  0xa3   : > { %845 = vmatmul.bf16.gmra.mxu0 %v4402_v49  ;;  %v4608_v49 = vor.u32 %v6120_v46, %v4607_v44  ;;  %v4708_v46 = vor.u32 %v6143_v41, %v4705_v42  ;;  %v6103_v37 = vld [vmem:[#allocation7 + $0x34] sm:$0xf]  ;;  %v6117_v41 = vld [vmem:[#allocation7 + $0xa4] sm:$0xf]  ;;  %v4601_v42 = vld [vmem:[#allocation7 + $0xa8] sm:$0xf0] }
  0xa4   : > { %864 = vmatmul.bf16.gmra.mxu1 %v4406_v50  ;;  %v4664_v50 = vor.u32 %v6134_v48, %v4663_v47  ;;  %v4807_v48 = vld [vmem:[#allocation7 + $0x240] sm:$0xf] }
  0xa5   : > { %883 = vmatmul.bf16.gmra.mxu2 %v4410_v51  ;;  %1532 = vmatpush.bf16.msrb.mxu1 %v4672_v38  ;;  %v4735_v51 = vld [vmem:[#allocation7 + $0x1b0] sm:$0xf] }
  0xa6   : > { %v4736_v53 = vor.u32 %v6152_v52, %v4735_v51  ;;  %1513 = vmatpush.bf16.msrb.mxu0 %v4608_v49  ;;  %1567 = vmatpush.bf16.msra.mxu3 %v4824_v24  ;;  %v6170_v49 = vld [vmem:[#allocation7 + $0x244] sm:$0xf0]  ;;  %v6119_v24 = vld [vmem:[#allocation7 + $0xb4] sm:$0xf] }
  0xa7   : > { %v4808_v52 = vor.u32 %v6170_v49, %v4807_v48  ;;  %v4673_v48 = vld [vmem:[#allocation7 + $0x138] sm:$0xf0]  ;;  %v4775_v49 = vld [vmem:[#allocation7 + $0x200] sm:$0xf] }
  0xa8   : > { %1551 = vmatpush.bf16.msrb.mxu2 %v4736_v53  ;;  %v4569_v53 = vld [vmem:[#allocation7 + $0x68] sm:$0xf0] }
  0xa9   : > { %1533 = vmatpush.bf16.msrb.mxu1 %v4664_v50  ;;  %v6109_v50 = vld [vmem:[#allocation7 + $0x64] sm:$0xf] }
  0xaa   : > { %1514 = vmatpush.bf16.msrb.mxu0 %v4600_v61  ;;  %1568 = vmatpush.bf16.msra.mxu3 %v4816_v34  ;;  %v4572_v56 = vor.u32 %v6109_v50, %v4569_v53  ;;  %v4700_v61 = vor.u32 %v6141_v58, %v4697_v59  ;;  %v4776_v59 = vor.u32 %v6162_v55, %v4775_v49 }
  0xac   : > { %1552 = vmatpush.bf16.msrb.mxu2 %v4728_v1  ;;  %v6107_v1 = vld [vmem:[#allocation7 + $0x54] sm:$0xf] }
  0xad   : > { %1534 = vmatpush.bf16.msrb.mxu1 %v4656_v62 }
  0xae   : > { %1515 = vmatpush.bf16.msrb.mxu0 %v4592_v5  ;;  %1569 = vmatpush.bf16.msra.mxu3 %v4808_v52  ;;  %v4561_v5 = vld [vmem:[#allocation7 + $0x58] sm:$0xf0] }
  0xaf   : > { %v4564_v9 = vor.u32 %v6107_v1, %v4561_v5 }
  0xb0   : > { %1553 = vmatpush.bf16.msrb.mxu2 %v4720_v16 }
  0xb1   : > { %1535 = vmatpush.bf16.msrb.mxu1 %v4648_v12  ;;  %v4689_v12 = vld [vmem:[#allocation7 + $0x158] sm:$0xf0] }
  0xb2   : > { %1516 = vmatpush.bf16.msrb.mxu0 %v4584_v20  ;;  %1570 = vmatpush.bf16.msra.mxu3 %v4800_v3  ;;  %v4692_v16 = vor.u32 %v6139_v11, %v4689_v12  ;;  %v6105_v20 = vld [vmem:[#allocation7 + $0x44] sm:$0xf]  ;;  %v4665_v3 = vld [vmem:[#allocation7 + $0x128] sm:$0xf0] }
  0xb3   : > { %v4556_v27 = vor.u32 %v6105_v20, %v4553_v23  ;;  %v4668_v6 = vor.u32 %v6133_v63, %v4665_v3  ;;  %v4769_v23 = vld [vmem:[#allocation7 + $0x1f8] sm:$0xf0] }
  0xb4   : > { %1554 = vmatpush.bf16.msrb.mxu2 %v4712_v29  ;;  %v6137_v29 = vld [vmem:[#allocation7 + $0x144] sm:$0xf]  ;;  %v4833_v63 = vld [vmem:[#allocation7 + $0x278] sm:$0xf0] }
  0xb5   : > { %1604 = vmatpush.bf16.msra.mxu1 %v4644_v30  ;;  %v4681_v30 = vld [vmem:[#allocation7 + $0x148] sm:$0xf0] }
  0xb6   : > { %1585 = vmatpush.bf16.msra.mxu0 %v4580_v39  ;;  %v4684_v34 = vor.u32 %v6137_v29, %v4681_v30  ;;  %v4784_v39 = vor.u32 %v6164_v36, %v4783_v35  ;;  %v6113_v29 = vld [vmem:[#allocation7 + $0x84] sm:$0xf] }
  0xb8   : > { %1623 = vmatpush.bf16.msra.mxu2 %v4708_v46  ;;  %v4604_v46 = vor.u32 %v6117_v41, %v4601_v42 }
  0xb9   : > { %1605 = vmatpush.bf16.msra.mxu1 %v4636_v45  ;;  %v4548_v45 = vor.u32 %v6103_v37, %v4545_v40  ;;  %v6097_v40 = vld [vmem:[#allocation7 + $0x4] sm:$0xf] }
  0xba   : > { %1586 = vmatpush.bf16.msra.mxu0 %v4572_v56  ;;  %v6101_v56 = vld [vmem:[#allocation7 + $0x24] sm:$0xf] }
  0xbc   : > { %1624 = vmatpush.bf16.msra.mxu2 %v4700_v61  ;;  %v6115_v61 = vld [vmem:[#allocation7 + $0x94] sm:$0xf] }
  0xbd   : > { %1606 = vmatpush.bf16.msra.mxu1 %v4628_v57  ;;  %v4537_v57 = vld [vmem:[#allocation7 + $0x28] sm:$0xf0] }
  0xbe   : > { %1587 = vmatpush.bf16.msra.mxu0 %v4564_v9 }
  0xc0   : > { %1625 = vmatpush.bf16.msra.mxu2 %v4692_v16 }
  0xc1   : > { %1607 = vmatpush.bf16.msra.mxu1 %v4620_v10 }
  0xc2   : > { %1588 = vmatpush.bf16.msra.mxu0 %v4556_v27 }
  0xc4   : > { %1626 = vmatpush.bf16.msra.mxu2 %v4684_v34  ;;  %v6131_v34 = vld [vmem:[#allocation7 + $0x114] sm:$0xf] }
  0xc6   : > { %1589 = vmatpush.bf16.msra.mxu0 %v4548_v45  ;;  %v4521_v45 = vld [vmem:[#allocation7 + $0x8] sm:$0xf0] }
  0xc7   : > { %v4524_v55 = vor.u32 %v6097_v40, %v4521_v45 }
  0xfc   : > { %v898_v28 = vpop.f32.mrf.mxu3 }
 0x104   : > { %v900_v62 = vpop.f32.mrf.mxu3 }
 0x110   : > { %v841_v14 = vpop.f32.mrf.mxu0 }
 0x111   : > { %v860_v15 = vpop.f32.mrf.mxu1  ;;  %v842_v19 = vadd.f32 %v7303_v4, %v841_v14 }
 0x113   : > { %v861_v31 = vadd.f32 %v860_v15, %v842_v19  ;;  %v6166_v19 = vld [vmem:[#allocation7 + $0x224] sm:$0xf0] }
 0x114   : > { %v4792_v22 = vor.u32 %v6166_v19, %v4791_v18  ;;  %v4529_v18 = vld [vmem:[#allocation7 + $0x18] sm:$0xf0] }
 0x116   : > { %1571 = vmatpush.bf16.msra.mxu3 %v4792_v22  ;;  %v6159_v22 = vld [vmem:[#allocation7 + $0x1f4] sm:$0xf] }
 0x118   : > { %v879_v38 = vpop.f32.mrf.mxu2  ;;  %v843_v44 = vpop.f32.mrf.mxu0 }
 0x119   : > { %v880_v43 = vadd.f32 %v879_v38, %v861_v31  ;;  %v862_v47 = vpop.f32.mrf.mxu1  ;;  %v844_v51 = vadd.f32 %v7303_v4, %v843_v44 }
 0x11a   : > { %1572 = vmatpush.bf16.msra.mxu3 %v4784_v39  ;;  %v4657_v39 = vld [vmem:[#allocation7 + $0x118] sm:$0xf0] }
 0x11b   : > { %v899_v60 = vadd.f32 %v898_v28, %v880_v43  ;;  %v863_v2 = vadd.f32 %v862_v47, %v844_v51  ;;  %v4612_v28 = vor.u32 %v6119_v24, %v4609_v25  ;;  %v903_v43 = vpop.f32.mrf.mxu3  ;;  %v6135_v47 = vld [vmem:[#allocation7 + $0x134] sm:$0xf]  ;;  %v4660_v49 = vor.u32 %v6131_v34, %v4657_v39  ;;  %v4809_v39 = vld [vmem:[#allocation7 + $0x248] sm:$0xf0] }
 0x11c   : > { %v4676_v54 = vor.u32 %v6135_v47, %v4673_v48 }
 0x11d   : > { %v908_v13 = vmax.f32 %v899_v60, 0.0  ;;  %1608 = vmatpush.bf16.msra.mxu1 %v4612_v28  ;;  %v4540_v60 = vor.u32 %v6101_v56, %v4537_v57  ;;  %v6175_v57 = vld [vmem:[#allocation7 + $0x274] sm:$0xf] }
 0x11e   : > { %1627 = vmatpush.bf16.msra.mxu2 %v4676_v54  ;;  %1573 = vmatpush.bf16.msra.mxu3 %v4776_v59 }
 0x11f   : > { %v912_v31 = vpack.c.bf16 %v908_v13, %v908_v13  ;;  %1590 = vmatpush.bf16.msra.mxu0 %v4540_v60 }
 0x120   : > { %v881_v8 = vpop.f32.mrf.mxu2  ;;  %v846_v15 = vpop.f32.mrf.mxu0 }
 0x121   : > { %v882_v14 = vadd.f32 %v881_v8, %v863_v2  ;;  %v847_v17 = vadd.f32 %v7303_v4, %v846_v15  ;;  %v865_v26 = vpop.f32.mrf.mxu1  ;;  %v920_v50 = vunpack.c.l.b16 %v912_v31  ;;  %1609 = vmatpush.bf16.msra.mxu1 %v4604_v46  ;;  %v6157_v46 = vld [vmem:[#allocation7 + $0x1e4] sm:$0xf] }
 0x122   : > { %1628 = vmatpush.bf16.msra.mxu2 %v4668_v6 }
 0x123   : > { %v901_v21 = vadd.f32 %v900_v62, %v882_v14  ;;  %v866_v33 = vadd.f32 %v865_v26, %v847_v17  ;;  %v4593_v62 = vld [vmem:[#allocation7 + $0x98] sm:$0xf0]  ;;  %v6099_v17 = vld [vmem:[#allocation7 + $0x14] sm:$0xf]  ;;  %v905_v24 = vpop.f32.mrf.mxu3 }
 0x124   : > { %v4596_v2 = vor.u32 %v6115_v61, %v4593_v62  ;;  %v6155_v61 = vld [vmem:[#allocation7 + $0x1d4] sm:$0xf]  ;;  %v4753_v62 = vld [vmem:[#allocation7 + $0x1d8] sm:$0xf0] }
 0x125   : > { %v909_v32 = vmax.f32 %v901_v21, 0.0  ;;  %v4756_v6 = vor.u32 %v6155_v61, %v4753_v62 }
 0x126   : > { %1610 = vmatpush.bf16.msra.mxu1 %v4596_v2  ;;  %1629 = vmatpush.bf16.msra.mxu2 %v4660_v49  ;;  %v4825_v2 = vld [vmem:[#allocation7 + $0x268] sm:$0xf0]  ;;  %v6147_v49 = vld [vmem:[#allocation7 + $0x194] sm:$0xf] }
 0x127   : > { %v913_v38 = vpack.c.bf16 %v909_v32, %v909_v32 }
 0x128   : > { %v884_v44 = vpop.f32.mrf.mxu2  ;;  %v848_v53 = vpop.f32.mrf.mxu0 }
 0x129   : > { %v921_v51 = vunpack.c.l.b16 %v913_v38  ;;  %v885_v52 = vadd.f32 %v884_v44, %v866_v33  ;;  %v849_v58 = vadd.f32 %v7303_v4, %v848_v53  ;;  %v867_v4 = vpop.f32.mrf.mxu1  ;;  %v4585_v33 = vld [vmem:[#allocation7 + $0x88] sm:$0xf0]  ;;  %v4772_v44 = vor.u32 %v6159_v22, %v4769_v23 }
 0x12a   : > { %v4588_v48 = vor.u32 %v6113_v29, %v4585_v33 }
 0x12b   : > { %v924_v0 = vpack.c.b16 %v921_v51, %v920_v50  ;;  %v904_v1 = vadd.f32 %v903_v43, %v885_v52  ;;  %v868_v9 = vadd.f32 %v867_v4, %v849_v58  ;;  %v4532_v43 = vor.u32 %v6099_v17, %v4529_v18  ;;  %v4761_v50 = vld [vmem:[#allocation7 + $0x1e8] sm:$0xf0]  ;;  %v6129_v51 = vld [vmem:[#allocation7 + $0x104] sm:$0xf] }
 0x12c   : > { %v4649_v52 = vld [vmem:[#allocation7 + $0x108] sm:$0xf0]  ;;  %v4764_v56 = vor.u32 %v6157_v46, %v4761_v50  ;;  %1611 = vmatpush.bf16.msra.mxu1 %v4588_v48  ;;  %v6153_v4 = vld [vmem:[#allocation7 + $0x1c4] sm:$0xf]  ;;  %v6167_v48 = vld [vmem:[#allocation7 + $0x234] sm:$0xf] }
 0x12d   : > { %v7314_v7 = vrot.slane %v924_v0, 7  ;;  %v910_v8 = vmax.f32 %v904_v1, 0.0  ;;  %1591 = vmatpush.bf16.msra.mxu0 %v4532_v43  ;;  %v4652_v60 = vor.u32 %v6129_v51, %v4649_v52  ;;  %v4836_v0 = vor.u32 %v6175_v57, %v4833_v63  ;;  %v6173_v1 = vld [vmem:[#allocation7 + $0x264] sm:$0xf]  ;;  %v4721_v50 = vld [vmem:[#allocation7 + $0x198] sm:$0xf0] }
 0x12e   : > { %v4801_v51 = vld [vmem:[#allocation7 + $0x238] sm:$0xf0]  ;;  %v4793_v57 = vld [vmem:[#allocation7 + $0x228] sm:$0xf0]  ;;  %v6163_v63 = vld [vmem:[#allocation7 + $0x214] sm:$0xf] }
 0x12f   : > { %4838 = vmatmul.msk.bf16.vlgmr.msrb.gmra.mxu3 %vm7310_vm2, %v7314_v7  ;;  %v7321_v10 = vsel %vm928_vm1, 0, %v7314_v7  ;;  %v7325_v11 = vsel %vm928_vm1, %v7314_v7, 0  ;;  %v914_v35 = vpack.c.bf16 %v910_v8, %v910_v8  ;;  %v4745_v8 = vld [vmem:[#allocation7 + $0x1c8] sm:$0xf0]  ;;  %1630 = vmatpush.bf16.msra.mxu2 %v4652_v60 }
 0x130   : > { %v886_v12 = vpop.f32.mrf.mxu2  ;;  %v966_v13 = vrot.slane %v7321_v10, 1  ;;  %v967_v14 = vrot.slane %v7325_v11, 1  ;;  %v939_v15 = vshrl.u32 %v7321_v10, 16  ;;  %v941_v16 = vshll.u32 %v7321_v10, 16  ;;  %1642 = vmatpush.bf16.msrb.mxu3 %v4772_v44  ;;  %v4713_v60 = vld [vmem:[#allocation7 + $0x188] sm:$0xf0] }
 0x131   : > { %v887_v19 = vadd.f32 %v886_v12, %v868_v9  ;;  %v945_v20 = vshll.u32 %v7325_v11, 16  ;;  %v978_v21 = vshrl.u32 %v7325_v11, 16  ;;  %v922_v58 = vunpack.c.l.b16 %v914_v35  ;;  %1592 = vmatpush.bf16.msra.mxu0 %v4524_v55 }
 0x132   : > { %v7334_v25 = vsel %vm965_vm3, %v966_v13, %v967_v14  ;;  %v943_v26 = vrot.slane %v941_v16, 1  ;;  %v975_v27 = vrot.slane %v939_v15, 1  ;;  %v976_v28 = vrot.slane %v941_v16, 2  ;;  %v6151_v16 = vld [vmem:[#allocation7 + $0x1b4] sm:$0xf] }
 0x133   : > { %v906_v30 = vadd.f32 %v905_v24, %v887_v19  ;;  %1536 = vmatmul.bf16.vlgmr.msrb.gmra.mxu1 %v7334_v25  ;;  %v980_v31 = vrot.slane %v978_v21, 1  ;;  %v981_v32 = vrot.slane %v945_v20, 2  ;;  %v947_v37 = vrot.slane %v945_v20, 1  ;;  %v4737_v21 = vld [vmem:[#allocation7 + $0x1b8] sm:$0xf0] }
 0x134   : > { %v944_v36 = vor.u32 %v943_v26, %v939_v15  ;;  %v977_v38 = vor.u32 %v976_v28, %v975_v27  ;;  %1643 = vmatpush.bf16.msrb.mxu3 %v4764_v56  ;;  %v4828_v12 = vor.u32 %v6173_v1, %v4825_v2  ;;  %v4748_v15 = vor.u32 %v6153_v4, %v4745_v8  ;;  %v6171_v24 = vld [vmem:[#allocation7 + $0x254] sm:$0xf]  ;;  %v4817_v26 = vld [vmem:[#allocation7 + $0x258] sm:$0xf0]  ;;  %v6165_v56 = vld [vmem:[#allocation7 + $0x224] sm:$0xf] }
 0x135   : > { %v911_v41 = vmax.f32 %v906_v30, 0.0  ;;  %v982_v42 = vor.u32 %v981_v32, %v980_v31  ;;  %v996_v52 = vrot.slane %v7321_v10, 2  ;;  %v4804_v55 = vor.u32 %v6167_v48, %v4801_v51  ;;  %v6161_v1 = vld [vmem:[#allocation7 + $0x204] sm:$0xf]  ;;  %v4777_v2 = vld [vmem:[#allocation7 + $0x208] sm:$0xf0] }
 0x136   : > { %v7338_v47 = vsel %vm938_vm4, %v944_v36, %v947_v37  ;;  %v4740_v36 = vor.u32 %v6151_v16, %v4737_v21  ;;  %v4820_v37 = vor.u32 %v6171_v24, %v4817_v26  ;;  %v4796_v62 = vor.u32 %v6165_v56, %v4793_v57  ;;  %v6182_v26 = vld [vmem:[#allocation10 + $0x28] sm:$0xff]  ;;  %v6179_v48 = vld [vmem:[#allocation10 + $0x10] sm:$0xff] }
 0x137   : > { %v915_v53 = vpack.c.bf16 %v911_v41, %v911_v41  ;;  %1517 = vmatmul.bf16.vlgmr.msrb.gmra.mxu0 %v7338_v47  ;;  %v7342_v54 = vsel %vm974_vm5, %v977_v38, %v982_v42  ;;  %v6169_v38 = vld [vmem:[#allocation7 + $0x244] sm:$0xf]  ;;  %v4729_v42 = vld [vmem:[#allocation7 + $0x1a8] sm:$0xf0] }
 0x138   : > { %1555 = vmatmul.bf16.vlgmr.msrb.gmra.mxu2 %v7342_v54  ;;  %1661 = vmatpush.bf16.msrb.mxu0 %v4836_v0  ;;  %v6149_v41 = vld [vmem:[#allocation7 + $0x1a4] sm:$0xf]  ;;  %v4812_v44 = vor.u32 %v6169_v38, %v4809_v39  ;;  %v4785_v0 = vld [vmem:[#allocation7 + $0x218] sm:$0xf0] }
 0x139   : > { %v923_v59 = vunpack.c.l.b16 %v915_v53  ;;  %1644 = vmatpush.bf16.msrb.mxu3 %v4756_v6  ;;  %v4732_v46 = vor.u32 %v6149_v41, %v4729_v42  ;;  %v997_v53 = vrot.slane %v7325_v11, 2  ;;  %v4788_v11 = vor.u32 %v6163_v63, %v4785_v0  ;;  %v6180_v38 = vld [vmem:[#allocation10 + $0x18] sm:$0xff] }
 0x13b   : > { %v925_v3 = vpack.c.b16 %v923_v59, %v922_v58  ;;  %v4724_v58 = vor.u32 %v6147_v49, %v4721_v50  ;;  %v6145_v59 = vld [vmem:[#allocation7 + $0x184] sm:$0xf]  ;;  %v998_v61 = vsel %vm995_vm6, %v996_v52, %v997_v53 }
 0x13c   : > { %1662 = vmatpush.bf16.msrb.mxu0 %v4828_v12  ;;  %v4716_v10 = vor.u32 %v6145_v59, %v4713_v60 }
 0x13d   : > { %v7345_v9 = vrot.slane %v925_v3, 7  ;;  %1645 = vmatpush.bf16.msrb.mxu3 %v4748_v15  ;;  %v4780_v3 = vor.u32 %v6161_v1, %v4777_v2 }
 0x13f   : > { %4840 = vmatmul.msk.bf16.gmra.mxu3 %vm7310_vm2, %v7345_v9  ;;  %v7352_v13 = vsel %vm928_vm1, 0, %v7345_v9  ;;  %v7356_v14 = vsel %vm928_vm1, %v7345_v9, 0 }
 0x140   : > { %v969_v17 = vrot.slane %v7352_v13, 1  ;;  %v970_v18 = vrot.slane %v7356_v14, 1  ;;  %v949_v19 = vshrl.u32 %v7352_v13, 16  ;;  %v951_v20 = vshll.u32 %v7352_v13, 16  ;;  %1663 = vmatpush.bf16.msrb.mxu0 %v4820_v37 }
 0x141   : > { %v955_v22 = vshll.u32 %v7356_v14, 16  ;;  %v987_v23 = vshrl.u32 %v7356_v14, 16  ;;  %1646 = vmatpush.bf16.msrb.mxu3 %v4740_v36  ;;  %v999_v6 = vrot.slane %v7352_v13, 2  ;;  %v1000_v4 = vrot.slane %v7356_v14, 2 }
 0x142   : > { %v7365_v27 = vsel %vm965_vm3, %v969_v17, %v970_v18  ;;  %v953_v28 = vrot.slane %v951_v20, 1  ;;  %v984_v29 = vrot.slane %v949_v19, 1  ;;  %v985_v30 = vrot.slane %v951_v20, 2  ;;  %v7386_v17 = vld [vmem:[#allocation8] sm:$0x3] }
 0x143   : > { %1541 = vmatmul.bf16.gmra.mxu1 %v7365_v27  ;;  %v957_v31 = vrot.slane %v955_v22, 1  ;;  %v989_v32 = vrot.slane %v987_v23, 1  ;;  %v990_v33 = vrot.slane %v955_v22, 2  ;;  %v1001_v8 = vsel %vm995_vm6, %v999_v6, %v1000_v4  ;;  %v6184_v18 = vld [vmem:[#allocation10 + $0x38] sm:$0xff]  ;;  %v6183_v22 = vld [vmem:[#allocation10 + $0x30] sm:$0xff] }
 0x144   : > { %v954_v34 = vor.u32 %v953_v28, %v949_v19  ;;  %v986_v35 = vor.u32 %v985_v30, %v984_v29  ;;  %1664 = vmatpush.bf16.msrb.mxu0 %v4812_v44  ;;  %v1086_v5 = vperm.slane %v7386_v17, 0  ;;  %1878 = vmatpush.bf16.msrb.mxu1 %v6184_v18  ;;  %v6191_v18 = vld [vmem:[#allocation10 + $0x70] sm:$0xff] }
 0x145   : > { %v991_v40 = vor.u32 %v990_v33, %v989_v32  ;;  %1647 = vmatpush.bf16.msrb.mxu3 %v4732_v46  ;;  %v6181_v33 = vld [vmem:[#allocation10 + $0x20] sm:$0xff]  ;;  %v6997_v46 = vmov 16.0  }
 0x146   : > { %v958_v43 = vsel %vm938_vm4, %v954_v34, %v957_v31  ;;  %6618 = vrcp.f32 %v6997_v46 }
 0x147   : > { %1522 = vmatmul.bf16.gmra.mxu0 %v958_v43  ;;  %v992_v45 = vsel %vm974_vm5, %v986_v35, %v991_v40 }
 0x148   : > { %1560 = vmatmul.bf16.gmra.mxu2 %v992_v45  ;;  %1665 = vmatpush.bf16.msrb.mxu0 %v4804_v55  ;;  %v6178_v55 = vld [vmem:[#allocation10 + $0x8] sm:$0xff] }
 0x149   : > { %1648 = vmatpush.bf16.msrb.mxu3 %v4724_v58  ;;  %1879 = vmatpush.bf16.msrb.mxu1 %v6183_v22 }
 0x14c   : > { %1666 = vmatpush.bf16.msrb.mxu0 %v4796_v62  ;;  %v6619_v57 = vpop.eup %6618  ;;  %v6177_v62 = vld [vmem:[#allocation10] sm:$0xff] }
 0x14d   : > { %1649 = vmatpush.bf16.msrb.mxu3 %v4716_v10  ;;  %1880 = vmatpush.bf16.msrb.mxu1 %v6182_v26  ;;  %v1717_v63 = vmul.f32 16.0, %v6619_v57  ;;  %vm1721_vm7 = vweird.f32 %v6619_v57 }
 0x14f   : > { %1574 = vmatmul.bf16.vlgmr.msra.gmra.mxu3 %v998_v61  ;;  %v1718_v4 = vsub.f32 1.0, %v1717_v63 }
 0x150   : > { %1667 = vmatpush.bf16.msrb.mxu0 %v4788_v11 }
 0x151   : > { %1881 = vmatpush.bf16.msrb.mxu1 %v6181_v33 }
 0x153   : > { %1612 = vmatmul.bf16.vlgmr.msra.gmra.mxu1 %v7338_v47 }
 0x154   : > { %1668 = vmatpush.bf16.msrb.mxu0 %v4780_v3 }
 0x155   : > { %1882 = vmatpush.bf16.msrb.mxu1 %v6180_v38 }
 0x157   : > { %4842 = vmatmul.msk.bf16.vlgmr.msra.gmra.mxu0 %vm7310_vm2, %v7314_v7 }
 0x158   : > { %1631 = vmatmul.bf16.vlgmr.msra.gmra.mxu2 %v7334_v25 }
 0x159   : > { %1883 = vmatpush.bf16.msrb.mxu1 %v6179_v48 }
 0x15d   : > { %1884 = vmatpush.bf16.msrb.mxu1 %v6178_v55 }
 0x15f   : > { %1579 = vmatmul.bf16.gmra.mxu3 %v1001_v8 }
 0x161   : > { %1885 = vmatpush.bf16.msrb.mxu1 %v6177_v62 }
 0x163   : > { %1617 = vmatmul.bf16.gmra.mxu1 %v958_v43 }
 0x167   : > { %4844 = vmatmul.msk.bf16.gmra.mxu0 %vm7310_vm2, %v7345_v9 }
 0x168   : > { %1636 = vmatmul.bf16.gmra.mxu2 %v7365_v27 }
 0x16f   : > { %1650 = vmatmul.bf16.vlgmr.msrb.gmra.mxu3 %v7342_v54 }
 0x177   : > { %1669 = vmatmul.bf16.vlgmr.msrb.gmra.mxu0 %v998_v61 }
 0x17f   : > { %1655 = vmatmul.bf16.gmra.mxu3 %v992_v45 }
 0x187   : > { %1674 = vmatmul.bf16.gmra.mxu0 %v1001_v8 }
 0x1b0   : > { %v1537_v13 = vpop.f32.mrf.mxu1 }
 0x1b2   : > { %v1499_v7 = vpop.f32.mrf.mxu3 }
 0x1b3   : > { %v1500_v21 = vadd.f32 %v1499_v7, %v1086_v5  ;;  %v1087_v7 = vperm.slane %v7386_v17, 1 }
 0x1b4   : > { %v1518_v25 = vpop.f32.mrf.mxu0 }
 0x1b5   : > { %v1519_v24 = vadd.f32 %v1518_v25, %v1500_v21 }
 0x1b7   : > { %v1538_v32 = vadd.f32 %v1537_v13, %v1519_v24 }
 0x1b8   : > { %v1539_v9 = vpop.f32.mrf.mxu1 }
 0x1ba   : > { %v1501_v47 = vpop.f32.mrf.mxu3 }
 0x1bb   : > { %v1556_v14 = vpop.f32.mrf.mxu2  ;;  %v1502_v23 = vadd.f32 %v1501_v47, %v1086_v5  ;;  %v6192_v47 = vld [vmem:[#allocation10 + $0x78] sm:$0xff] }
 0x1bc   : > { %v1520_v12 = vpop.f32.mrf.mxu0  ;;  %v1557_v34 = vadd.f32 %v1556_v14, %v1538_v32  ;;  %1891 = vmatpush.bf16.msrb.mxu2 %v6192_v47 }
 0x1bd   : > { %v1521_v28 = vadd.f32 %v1520_v12, %v1502_v23 }
 0x1bf   : > { %v1540_v35 = vadd.f32 %v1539_v9, %v1521_v28 }
 0x1c0   : > { %v1542_v29 = vpop.f32.mrf.mxu1  ;;  %1892 = vmatpush.bf16.msrb.mxu2 %v6191_v18 }
 0x1c2   : > { %v1504_v15 = vpop.f32.mrf.mxu3 }
 0x1c3   : > { %v1558_v19 = vpop.f32.mrf.mxu2  ;;  %v1505_v42 = vadd.f32 %v1504_v15, %v1086_v5 }
 0x1c4   : > { %v1523_v16 = vpop.f32.mrf.mxu0  ;;  %v1559_v36 = vadd.f32 %v1558_v19, %v1540_v35 }
 0x1c5   : > { %v1524_v52 = vadd.f32 %v1523_v16, %v1505_v42  ;;  %v1719_v16 = vmul.f32 %v6619_v57, %v1718_v4 }
 0x1c7   : > { %v1543_v60 = vadd.f32 %v1542_v29, %v1524_v52  ;;  %v1720_v21 = vadd.f32 %v6619_v57, %v1719_v16 }
 0x1c8   : > { %v1544_v43 = vpop.f32.mrf.mxu1 }
 0x1ca   : > { %v1506_v20 = vpop.f32.mrf.mxu3 }
 0x1cb   : > { %v1561_v30 = vpop.f32.mrf.mxu2  ;;  %v1507_v50 = vadd.f32 %v1506_v20, %v1086_v5 }
 0x1cc   : > { %v1525_v54 = vpop.f32.mrf.mxu0  ;;  %v1562_v0 = vadd.f32 %v1561_v30, %v1543_v60 }
 0x1cd   : > { %v1526_v58 = vadd.f32 %v1525_v54, %v1507_v50 }
 0x1cf   : > { %v1545_v11 = vadd.f32 %v1544_v43, %v1526_v58 }
 0x1d0   : > { %v1613_v10 = vpop.f32.mrf.mxu1 }
 0x1d2   : > { %v1575_v27 = vpop.f32.mrf.mxu3 }
 0x1d3   : > { %v1576_v37 = vadd.f32 %v1575_v27, %v1557_v34  ;;  %v1563_v49 = vpop.f32.mrf.mxu2  ;;  %v6190_v27 = vld [vmem:[#allocation10 + $0x68] sm:$0xff] }
 0x1d4   : > { %v1594_v31 = vpop.f32.mrf.mxu0  ;;  %v1564_v2 = vadd.f32 %v1563_v49, %v1545_v11  ;;  %1893 = vmatpush.bf16.msrb.mxu2 %v6190_v27 }
 0x1d5   : > { %v1680_v44 = vmax.f32 %v1576_v37, 0.0  ;;  %v1595_v5 = vadd.f32 %v1594_v31, %v1087_v7  ;;  %v7392_v31 = vsel %vm1721_vm7, %v6619_v57, %v1720_v21  ;;  %v6187_v57 = vld [vmem:[#allocation10 + $0x50] sm:$0xff] }
 0x1d7   : > { %v1614_v17 = vadd.f32 %v1613_v10, %v1595_v5 }
 0x1d8   : > { %v1615_v19 = vpop.f32.mrf.mxu1 }
 0x1da   : > { %v1577_v39 = vpop.f32.mrf.mxu3 }
 0x1db   : > { %v1578_v40 = vadd.f32 %v1577_v39, %v1559_v36  ;;  %v1632_v1 = vpop.f32.mrf.mxu2  ;;  %v6189_v36 = vld [vmem:[#allocation10 + $0x60] sm:$0xff] }
 0x1dc   : > { %v1596_v41 = vpop.f32.mrf.mxu0  ;;  %v1633_v30 = vadd.f32 %v1632_v1, %v1614_v17  ;;  %1894 = vmatpush.bf16.msrb.mxu2 %v6189_v36  ;;  %v6186_v1 = vld [vmem:[#allocation10 + $0x48] sm:$0xff] }
 0x1dd   : > { %v1682_v45 = vmax.f32 %v1578_v40, 0.0  ;;  %v1597_v24 = vadd.f32 %v1596_v41, %v1087_v7 }
 0x1df   : > { %v1688_v51 = vadd.f32 %v1682_v45, %v1680_v44  ;;  %v1616_v33 = vadd.f32 %v1615_v19, %v1597_v24  ;;  %v6188_v45 = vld [vmem:[#allocation10 + $0x58] sm:$0xff] }
 0x1e0   : > { %v1618_v41 = vpop.f32.mrf.mxu1  ;;  %1895 = vmatpush.bf16.msrb.mxu2 %v6188_v45 }
 0x1e1   : > { %v1689_v53 = vrot.slane %v1688_v51, 4 }
 0x1e2   : > { %v1580_v56 = vpop.f32.mrf.mxu3 }
 0x1e3   : > { %v1690_v61 = vadd.f32 %v1689_v53, %v1688_v51  ;;  %v1581_v6 = vadd.f32 %v1580_v56, %v1562_v0  ;;  %v1634_v22 = vpop.f32.mrf.mxu2 }
 0x1e4   : > { %v7389_v59 = vpop.f32.mrf.mxu0  ;;  %v1635_v38 = vadd.f32 %v1634_v22, %v1616_v33  ;;  %1896 = vmatpush.bf16.msrb.mxu2 %v6187_v57  ;;  %v5015_v57 = vld [vmem:[#allocation13 + $0xc8] sm:$0xf] }
 0x1e5   : > { %v1691_v3 = vrot.slane %v1690_v61, 2  ;;  %v1684_v14 = vmax.f32 %v1581_v6, 0.0  ;;  %v1600_v52 = vadd.f32 %v7389_v59, %v1087_v7  ;;  %v6185_v59 = vld [vmem:[#allocation10 + $0x40] sm:$0xff] }
 0x1e7   : > { %v1692_v13 = vadd.f32 %v1691_v3, %v1690_v61  ;;  %v1619_v63 = vadd.f32 %v1618_v41, %v1600_v52  ;;  %v6217_v52 = vld [vmem:[#allocation13 + $0xc4] sm:$0xf] }
 0x1e8   : > { %1897 = vmatpush.bf16.msrb.mxu2 %v6186_v1  ;;  %v1620_v4 = vpop.f32.mrf.mxu1  ;;  %v4993_v1 = vld [vmem:[#allocation13 + $0xb0] sm:$0xf0] }
 0x1e9   : > { %v1693_v20 = vrot.slane %v1692_v13, 1 }
 0x1ea   : > { %v1582_v8 = vpop.f32.mrf.mxu3 }
 0x1eb   : > { %v1583_v25 = vadd.f32 %v1582_v8, %v1564_v2  ;;  %v1694_v29 = vadd.f32 %v1693_v20, %v1692_v13  ;;  %v1637_v46 = vpop.f32.mrf.mxu2 }
 0x1ec   : > { %v1601_v12 = vpop.f32.mrf.mxu0  ;;  %v1638_v6 = vadd.f32 %v1637_v46, %v1619_v63  ;;  %1898 = vmatpush.bf16.msrb.mxu2 %v6185_v59  ;;  %v4991_v63 = vld [vmem:[#allocation13 + $0xa0] sm:$0xf]  ;;  %v6214_v59 = vld [vmem:[#allocation13 + $0xac] sm:$0xf] }
 0x1ed   : > { %v1686_v15 = vmax.f32 %v1583_v25, 0.0  ;;  %v1723_v37 = vmul.f32 %v7392_v31, %v1694_v29  ;;  %v1602_v0 = vadd.f32 %v1601_v12, %v1087_v7 }
 0x1ef   : > { %v1702_v9 = vadd.f32 %v1686_v15, %v1684_v14  ;;  %v1727_v49 = vpack.c.bf16 %v1723_v37, %v1723_v37  ;;  %v1621_v25 = vadd.f32 %v1620_v4, %v1602_v0  ;;  %v6215_v0 = vld [vmem:[#allocation13 + $0xac] sm:$0xf0]  ;;  %v5001_v4 = vld [vmem:[#allocation13 + $0xb8] sm:$0xf0] }
 0x1f1   : > { %v1703_v54 = vrot.slane %v1702_v9, 4  ;;  %v1771_v58 = vunpack.c.l.b16 %v1727_v49  ;;  %v5033_v49 = vld [vmem:[#allocation13 + $0xf8] sm:$0xf0] }
 0x1f2   : > { %v1651_v23 = vpop.f32.mrf.mxu3 }
 0x1f3   : > { %v1704_v26 = vadd.f32 %v1703_v54, %v1702_v9  ;;  %v1652_v35 = vadd.f32 %v1651_v23, %v1633_v30  ;;  %v1639_v8 = vpop.f32.mrf.mxu2 }
 0x1f4   : > { %v1670_v28 = vpop.f32.mrf.mxu0  ;;  %v1640_v14 = vadd.f32 %v1639_v8, %v1621_v25 }
 0x1f5   : > { %v1705_v32 = vrot.slane %v1704_v26, 2  ;;  %v1671_v43 = vadd.f32 %v1670_v28, %v1652_v35 }
 0x1f7   : > { %v1706_v34 = vadd.f32 %v1705_v32, %v1704_v26  ;;  %v1681_v55 = vmax.f32 %v1671_v43, 0.0  ;;  %v5031_v43 = vld [vmem:[#allocation13 + $0xe8] sm:$0xf] }
 0x1f9   : > { %v1707_v39 = vrot.slane %v1706_v34, 1 }
 0x1fa   : > { %v1653_v40 = vpop.f32.mrf.mxu3 }
 0x1fb   : > { %v1708_v42 = vadd.f32 %v1707_v39, %v1706_v34  ;;  %v1654_v44 = vadd.f32 %v1653_v40, %v1635_v38  ;;  %v5023_v38 = vld [vmem:[#allocation13 + $0xe0] sm:$0xf]  ;;  %v6223_v39 = vld [vmem:[#allocation13 + $0xec] sm:$0xf0]  ;;  %v6221_v40 = vld [vmem:[#allocation13 + $0xe4] sm:$0xf] }
 0x1fc   : > { %v1672_v48 = vpop.f32.mrf.mxu0  ;;  %v5024_v41 = vor.u32 %v6223_v39, %v5023_v38  ;;  %v4951_v38 = vld [vmem:[#allocation13 + $0x48] sm:$0xf]  ;;  %v6204_v39 = vld [vmem:[#allocation13 + $0x54] sm:$0xf0] }
 0x1fd   : > { %v1725_v50 = vmul.f32 %v7392_v31, %v1708_v42  ;;  %v1673_v51 = vadd.f32 %v1672_v48, %v1654_v44  ;;  %v5025_v42 = vld [vmem:[#allocation13 + $0xf0] sm:$0xf0]  ;;  %v6224_v44 = vld [vmem:[#allocation13 + $0xf4] sm:$0xf0]  ;;  %v6222_v48 = vld [vmem:[#allocation13 + $0xec] sm:$0xf] }
 0x1fe   : > { %v5028_v45 = vor.u32 %v6221_v40, %v5025_v42  ;;  %v5032_v46 = vor.u32 %v6224_v44, %v5031_v43  ;;  %2107 = vmatpush.bf16.msra.mxu3 %v5024_v41  ;;  %v6202_v40 = vld [vmem:[#allocation13 + $0x4c] sm:$0xf]  ;;  %v4953_v41 = vld [vmem:[#allocation13 + $0x58] sm:$0xf0]  ;;  %v4952_v44 = vor.u32 %v6204_v39, %v4951_v38 }
 0x1ff   : > { %v1729_v53 = vpack.c.bf16 %v1725_v50, %v1725_v50  ;;  %v1683_v56 = vmax.f32 %v1673_v51, 0.0  ;;  %v5007_v50 = vld [vmem:[#allocation13 + $0xc0] sm:$0xf]  ;;  %v6219_v51 = vld [vmem:[#allocation13 + $0xcc] sm:$0xf0] }
 0x200   : > { %2120 = vmatpush.bf16.msra.mxu0 %v5028_v45  ;;  %2133 = vmatpush.bf16.msra.mxu1 %v5032_v46  ;;  %v4927_v45 = vld [vmem:[#allocation13 + $0x20] sm:$0xf]  ;;  %v6199_v46 = vld [vmem:[#allocation13 + $0x2c] sm:$0xf0] }
 0x201   : > { %v1773_v60 = vunpack.c.l.b16 %v1729_v53  ;;  %v1695_v61 = vadd.f32 %v1683_v56, %v1681_v55  ;;  %v5009_v53 = vld [vmem:[#allocation13 + $0xd0] sm:$0xf0]  ;;  %v5008_v55 = vor.u32 %v6219_v51, %v5007_v50  ;;  %v6200_v51 = vld [vmem:[#allocation13 + $0x34] sm:$0xf0] }
 0x202   : > { %v1656_v62 = vpop.f32.mrf.mxu3  ;;  %v5012_v56 = vor.u32 %v6217_v52, %v5009_v53  ;;  %v4929_v50 = vld [vmem:[#allocation13 + $0x30] sm:$0xf0]  ;;  %v6198_v52 = vld [vmem:[#allocation13 + $0x2c] sm:$0xf]  ;;  %v4937_v53 = vld [vmem:[#allocation13 + $0x38] sm:$0xf0] }
 0x203   : > { %v1696_v10 = vrot.slane %v1695_v61, 4  ;;  %v1776_v11 = vsel %vm1775_vm8, %v1773_v60, %v1771_v58  ;;  %v1657_v13 = vadd.f32 %v1656_v62, %v1638_v6  ;;  %v6220_v58 = vld [vmem:[#allocation13 + $0xd4] sm:$0xf0]  ;;  %v6218_v60 = vld [vmem:[#allocation13 + $0xcc] sm:$0xf]  ;;  %2108 = vmatpush.bf16.msra.mxu3 %v5008_v55  ;;  %v4928_v55 = vor.u32 %v6199_v46, %v4927_v45 }
 0x204   : > { %v1675_v2 = vpop.f32.mrf.mxu0  ;;  %v1778_v3 = vpack.c.b16 %v1776_v11, %v1776_v11  ;;  %v5017_v62 = vld [vmem:[#allocation13 + $0xd8] sm:$0xf0]  ;;  %v6213_v11 = vld [vmem:[#allocation13 + $0xa4] sm:$0xf]  ;;  %v6216_v6 = vld [vmem:[#allocation13 + $0xb4] sm:$0xf0]  ;;  %2121 = vmatpush.bf16.msra.mxu0 %v5012_v56 }
 0x205   : > { %v1697_v47 = vadd.f32 %v1696_v10, %v1695_v61  ;;  %v1676_v7 = vadd.f32 %v1675_v2, %v1657_v13  ;;  %v5016_v61 = vor.u32 %v6220_v58, %v5015_v57  ;;  %v5020_v10 = vor.u32 %v6218_v60, %v5017_v62  ;;  %v4999_v2 = vld [vmem:[#allocation13 + $0xa8] sm:$0xf]  ;;  %v6211_v13 = vld [vmem:[#allocation13 + $0x8c] sm:$0xf0]  ;;  %v4911_v62 = vld [vmem:[#allocation13] sm:$0xf] }
 0x206   : > { %1886 = vmatmul.bf16.vlgmr.msrb.gmra.mxu1 %v1778_v3  ;;  %v4992_v3 = vor.u32 %v6215_v0, %v4991_v63  ;;  %v4996_v8 = vor.u32 %v6213_v11, %v4993_v1  ;;  %v5000_v25 = vor.u32 %v6216_v6, %v4999_v2  ;;  %v4940_v60 = vor.u32 %v6198_v52, %v4937_v53  ;;  %v6195_v63 = vld [vmem:[#allocation13 + $0xc] sm:$0xf0]  ;;  %v6193_v0 = vld [vmem:[#allocation13 + $0x4] sm:$0xf]  ;;  %v4913_v11 = vld [vmem:[#allocation13 + $0x10] sm:$0xf0] }
 0x207   : > { %v1698_v16 = vrot.slane %v1697_v47, 2  ;;  %v1685_v19 = vmax.f32 %v1676_v7, 0.0  ;;  %2134 = vmatpush.bf16.msra.mxu1 %v5016_v61  ;;  %v4983_v7 = vld [vmem:[#allocation13 + $0x88] sm:$0xf]  ;;  %v6196_v2 = vld [vmem:[#allocation13 + $0x14] sm:$0xf0] }
 0x208   : > { %2109 = vmatpush.bf16.msra.mxu3 %v4992_v3  ;;  %2122 = vmatpush.bf16.msra.mxu0 %v4996_v8  ;;  %v4919_v1 = vld [vmem:[#allocation13 + $0x8] sm:$0xf]  ;;  %v4916_v3 = vor.u32 %v6193_v0, %v4913_v11 }
 0x209   : > { %v1699_v18 = vadd.f32 %v1698_v16, %v1697_v47  ;;  %v4975_v47 = vld [vmem:[#allocation13 + $0x80] sm:$0xf]  ;;  %v4977_v16 = vld [vmem:[#allocation13 + $0x90] sm:$0xf0]  ;;  %v4920_v6 = vor.u32 %v6196_v2, %v4919_v1 }
 0x20a   : > { %v1658_v15 = vpop.f32.mrf.mxu3 }
 0x20b   : > { %v1659_v12 = vadd.f32 %v1658_v15, %v1640_v14  ;;  %v1700_v21 = vrot.slane %v1699_v18, 1  ;;  %v6209_v14 = vld [vmem:[#allocation13 + $0x84] sm:$0xf]  ;;  %v5004_v15 = vor.u32 %v6214_v59, %v5001_v4  ;;  %2135 = vmatpush.bf16.msra.mxu1 %v5000_v25  ;;  %v6194_v59 = vld [vmem:[#allocation13 + $0xc] sm:$0xf] }
 0x20c   : > { %v1677_v5 = vpop.f32.mrf.mxu0  ;;  %v4921_v4 = vld [vmem:[#allocation13 + $0x18] sm:$0xf0] }
 0x20d   : > { %v1678_v9 = vadd.f32 %v1677_v5, %v1659_v12  ;;  %v1701_v17 = vadd.f32 %v1700_v21, %v1699_v18  ;;  %v6212_v12 = vld [vmem:[#allocation13 + $0x94] sm:$0xf0]  ;;  %v6210_v5 = vld [vmem:[#allocation13 + $0x8c] sm:$0xf]  ;;  %v4976_v18 = vor.u32 %v6211_v13, %v4975_v47  ;;  %v6207_v21 = vld [vmem:[#allocation13 + $0x6c] sm:$0xf0]  ;;  %v4924_v8 = vor.u32 %v6194_v59, %v4921_v4 }
 0x20e   : > { %v6617_v25 = vld [vmem:[#allocation11] ss:$0 sm:$0xff] }
 0x20f   : > { %v1687_v20 = vmax.f32 %v1678_v9, 0.0  ;;  %v1724_v27 = vmul.f32 %v7392_v31, %v1701_v17  ;;  %v4985_v9 = vld [vmem:[#allocation13 + $0x98] sm:$0xf0]  ;;  %v4961_v17 = vld [vmem:[#allocation13 + $0x70] sm:$0xf0]  ;;  %2110 = vmatpush.bf16.msra.mxu3 %v4976_v18 }
 0x211   : > { %v1709_v54 = vadd.f32 %v1687_v20, %v1685_v19  ;;  %v1728_v30 = vpack.c.bf16 %v1724_v27, %v1724_v27  ;;  %v4980_v19 = vor.u32 %v6209_v14, %v4977_v16  ;;  %v4984_v20 = vor.u32 %v6212_v12, %v4983_v7  ;;  %v6206_v27 = vld [vmem:[#allocation13 + $0x6c] sm:$0xf]  ;;  %v1937_v7 = vld [vmem:[#allocation14] sm:$0xf] }
 0x212   : > { %v1941_v18 = vperm.slane %v1937_v7, 2 }
 0x213   : > { %v1710_v22 = vrot.slane %v1709_v54, 4  ;;  %v1772_v34 = vunpack.c.l.b16 %v1728_v30  ;;  %2123 = vmatpush.bf16.msra.mxu0 %v4980_v19  ;;  %2136 = vmatpush.bf16.msra.mxu1 %v4984_v20  ;;  %v1939_v19 = vperm.slane %v1937_v7, 0  ;;  %v1942_v20 = vperm.slane %v1937_v7, 3 }
 0x215   : > { %v1711_v23 = vadd.f32 %v1710_v22, %v1709_v54  ;;  %v4959_v54 = vld [vmem:[#allocation13 + $0x60] sm:$0xf]  ;;  %v6205_v22 = vld [vmem:[#allocation13 + $0x64] sm:$0xf] }
 0x216   : > { %v4964_v30 = vor.u32 %v6205_v22, %v4961_v17 }
 0x217   : > { %v1712_v24 = vrot.slane %v1711_v23, 2 }
 0x218   : > { %2124 = vmatpush.bf16.msra.mxu0 %v4964_v30 }
 0x219   : > { %v1713_v26 = vadd.f32 %v1712_v24, %v1711_v23  ;;  %v4988_v23 = vor.u32 %v6210_v5, %v4985_v9  ;;  %v4967_v24 = vld [vmem:[#allocation13 + $0x68] sm:$0xf]  ;;  %v1940_v5 = vperm.slane %v1937_v7, 1 }
 0x21b   : > { %v1714_v28 = vrot.slane %v1713_v26, 1 }
 0x21d   : > { %v1715_v29 = vadd.f32 %v1714_v28, %v1713_v26  ;;  %v6208_v26 = vld [vmem:[#allocation13 + $0x74] sm:$0xf0]  ;;  %v4969_v28 = vld [vmem:[#allocation13 + $0x78] sm:$0xf0] }
 0x21f   : > { %v1726_v32 = vmul.f32 %v7392_v31, %v1715_v29  ;;  %v5036_v31 = vor.u32 %v6222_v48, %v5033_v49  ;;  %v4960_v29 = vor.u32 %v6207_v21, %v4959_v54  ;;  %v6197_v48 = vld [vmem:[#allocation13 + $0x24] sm:$0xf]  ;;  %v4956_v49 = vor.u32 %v6202_v40, %v4953_v41 }
 0x220   : > { %v4932_v57 = vor.u32 %v6197_v48, %v4929_v50 }
 0x221   : > { %v1730_v33 = vpack.c.bf16 %v1726_v32, %v1726_v32  ;;  %2146 = vmatpush.bf16.msra.mxu2 %v5036_v31  ;;  %v4968_v32 = vor.u32 %v6208_v26, %v4967_v24  ;;  %2111 = vmatpush.bf16.msra.mxu3 %v4960_v29  ;;  %v4935_v31 = vld [vmem:[#allocation13 + $0x28] sm:$0xf] }
 0x222   : > { %v4936_v58 = vor.u32 %v6200_v51, %v4935_v31 }
 0x223   : > { %v1774_v35 = vunpack.c.l.b16 %v1730_v33  ;;  %v4943_v33 = vld [vmem:[#allocation13 + $0x40] sm:$0xf]  ;;  %2137 = vmatpush.bf16.msra.mxu1 %v4968_v32 }
 0x225   : > { %v1777_v36 = vsel %vm1775_vm8, %v1774_v35, %v1772_v34  ;;  %2147 = vmatpush.bf16.msra.mxu2 %v5020_v10  ;;  %v6203_v34 = vld [vmem:[#allocation13 + $0x4c] sm:$0xf0]  ;;  %v6201_v35 = vld [vmem:[#allocation13 + $0x44] sm:$0xf]  ;;  %v4912_v10 = vor.u32 %v6195_v63, %v4911_v62 }
 0x226   : > { %v1779_v37 = vpack.c.b16 %v1777_v36, %v1777_v36  ;;  %v4972_v36 = vor.u32 %v6206_v27, %v4969_v28  ;;  %v4944_v42 = vor.u32 %v6203_v34, %v4943_v33 }
 0x227   : > { %2138 = vmatpush.bf16.msra.mxu1 %v4952_v44 }
 0x228   : > { %1899 = vmatmul.bf16.vlgmr.msrb.gmra.mxu2 %v1779_v37  ;;  %v4945_v37 = vld [vmem:[#allocation13 + $0x50] sm:$0xf0]  ;;  %2112 = vmatpush.bf16.msra.mxu3 %v4944_v42 }
 0x229   : > { %2148 = vmatpush.bf16.msra.mxu2 %v5004_v15  ;;  %v4948_v43 = vor.u32 %v6201_v35, %v4945_v37 }
 0x22b   : > { %2125 = vmatpush.bf16.msra.mxu0 %v4948_v43  ;;  %2139 = vmatpush.bf16.msra.mxu1 %v4936_v58 }
 0x22c   : > { %2113 = vmatpush.bf16.msra.mxu3 %v4928_v55 }
 0x22d   : > { %2149 = vmatpush.bf16.msra.mxu2 %v4988_v23 }
 0x22f   : > { %2126 = vmatpush.bf16.msra.mxu0 %v4932_v57  ;;  %2140 = vmatpush.bf16.msra.mxu1 %v4920_v6 }
 0x230   : > { %2114 = vmatpush.bf16.msra.mxu3 %v4912_v10 }
 0x231   : > { %2150 = vmatpush.bf16.msra.mxu2 %v4972_v36 }
 0x233   : > { %2127 = vmatpush.bf16.msra.mxu0 %v4916_v3 }
 0x235   : > { %2151 = vmatpush.bf16.msra.mxu2 %v4956_v49 }
 0x239   : > { %2152 = vmatpush.bf16.msra.mxu2 %v4940_v60 }
 0x23d   : > { %2153 = vmatpush.bf16.msra.mxu2 %v4924_v8 }
 0x283   : > { %v1887_v56 = vpop.f32.mrf.mxu1 }
 0x284   : > { %v1888_v47 = vadd.f32 %v6617_v25, %v1887_v56 }
 0x28b   : > { %v1889_v61 = vpop.f32.mrf.mxu1 }
 0x2ab   : > { %v1900_v13 = vpop.f32.mrf.mxu2 }
 0x2ac   : > { %v1901_v14 = vadd.f32 %v1900_v13, %v1888_v47 }
 0x2ae   : > { %v1904_v15 = vpack.c.bf16 %v1901_v14, %v1901_v14 }
 0x2b0   : > { %2115 = vmatmul.bf16.vlgmr.msra.gmra.mxu3 %v1904_v15  ;;  %2128 = vmatmul.bf16.vlgmr.msra.gmra.mxu0 %v1904_v15 }
 0x2b1   : > { %2141 = vmatmul.bf16.vlgmr.msra.gmra.mxu1 %v1904_v15  ;;  %2154 = vmatmul.bf16.vlgmr.msra.gmra.mxu2 %v1904_v15 }
 0x2b3   : > { %v1902_v16 = vpop.f32.mrf.mxu2 }
 0x32d   : > { %v2129_v12 = vpop.f32.mrf.mxu0 }
 0x32e   : > { %v2142_v9 = vpop.f32.mrf.mxu1  ;;  %v2130_v54 = vadd.f32 %v2129_v12, %v1940_v5 }
 0x32f   : > { %v2143_v21 = vadd.f32 %v2142_v9, %v1941_v18 }
 0x330   : > { %v2160_v27 = vmax.f32 %v2130_v54, 0.0 }
 0x331   : > { %v2161_v30 = vmax.f32 %v2143_v21, 0.0 }
 0x333   : > { %v2116_v22 = vpop.f32.mrf.mxu3 }
 0x334   : > { %v2117_v23 = vadd.f32 %v2116_v22, %v1939_v19  ;;  %v2155_v17 = vpop.f32.mrf.mxu2 }
 0x335   : > { %v2156_v24 = vadd.f32 %v2155_v17, %v1942_v20  ;;  %v2131_v26 = vpop.f32.mrf.mxu0 }
 0x336   : > { %v2159_v28 = vmax.f32 %v2117_v23, 0.0  ;;  %v2144_v29 = vpop.f32.mrf.mxu1 }
 0x337   : > { %v2162_v32 = vmax.f32 %v2156_v24, 0.0 }
 0x338   : > { %v2163_v33 = vpack.c.bf16 %v2160_v27, %v2159_v28 }
 0x339   : > { %v2164_v34 = vpack.c.bf16 %v2162_v32, %v2161_v30 }
 0x33a   : > { %v2167_v35 = vrot.slane %v2163_v33, 3 }
 0x33b   : > { %v2168_v36 = vrot.slane %v2164_v34, 6  ;;  %v2169_v37 = vrot.slane %v2164_v34, 1  ;;  %v2118_v38 = vpop.f32.mrf.mxu3 }
 0x33c   : > { %v2172_v39 = vsel %vm928_vm1, %v2163_v33, %v2167_v35  ;;  %v2157_v40 = vpop.f32.mrf.mxu2 }
 0x33d   : > { %v2176_v41 = vsel %vm2173_vm9, %v2168_v36, %v2169_v37 }
 0x33e   : > { %v2178_v42 = vsel %vm2177_vm10, %v2172_v39, %v2176_v41 }
 0x33f   : > { %2180 = vst [vmem:[#allocation2] sm:$0xf] %v2178_v42 }
 0x340 PF: > { %v5263_v43 = vld [vmem:[%s7236_s1 + $0x1c0] sm:$0xf]  ;;  %vm4176_vm11 = vcmask 1041408   ;;  %vm4178_vm12 = vcmask 1045508   ;;  %vm4180_vm13 = vcmask 1043456  }
 0x341   : > { %v6285_v44 = vld [vmem:[%s7236_s1 + $0x1dc] sm:$0xf0] }
 0x342   : > { %v5519_v45 = vld [vmem:[%s7236_s1 + $0x3c0] sm:$0xf]  ;;  %v5264_v46 = vor.u32 %v6285_v44, %v5263_v43 }
 0x343   : > { %v6349_v48 = vld [vmem:[%s7236_s1 + $0x3dc] sm:$0xf0] }
 0x344   : > { %v5775_v49 = vld [vmem:[%s7236_s1 + $0x5c0] sm:$0xf]  ;;  %v5520_v31 = vor.u32 %v6349_v48, %v5519_v45  ;;  %3746 = vmatpush.bf16.msra.mxu0 %v5264_v46 }
 0x345   : > { %v6413_v50 = vld [vmem:[%s7236_s1 + $0x5dc] sm:$0xf0] }
 0x346   : > { %v5776_v51 = vor.u32 %v6413_v50, %v5775_v49  ;;  %v6031_v52 = vld [vmem:[%s7236_s1 + $0x7c0] sm:$0xf]  ;;  %3759 = vmatpush.bf16.msra.mxu1 %v5520_v31 }
 0x347   : > { %v6477_v53 = vld [vmem:[%s7236_s1 + $0x7dc] sm:$0xf0] }
 0x348   : > { %v5231_v55 = vld [vmem:[%s7236_s1 + $0x180] sm:$0xf]  ;;  %v6032_v56 = vor.u32 %v6477_v53, %v6031_v52  ;;  %3772 = vmatpush.bf16.msra.mxu2 %v5776_v51 }
 0x349   : > { %v6277_v57 = vld [vmem:[%s7236_s1 + $0x19c] sm:$0xf0] }
 0x34a   : > { %v5487_v58 = vld [vmem:[%s7236_s1 + $0x380] sm:$0xf]  ;;  %v5232_v61 = vor.u32 %v6277_v57, %v5231_v55  ;;  %3785 = vmatpush.bf16.msra.mxu3 %v6032_v56 }
 0x34b   : > { %v6341_v60 = vld [vmem:[%s7236_s1 + $0x39c] sm:$0xf0] }
 0x34c   : > { %v5488_v62 = vor.u32 %v6341_v60, %v5487_v58  ;;  %v5743_v63 = vld [vmem:[%s7236_s1 + $0x580] sm:$0xf]  ;;  %3747 = vmatpush.bf16.msra.mxu0 %v5232_v61 }
 0x34d   : > { %v6405_v0 = vld [vmem:[%s7236_s1 + $0x59c] sm:$0xf0] }
 0x34e   : > { %v5999_v10 = vld [vmem:[%s7236_s1 + $0x780] sm:$0xf]  ;;  %v5744_v11 = vor.u32 %v6405_v0, %v5743_v63  ;;  %3760 = vmatpush.bf16.msra.mxu1 %v5488_v62 }
 0x34f   : > { %v6469_v1 = vld [vmem:[%s7236_s1 + $0x79c] sm:$0xf0] }
 0x350   : > { %v5199_v2 = vld [vmem:[%s7236_s1 + $0x140] sm:$0xf]  ;;  %v6000_v6 = vor.u32 %v6469_v1, %v5999_v10  ;;  %3773 = vmatpush.bf16.msra.mxu2 %v5744_v11 }
 0x351   : > { %v6269_v3 = vld [vmem:[%s7236_s1 + $0x15c] sm:$0xf0] }
 0x352   : > { %v5455_v59 = vld [vmem:[%s7236_s1 + $0x340] sm:$0xf]  ;;  %v5200_v25 = vor.u32 %v6269_v3, %v5199_v2  ;;  %3786 = vmatpush.bf16.msra.mxu3 %v6000_v6 }
 0x353   : > { %v6333_v4 = vld [vmem:[%s7236_s1 + $0x35c] sm:$0xf0] }
 0x354   : > { %v5711_v8 = vld [vmem:[%s7236_s1 + $0x540] sm:$0xf]  ;;  %v5456_v15 = vor.u32 %v6333_v4, %v5455_v59  ;;  %3748 = vmatpush.bf16.msra.mxu0 %v5200_v25  ;;  %v5265_v25 = vld [vmem:[%s7236_s1 + $0x1e0] sm:$0xf0] }
 0x355   : > { %v6397_v47 = vld [vmem:[%s7236_s1 + $0x55c] sm:$0xf0] }
 0x356   : > { %v5967_v13 = vld [vmem:[%s7236_s1 + $0x740] sm:$0xf]  ;;  %v5712_v16 = vor.u32 %v6397_v47, %v5711_v8  ;;  %3761 = vmatpush.bf16.msra.mxu1 %v5456_v15  ;;  %v6281_v8 = vld [vmem:[%s7236_s1 + $0x1c4] sm:$0xf] }
 0x357   : > { %v6461_v14 = vld [vmem:[%s7236_s1 + $0x75c] sm:$0xf0]  ;;  %v6345_v47 = vld [vmem:[%s7236_s1 + $0x3c4] sm:$0xf] }
 0x358   : > { %v5167_v7 = vld [vmem:[%s7236_s1 + $0x100] sm:$0xf]  ;;  %v5968_v9 = vor.u32 %v6461_v14, %v5967_v13  ;;  %3774 = vmatpush.bf16.msra.mxu2 %v5712_v16  ;;  %v5521_v14 = vld [vmem:[%s7236_s1 + $0x3e0] sm:$0xf0] }
 0x359   : > { %v6261_v12 = vld [vmem:[%s7236_s1 + $0x11c] sm:$0xf0]  ;;  %v6409_v15 = vld [vmem:[%s7236_s1 + $0x5c4] sm:$0xf] }
 0x35a   : > { %v5423_v5 = vld [vmem:[%s7236_s1 + $0x300] sm:$0xf]  ;;  %v5168_v22 = vor.u32 %v6261_v12, %v5167_v7  ;;  %3787 = vmatpush.bf16.msra.mxu3 %v5968_v9  ;;  %v5777_v16 = vld [vmem:[%s7236_s1 + $0x5e0] sm:$0xf0] }
 0x35b   : > { %v6325_v18 = vld [vmem:[%s7236_s1 + $0x31c] sm:$0xf0]  ;;  %v6033_v9 = vld [vmem:[%s7236_s1 + $0x7e0] sm:$0xf0] }
 0x35c   : > { %v5679_v19 = vld [vmem:[%s7236_s1 + $0x500] sm:$0xf]  ;;  %v5424_v23 = vor.u32 %v6325_v18, %v5423_v5  ;;  %3749 = vmatpush.bf16.msra.mxu0 %v5168_v22  ;;  %v6473_v5 = vld [vmem:[%s7236_s1 + $0x7c4] sm:$0xf] }
 0x35d   : > { %v6389_v20 = vld [vmem:[%s7236_s1 + $0x51c] sm:$0xf0]  ;;  %v5233_v22 = vld [vmem:[%s7236_s1 + $0x1a0] sm:$0xf0] }
 0x35e   : > { %v5935_v54 = vld [vmem:[%s7236_s1 + $0x700] sm:$0xf]  ;;  %v5680_v17 = vor.u32 %v6389_v20, %v5679_v19  ;;  %3762 = vmatpush.bf16.msra.mxu1 %v5424_v23  ;;  %v5268_v19 = vor.u32 %v6281_v8, %v5265_v25  ;;  %v5524_v20 = vor.u32 %v6345_v47, %v5521_v14  ;;  %v6337_v23 = vld [vmem:[%s7236_s1 + $0x384] sm:$0xf] }
 0x35f   : > { %v6453_v21 = vld [vmem:[%s7236_s1 + $0x71c] sm:$0xf0]  ;;  %v5905_v8 = vld [vmem:[%s7236_s1 + $0x6e0] sm:$0xf0] }
 0x360   : > { %v5135_v24 = vld [vmem:[%s7236_s1 + $0xc0] sm:$0xf]  ;;  %v5936_v28 = vor.u32 %v6453_v21, %v5935_v54  ;;  %3775 = vmatpush.bf16.msra.mxu2 %v5680_v17  ;;  %v5780_v54 = vor.u32 %v6409_v15, %v5777_v16  ;;  %v6273_v21 = vld [vmem:[%s7236_s1 + $0x184] sm:$0xf]  ;;  %v6036_v17 = vor.u32 %v6473_v5, %v6033_v9 }
 0x361   : > { %v6253_v26 = vld [vmem:[%s7236_s1 + $0xdc] sm:$0xf0]  ;;  %v6241_v14 = vld [vmem:[%s7236_s1 + $0x84] sm:$0xf] }
 0x362   : > { %v5391_v27 = vld [vmem:[%s7236_s1 + $0x2c0] sm:$0xf]  ;;  %v5136_v35 = vor.u32 %v6253_v26, %v5135_v24  ;;  %3788 = vmatpush.bf16.msra.mxu3 %v5936_v28  ;;  %v5489_v24 = vld [vmem:[%s7236_s1 + $0x3a0] sm:$0xf0] }
 0x363   : > { %v6317_v29 = vld [vmem:[%s7236_s1 + $0x2dc] sm:$0xf0]  ;;  %v6401_v26 = vld [vmem:[%s7236_s1 + $0x584] sm:$0xf] }
 0x364   : > { %v5647_v30 = vld [vmem:[%s7236_s1 + $0x4c0] sm:$0xf]  ;;  %v5392_v36 = vor.u32 %v6317_v29, %v5391_v27  ;;  %3750 = vmatpush.bf16.msra.mxu0 %v5136_v35  ;;  %v5745_v27 = vld [vmem:[%s7236_s1 + $0x5a0] sm:$0xf0] }
 0x365   : > { %v6381_v32 = vld [vmem:[%s7236_s1 + $0x4dc] sm:$0xf0]  ;;  %v6465_v28 = vld [vmem:[%s7236_s1 + $0x784] sm:$0xf] }
 0x366   : > { %v5903_v33 = vld [vmem:[%s7236_s1 + $0x6c0] sm:$0xf]  ;;  %v5648_v37 = vor.u32 %v6381_v32, %v5647_v30  ;;  %3763 = vmatpush.bf16.msra.mxu1 %v5392_v36  ;;  %v6001_v29 = vld [vmem:[%s7236_s1 + $0x7a0] sm:$0xf0]  ;;  %v2181_v30 = vld [vmem:[#allocation2] sm:$0xf]  ;;  %v5236_v32 = vor.u32 %v6273_v21, %v5233_v22 }
 0x367   : > { %v6445_v34 = vld [vmem:[%s7236_s1 + $0x6dc] sm:$0xf0]  ;;  %2457 = vst [vmem:[#allocation1] ss:$9 sm:$0xff] %v2181_v30  ;;  %v6265_v35 = vld [vmem:[%s7236_s1 + $0x144] sm:$0xf] }
 0x368   : > { %v5103_v38 = vld [vmem:[%s7236_s1 + $0x80] sm:$0xf]  ;;  %v5904_v41 = vor.u32 %v6445_v34, %v5903_v33  ;;  %3776 = vmatpush.bf16.msra.mxu2 %v5648_v37  ;;  %v5492_v33 = vor.u32 %v6337_v23, %v5489_v24  ;;  %v5748_v34 = vor.u32 %v6401_v26, %v5745_v27  ;;  %v5201_v36 = vld [vmem:[%s7236_s1 + $0x160] sm:$0xf0] }
 0x369   : > { %v6245_v39 = vld [vmem:[%s7236_s1 + $0x9c] sm:$0xf0]  ;;  %v6329_v37 = vld [vmem:[%s7236_s1 + $0x344] sm:$0xf] }
 0x36a   : > { %v5359_v40 = vld [vmem:[%s7236_s1 + $0x280] sm:$0xf]  ;;  %v5104_v48 = vor.u32 %v6245_v39, %v5103_v38  ;;  %3789 = vmatpush.bf16.msra.mxu3 %v5904_v41  ;;  %v6004_v38 = vor.u32 %v6465_v28, %v6001_v29  ;;  %v5457_v39 = vld [vmem:[%s7236_s1 + $0x360] sm:$0xf0] }
 0x36b   : > { %v6309_v42 = vld [vmem:[%s7236_s1 + $0x29c] sm:$0xf0]  ;;  %v5713_v41 = vld [vmem:[%s7236_s1 + $0x560] sm:$0xf0] }
 0x36c   : > { %v5615_v43 = vld [vmem:[%s7236_s1 + $0x480] sm:$0xf]  ;;  %v5360_v49 = vor.u32 %v6309_v42, %v5359_v40  ;;  %3751 = vmatpush.bf16.msra.mxu0 %v5104_v48  ;;  %v6393_v40 = vld [vmem:[%s7236_s1 + $0x544] sm:$0xf] }
 0x36d   : > { %v6373_v44 = vld [vmem:[%s7236_s1 + $0x49c] sm:$0xf0]  ;;  %v6457_v42 = vld [vmem:[%s7236_s1 + $0x744] sm:$0xf]  ;;  %v5716_v48 = vor.u32 %v6393_v40, %v5713_v41 }
 0x36e   : > { %v5871_v45 = vld [vmem:[%s7236_s1 + $0x680] sm:$0xf]  ;;  %v5616_v50 = vor.u32 %v6373_v44, %v5615_v43  ;;  %3764 = vmatpush.bf16.msra.mxu1 %v5360_v49  ;;  %v5969_v43 = vld [vmem:[%s7236_s1 + $0x760] sm:$0xf0]  ;;  %v5204_v44 = vor.u32 %v6265_v35, %v5201_v36 }
 0x36f   : > { %v6437_v46 = vld [vmem:[%s7236_s1 + $0x69c] sm:$0xf0]  ;;  %v5169_v49 = vld [vmem:[%s7236_s1 + $0x120] sm:$0xf0] }
 0x370   : > { %v5071_v31 = vld [vmem:[%s7236_s1 + $0x40] sm:$0xf]  ;;  %v5872_v53 = vor.u32 %v6437_v46, %v5871_v45  ;;  %3777 = vmatpush.bf16.msra.mxu2 %v5616_v50  ;;  %v6257_v45 = vld [vmem:[%s7236_s1 + $0x104] sm:$0xf]  ;;  %v5460_v46 = vor.u32 %v6329_v37, %v5457_v39 }
 0x371   : > { %v6237_v51 = vld [vmem:[%s7236_s1 + $0x5c] sm:$0xf0]  ;;  %v6321_v50 = vld [vmem:[%s7236_s1 + $0x304] sm:$0xf] }
 0x372   : > { %v5327_v52 = vld [vmem:[%s7236_s1 + $0x240] sm:$0xf]  ;;  %v5072_v61 = vor.u32 %v6237_v51, %v5071_v31  ;;  %3790 = vmatpush.bf16.msra.mxu3 %v5872_v53  ;;  %v5425_v31 = vld [vmem:[%s7236_s1 + $0x320] sm:$0xf0]  ;;  %v5972_v51 = vor.u32 %v6457_v42, %v5969_v43 }
 0x373   : > { %v6301_v55 = vld [vmem:[%s7236_s1 + $0x25c] sm:$0xf0]  ;;  %v5681_v53 = vld [vmem:[%s7236_s1 + $0x520] sm:$0xf0] }
 0x374   : > { %v5583_v56 = vld [vmem:[%s7236_s1 + $0x440] sm:$0xf]  ;;  %v5328_v0 = vor.u32 %v6301_v55, %v5327_v52  ;;  %3752 = vmatpush.bf16.msra.mxu0 %v5072_v61  ;;  %v6385_v52 = vld [vmem:[%s7236_s1 + $0x504] sm:$0xf] }
 0x375   : > { %v6365_v57 = vld [vmem:[%s7236_s1 + $0x45c] sm:$0xf0]  ;;  %v6449_v55 = vld [vmem:[%s7236_s1 + $0x704] sm:$0xf] }
 0x376   : > { %v5839_v58 = vld [vmem:[%s7236_s1 + $0x640] sm:$0xf]  ;;  %v5584_v10 = vor.u32 %v6365_v57, %v5583_v56  ;;  %3765 = vmatpush.bf16.msra.mxu1 %v5328_v0  ;;  %v5937_v56 = vld [vmem:[%s7236_s1 + $0x720] sm:$0xf0]  ;;  %v7498_v57 = vld [vmem:[#allocation1 + $0x12] sm:$0xff]  ;;  %v5684_v0 = vor.u32 %v6385_v52, %v5681_v53 }
 0x377   : > { %v6429_v60 = vld [vmem:[%s7236_s1 + $0x65c] sm:$0xf0]  ;;  %v5105_v15 = vld [vmem:[%s7236_s1 + $0xa0] sm:$0xf0]  ;;  %v6039_v53 = vld [vmem:[%s7236_s1 + $0x7c8] sm:$0xf] }
 0x378   : > { %v5039_v62 = vld [vmem:[%s7236_s1] sm:$0xf]  ;;  %v5840_v3 = vor.u32 %v6429_v60, %v5839_v58  ;;  %3778 = vmatpush.bf16.msra.mxu2 %v5584_v10  ;;  %v5172_v60 = vor.u32 %v6257_v45, %v5169_v49  ;;  %v6249_v10 = vld [vmem:[%s7236_s1 + $0xc4] sm:$0xf]  ;;  %v6286_v45 = vld [vmem:[%s7236_s1 + $0x1e4] sm:$0xf0] }
 0x379   : > { %v6229_v63 = vld [vmem:[%s7236_s1 + $0x1c] sm:$0xf0]  ;;  %v6305_v16 = vld [vmem:[%s7236_s1 + $0x284] sm:$0xf]  ;;  %v6350_v49 = vld [vmem:[%s7236_s1 + $0x3e4] sm:$0xf0] }
 0x37a   : > { %v5295_v11 = vld [vmem:[%s7236_s1 + $0x200] sm:$0xf]  ;;  %v5040_v13 = vor.u32 %v6229_v63, %v5039_v62  ;;  %3791 = vmatpush.bf16.msra.mxu3 %v5840_v3  ;;  %v7505_v62 = vld [vmem:[#allocation1 + $0x9] sm:$0xff]  ;;  %v5428_v63 = vor.u32 %v6321_v50, %v5425_v31  ;;  %v5393_v3 = vld [vmem:[%s7236_s1 + $0x2e0] sm:$0xf0] }
 0x37b   : > { %v6293_v1 = vld [vmem:[%s7236_s1 + $0x21c] sm:$0xf0]  ;;  %v6369_v5 = vld [vmem:[%s7236_s1 + $0x484] sm:$0xf]  ;;  %v5783_v50 = vld [vmem:[%s7236_s1 + $0x5c8] sm:$0xf] }
 0x37c   : > { %v5551_v2 = vld [vmem:[%s7236_s1 + $0x400] sm:$0xf]  ;;  %v5296_v7 = vor.u32 %v6293_v1, %v5295_v11  ;;  %3753 = vmatpush.bf16.msra.mxu0 %v5040_v13  ;;  %v5137_v11 = vld [vmem:[%s7236_s1 + $0xe0] sm:$0xf0]  ;;  %v6414_v31 = vld [vmem:[%s7236_s1 + $0x5e4] sm:$0xf0] }
 0x37d   : > { %v6357_v6 = vld [vmem:[%s7236_s1 + $0x41c] sm:$0xf0]  ;;  %v6313_v1 = vld [vmem:[%s7236_s1 + $0x2c4] sm:$0xf]  ;;  %v5140_v25 = vor.u32 %v6249_v10, %v5137_v11  ;;  %v5239_v10 = vld [vmem:[%s7236_s1 + $0x188] sm:$0xf] }
 0x37e   : > { %v5807_v59 = vld [vmem:[%s7236_s1 + $0x600] sm:$0xf]  ;;  %v5552_v12 = vor.u32 %v6357_v6, %v5551_v2  ;;  %3766 = vmatpush.bf16.msra.mxu1 %v5296_v7  ;;  %v5940_v2 = vor.u32 %v6449_v55, %v5937_v56  ;;  %v6377_v6 = vld [vmem:[%s7236_s1 + $0x4c4] sm:$0xf]  ;;  %v5396_v47 = vor.u32 %v6313_v1, %v5393_v3  ;;  %v6478_v55 = vld [vmem:[%s7236_s1 + $0x7e4] sm:$0xf0] }
 0x37f   : > { %v6421_v4 = vld [vmem:[%s7236_s1 + $0x61c] sm:$0xf0]  ;;  %v5617_v9 = vld [vmem:[%s7236_s1 + $0x4a0] sm:$0xf0]  ;;  %v6278_v11 = vld [vmem:[%s7236_s1 + $0x1a4] sm:$0xf0] }
 0x380   : > { %v5808_v18 = vor.u32 %v6421_v4, %v5807_v59  ;;  %3779 = vmatpush.bf16.msra.mxu2 %v5552_v12  ;;  %3798 = vmatpush.bf16.msrb.mxu0 %v5268_v19  ;;  %v7500_v58 = vld [vmem:[#allocation1] sm:$0xff]  ;;  %v5620_v21 = vor.u32 %v6369_v5, %v5617_v9 }
 0x381   : > { %v7503_v61 = vld [vmem:[#allocation1 + $0x1b] sm:$0xff]  ;;  %3754 = vmatmul.bf16.vlgmr.msra.gmra.mxu0 %v7500_v58  ;;  %3767 = vmatmul.bf16.vlgmr.msra.gmra.mxu1 %v7505_v62  ;;  %v5495_v1 = vld [vmem:[%s7236_s1 + $0x388] sm:$0xf] }
 0x382   : > { %3792 = vmatpush.bf16.msra.mxu3 %v5808_v18  ;;  %3811 = vmatpush.bf16.msrb.mxu1 %v5524_v20  ;;  %v5649_v59 = vld [vmem:[%s7236_s1 + $0x4e0] sm:$0xf0]  ;;  %v5108_v20 = vor.u32 %v6241_v14, %v5105_v15  ;;  %v6342_v3 = vld [vmem:[%s7236_s1 + $0x3a4] sm:$0xf0] }
 0x383   : > { %3780 = vmatmul.bf16.vlgmr.msra.gmra.mxu2 %v7498_v57  ;;  %v6441_v4 = vld [vmem:[%s7236_s1 + $0x6c4] sm:$0xf]  ;;  %v5652_v13 = vor.u32 %v6377_v6, %v5649_v59  ;;  %v5751_v6 = vld [vmem:[%s7236_s1 + $0x588] sm:$0xf] }
 0x384   : > { %3824 = vmatpush.bf16.msrb.mxu2 %v5780_v54  ;;  %3799 = vmatpush.bf16.msrb.mxu0 %v5236_v32  ;;  %v5908_v7 = vor.u32 %v6441_v4, %v5905_v8  ;;  %v5361_v12 = vld [vmem:[%s7236_s1 + $0x2a0] sm:$0xf0]  ;;  %v6406_v59 = vld [vmem:[%s7236_s1 + $0x5a4] sm:$0xf0] }
 0x385   : > { %3793 = vmatmul.bf16.vlgmr.msra.gmra.mxu3 %v7503_v61  ;;  %v6433_v18 = vld [vmem:[%s7236_s1 + $0x684] sm:$0xf]  ;;  %v5364_v54 = vor.u32 %v6305_v16, %v5361_v12  ;;  %v6007_v4 = vld [vmem:[%s7236_s1 + $0x788] sm:$0xf] }
 0x386   : > { %3837 = vmatpush.bf16.msrb.mxu3 %v6036_v17  ;;  %3812 = vmatpush.bf16.msrb.mxu1 %v5492_v33  ;;  %v5873_v19 = vld [vmem:[%s7236_s1 + $0x6a0] sm:$0xf0]  ;;  %v6470_v8 = vld [vmem:[%s7236_s1 + $0x7a4] sm:$0xf0] }
 0x387   : > { %v6233_v22 = vld [vmem:[%s7236_s1 + $0x44] sm:$0xf]  ;;  %v5876_v24 = vor.u32 %v6433_v18, %v5873_v19  ;;  %v5207_v14 = vld [vmem:[%s7236_s1 + $0x148] sm:$0xf] }
 0x388   : > { %3825 = vmatpush.bf16.msrb.mxu2 %v5748_v34  ;;  %3800 = vmatpush.bf16.msrb.mxu0 %v5204_v44  ;;  %v5073_v23 = vld [vmem:[%s7236_s1 + $0x60] sm:$0xf0]  ;;  %v5271_v44 = vld [vmem:[%s7236_s1 + $0x1c8] sm:$0xf] }
 0x389   : > { %v6297_v17 = vld [vmem:[%s7236_s1 + $0x244] sm:$0xf]  ;;  %v5076_v32 = vor.u32 %v6233_v22, %v5073_v23  ;;  %v6270_v15 = vld [vmem:[%s7236_s1 + $0x164] sm:$0xf0] }
 0x38a   : > { %3838 = vmatpush.bf16.msrb.mxu3 %v6004_v38  ;;  %3813 = vmatpush.bf16.msrb.mxu1 %v5460_v46  ;;  %v5329_v26 = vld [vmem:[%s7236_s1 + $0x260] sm:$0xf0]  ;;  %v5527_v46 = vld [vmem:[%s7236_s1 + $0x3c8] sm:$0xf] }
 0x38b   : > { %v6361_v27 = vld [vmem:[%s7236_s1 + $0x444] sm:$0xf]  ;;  %v5332_v35 = vor.u32 %v6297_v17, %v5329_v26  ;;  %v5463_v16 = vld [vmem:[%s7236_s1 + $0x348] sm:$0xf] }
 0x38c   : > { %3826 = vmatpush.bf16.msrb.mxu2 %v5716_v48  ;;  %3801 = vmatpush.bf16.msrb.mxu0 %v5172_v60  ;;  %v5585_v28 = vld [vmem:[%s7236_s1 + $0x460] sm:$0xf0]  ;;  %v5272_v60 = vor.u32 %v6286_v45, %v5271_v44  ;;  %v6334_v12 = vld [vmem:[%s7236_s1 + $0x364] sm:$0xf0] }
 0x38d   : > { %v6425_v29 = vld [vmem:[%s7236_s1 + $0x644] sm:$0xf]  ;;  %v5588_v36 = vor.u32 %v6361_v27, %v5585_v28  ;;  %v5719_v5 = vld [vmem:[%s7236_s1 + $0x548] sm:$0xf] }
 0x38e   : > { %3839 = vmatpush.bf16.msrb.mxu3 %v5972_v51  ;;  %3814 = vmatpush.bf16.msrb.mxu1 %v5428_v63  ;;  %v5841_v30 = vld [vmem:[%s7236_s1 + $0x660] sm:$0xf0]  ;;  %v5528_v63 = vor.u32 %v6350_v49, %v5527_v46  ;;  %v6398_v9 = vld [vmem:[%s7236_s1 + $0x564] sm:$0xf0] }
 0x38f   : > { %v6225_v33 = vld [vmem:[%s7236_s1 + $0x4] sm:$0xf]  ;;  %v5844_v40 = vor.u32 %v6425_v29, %v5841_v30  ;;  %v5975_v18 = vld [vmem:[%s7236_s1 + $0x748] sm:$0xf] }
 0x390   : > { %3827 = vmatpush.bf16.msrb.mxu2 %v5684_v0  ;;  %3802 = vmatpush.bf16.msrb.mxu0 %v5140_v25  ;;  %v5041_v34 = vld [vmem:[%s7236_s1 + $0x20] sm:$0xf0]  ;;  %v5784_v0 = vor.u32 %v6414_v31, %v5783_v50  ;;  %v5240_v25 = vor.u32 %v6278_v11, %v5239_v10  ;;  %v6462_v19 = vld [vmem:[%s7236_s1 + $0x764] sm:$0xf0] }
 0x391   : > { %v6289_v37 = vld [vmem:[%s7236_s1 + $0x204] sm:$0xf]  ;;  %v5044_v48 = vor.u32 %v6225_v33, %v5041_v34  ;;  %v5175_v22 = vld [vmem:[%s7236_s1 + $0x108] sm:$0xf] }
 0x392   : > { %3840 = vmatpush.bf16.msrb.mxu3 %v5940_v2  ;;  %3815 = vmatpush.bf16.msrb.mxu1 %v5396_v47  ;;  %v5297_v38 = vld [vmem:[%s7236_s1 + $0x220] sm:$0xf0]  ;;  %v6040_v2 = vor.u32 %v6478_v55, %v6039_v53  ;;  %v5496_v47 = vor.u32 %v6342_v3, %v5495_v1  ;;  %v6262_v23 = vld [vmem:[%s7236_s1 + $0x124] sm:$0xf0] }
 0x393   : > { %v6353_v39 = vld [vmem:[%s7236_s1 + $0x404] sm:$0xf]  ;;  %v5300_v51 = vor.u32 %v6289_v37, %v5297_v38  ;;  %v5431_v17 = vld [vmem:[%s7236_s1 + $0x308] sm:$0xf] }
 0x394   : > { %3828 = vmatpush.bf16.msrb.mxu2 %v5652_v13  ;;  %3803 = vmatpush.bf16.msrb.mxu0 %v5108_v20  ;;  %v5553_v41 = vld [vmem:[%s7236_s1 + $0x420] sm:$0xf0]  ;;  %v5752_v13 = vor.u32 %v6406_v59, %v5751_v6  ;;  %v5208_v20 = vor.u32 %v6270_v15, %v5207_v14  ;;  %v6326_v26 = vld [vmem:[%s7236_s1 + $0x324] sm:$0xf0] }
 0x395   : > { %v6417_v42 = vld [vmem:[%s7236_s1 + $0x604] sm:$0xf]  ;;  %v5556_v52 = vor.u32 %v6353_v39, %v5553_v41  ;;  %v5687_v27 = vld [vmem:[%s7236_s1 + $0x508] sm:$0xf]  ;;  %v5432_v33 = vor.u32 %v6326_v26, %v5431_v17  ;;  %v6410_v17 = vld [vmem:[%s7236_s1 + $0x5cc] sm:$0xf] }
 0x396   : > { %3841 = vmatpush.bf16.msrb.mxu3 %v5908_v7  ;;  %3816 = vmatpush.bf16.msrb.mxu1 %v5364_v54  ;;  %v5809_v43 = vld [vmem:[%s7236_s1 + $0x620] sm:$0xf0]  ;;  %v6008_v7 = vor.u32 %v6470_v8, %v6007_v4  ;;  %v5464_v54 = vor.u32 %v6334_v12, %v5463_v16  ;;  %v6390_v28 = vld [vmem:[%s7236_s1 + $0x524] sm:$0xf0] }
 0x397   : > { %v5812_v56 = vor.u32 %v6417_v42, %v5809_v43  ;;  %v5943_v29 = vld [vmem:[%s7236_s1 + $0x708] sm:$0xf]  ;;  %v5688_v34 = vor.u32 %v6390_v28, %v5687_v27  ;;  %v6474_v28 = vld [vmem:[%s7236_s1 + $0x7cc] sm:$0xf] }
 0x398   : > { %3829 = vmatpush.bf16.msrb.mxu2 %v5620_v21  ;;  %3804 = vmatpush.bf16.msrb.mxu0 %v5076_v32  ;;  %v5720_v21 = vor.u32 %v6398_v9, %v5719_v5  ;;  %v6454_v30 = vld [vmem:[%s7236_s1 + $0x724] sm:$0xf0]  ;;  %v5176_v32 = vor.u32 %v6262_v23, %v5175_v22  ;;  %v5529_v23 = vld [vmem:[%s7236_s1 + $0x3e8] sm:$0xf0] }
 0x399   : > { %v5399_v37 = vld [vmem:[%s7236_s1 + $0x2c8] sm:$0xf]  ;;  %v5944_v38 = vor.u32 %v6454_v30, %v5943_v29  ;;  %v6041_v29 = vld [vmem:[%s7236_s1 + $0x7e8] sm:$0xf0] }
 0x39a   : > { %3842 = vmatpush.bf16.msrb.mxu3 %v5876_v24  ;;  %3817 = vmatpush.bf16.msrb.mxu1 %v5332_v35  ;;  %v5976_v24 = vor.u32 %v6462_v19, %v5975_v18  ;;  %v5143_v35 = vld [vmem:[%s7236_s1 + $0xc8] sm:$0xf] }
 0x39b   : > { %v6318_v39 = vld [vmem:[%s7236_s1 + $0x2e4] sm:$0xf0] }
 0x39c   : > { %3830 = vmatpush.bf16.msrb.mxu2 %v5588_v36  ;;  %3805 = vmatpush.bf16.msrb.mxu0 %v5044_v48  ;;  %v6254_v36 = vld [vmem:[%s7236_s1 + $0xe4] sm:$0xf0]  ;;  %v5400_v45 = vor.u32 %v6318_v39, %v5399_v37  ;;  %v6338_v37 = vld [vmem:[%s7236_s1 + $0x38c] sm:$0xf] }
 0x39d   : > { %v6382_v41 = vld [vmem:[%s7236_s1 + $0x4e4] sm:$0xf0]  ;;  %v5144_v44 = vor.u32 %v6254_v36, %v5143_v35  ;;  %v6274_v35 = vld [vmem:[%s7236_s1 + $0x18c] sm:$0xf] }
 0x39e   : > { %3843 = vmatpush.bf16.msrb.mxu3 %v5844_v40  ;;  %3818 = vmatpush.bf16.msrb.mxu1 %v5300_v51  ;;  %v5655_v40 = vld [vmem:[%s7236_s1 + $0x4c8] sm:$0xf]  ;;  %v5241_v36 = vld [vmem:[%s7236_s1 + $0x1a8] sm:$0xf0] }
 0x39f   : > { %3806 = vmatmul.bf16.vlgmr.msrb.gmra.mxu0 %v7500_v58  ;;  %v5911_v42 = vld [vmem:[%s7236_s1 + $0x6c8] sm:$0xf]  ;;  %v5656_v46 = vor.u32 %v6382_v41, %v5655_v40  ;;  %v5497_v39 = vld [vmem:[%s7236_s1 + $0x3a8] sm:$0xf0] }
 0x3a0   : > { %3831 = vmatpush.bf16.msrb.mxu2 %v5556_v52  ;;  %3850 = vmatpush.bf16.msra.mxu0 %v5272_v60  ;;  %v6446_v43 = vld [vmem:[%s7236_s1 + $0x6e4] sm:$0xf0]  ;;  %v6402_v40 = vld [vmem:[%s7236_s1 + $0x58c] sm:$0xf] }
 0x3a1   : > { %3819 = vmatmul.bf16.vlgmr.msrb.gmra.mxu1 %v7505_v62  ;;  %v5111_v48 = vld [vmem:[%s7236_s1 + $0x88] sm:$0xf]  ;;  %v5912_v31 = vor.u32 %v6446_v43, %v5911_v42  ;;  %v5753_v41 = vld [vmem:[%s7236_s1 + $0x5a8] sm:$0xf0] }
 0x3a2   : > { %3844 = vmatpush.bf16.msrb.mxu3 %v5812_v56  ;;  %3863 = vmatpush.bf16.msra.mxu1 %v5528_v63  ;;  %v6246_v49 = vld [vmem:[%s7236_s1 + $0xa4] sm:$0xf0]  ;;  %v6466_v42 = vld [vmem:[%s7236_s1 + $0x78c] sm:$0xf] }
 0x3a3   : > { %3832 = vmatmul.bf16.vlgmr.msrb.gmra.mxu2 %v7498_v57  ;;  %v5367_v50 = vld [vmem:[%s7236_s1 + $0x288] sm:$0xf]  ;;  %v5112_v60 = vor.u32 %v6246_v49, %v5111_v48  ;;  %v6009_v43 = vld [vmem:[%s7236_s1 + $0x7a8] sm:$0xf0] }
 0x3a4   : > { %3876 = vmatpush.bf16.msra.mxu2 %v5784_v0  ;;  %3851 = vmatpush.bf16.msra.mxu0 %v5240_v25  ;;  %v6310_v51 = vld [vmem:[%s7236_s1 + $0x2a4] sm:$0xf0]  ;;  %v6266_v48 = vld [vmem:[%s7236_s1 + $0x14c] sm:$0xf] }
 0x3a5   : > { %3845 = vmatmul.bf16.vlgmr.msrb.gmra.mxu3 %v7503_v61  ;;  %v5623_v52 = vld [vmem:[%s7236_s1 + $0x488] sm:$0xf]  ;;  %v5368_v63 = vor.u32 %v6310_v51, %v5367_v50  ;;  %v5209_v49 = vld [vmem:[%s7236_s1 + $0x168] sm:$0xf0] }
 0x3a6   : > { %3889 = vmatpush.bf16.msra.mxu3 %v6040_v2  ;;  %3864 = vmatpush.bf16.msra.mxu1 %v5496_v47  ;;  %v6374_v53 = vld [vmem:[%s7236_s1 + $0x4a4] sm:$0xf0]  ;;  %v6330_v50 = vld [vmem:[%s7236_s1 + $0x34c] sm:$0xf] }
 0x3a7   : > { %v5879_v55 = vld [vmem:[%s7236_s1 + $0x688] sm:$0xf]  ;;  %v5624_v0 = vor.u32 %v6374_v53, %v5623_v52  ;;  %v5465_v51 = vld [vmem:[%s7236_s1 + $0x368] sm:$0xf0] }
 0x3a8   : > { %3877 = vmatpush.bf16.msra.mxu2 %v5752_v13  ;;  %3852 = vmatpush.bf16.msra.mxu0 %v5208_v20  ;;  %v6438_v56 = vld [vmem:[%s7236_s1 + $0x6a4] sm:$0xf0]  ;;  %v6282_v20 = vld [vmem:[%s7236_s1 + $0x1cc] sm:$0xf] }
 0x3a9   : > { %v5079_v10 = vld [vmem:[%s7236_s1 + $0x48] sm:$0xf]  ;;  %v5880_v2 = vor.u32 %v6438_v56, %v5879_v55  ;;  %v6394_v52 = vld [vmem:[%s7236_s1 + $0x54c] sm:$0xf] }
 0x3aa   : > { %3890 = vmatpush.bf16.msra.mxu3 %v6008_v7  ;;  %3865 = vmatpush.bf16.msra.mxu1 %v5464_v54  ;;  %v6238_v11 = vld [vmem:[%s7236_s1 + $0x64] sm:$0xf0]  ;;  %v5273_v54 = vld [vmem:[%s7236_s1 + $0x1e8] sm:$0xf0] }
 0x3ab   : > { %v5335_v1 = vld [vmem:[%s7236_s1 + $0x248] sm:$0xf]  ;;  %v5080_v25 = vor.u32 %v6238_v11, %v5079_v10  ;;  %v5721_v53 = vld [vmem:[%s7236_s1 + $0x568] sm:$0xf0] }
 0x3ac   : > { %3878 = vmatpush.bf16.msra.mxu2 %v5720_v21  ;;  %3853 = vmatpush.bf16.msra.mxu0 %v5176_v32  ;;  %v6302_v3 = vld [vmem:[%s7236_s1 + $0x264] sm:$0xf0]  ;;  %v6346_v21 = vld [vmem:[%s7236_s1 + $0x3cc] sm:$0xf]  ;;  %v5276_v32 = vor.u32 %v6282_v20, %v5273_v54 }
 0x3ad   : > { %v5591_v6 = vld [vmem:[%s7236_s1 + $0x448] sm:$0xf]  ;;  %v5336_v14 = vor.u32 %v6302_v3, %v5335_v1  ;;  %v6458_v55 = vld [vmem:[%s7236_s1 + $0x74c] sm:$0xf] }
 0x3ae   : > { %3891 = vmatpush.bf16.msra.mxu3 %v5976_v24  ;;  %3866 = vmatpush.bf16.msra.mxu1 %v5432_v33  ;;  %v6366_v59 = vld [vmem:[%s7236_s1 + $0x464] sm:$0xf0]  ;;  %v5785_v24 = vld [vmem:[%s7236_s1 + $0x5e8] sm:$0xf0]  ;;  %v5532_v33 = vor.u32 %v6346_v21, %v5529_v23 }
 0x3af   : > { %v5847_v4 = vld [vmem:[%s7236_s1 + $0x648] sm:$0xf]  ;;  %v5592_v15 = vor.u32 %v6366_v59, %v5591_v6  ;;  %v5977_v56 = vld [vmem:[%s7236_s1 + $0x768] sm:$0xf0] }
 0x3b0   : > { %3879 = vmatpush.bf16.msra.mxu2 %v5688_v34  ;;  %3854 = vmatpush.bf16.msra.mxu0 %v5144_v44  ;;  %v6430_v8 = vld [vmem:[%s7236_s1 + $0x664] sm:$0xf0]  ;;  %v5788_v34 = vor.u32 %v6410_v17, %v5785_v24  ;;  %v5244_v44 = vor.u32 %v6274_v35, %v5241_v36  ;;  %v6258_v10 = vld [vmem:[%s7236_s1 + $0x10c] sm:$0xf] }
 0x3b1   : > { %v5047_v47 = vld [vmem:[%s7236_s1 + $0x8] sm:$0xf]  ;;  %v5848_v5 = vor.u32 %v6430_v8, %v5847_v4  ;;  %v5177_v11 = vld [vmem:[%s7236_s1 + $0x128] sm:$0xf0] }
 0x3b2   : > { %3892 = vmatpush.bf16.msra.mxu3 %v5944_v38  ;;  %3867 = vmatpush.bf16.msra.mxu1 %v5400_v45  ;;  %v6230_v13 = vld [vmem:[%s7236_s1 + $0x24] sm:$0xf0]  ;;  %v6044_v38 = vor.u32 %v6474_v28, %v6041_v29  ;;  %v5500_v45 = vor.u32 %v6338_v37, %v5497_v39  ;;  %v6322_v1 = vld [vmem:[%s7236_s1 + $0x30c] sm:$0xf] }
 0x3b3   : > { %v5303_v16 = vld [vmem:[%s7236_s1 + $0x208] sm:$0xf]  ;;  %v5048_v22 = vor.u32 %v6230_v13, %v5047_v47  ;;  %v5433_v3 = vld [vmem:[%s7236_s1 + $0x328] sm:$0xf0] }
 0x3b4   : > { %3880 = vmatpush.bf16.msra.mxu2 %v5656_v46  ;;  %3855 = vmatpush.bf16.msra.mxu0 %v5112_v60  ;;  %v6294_v7 = vld [vmem:[%s7236_s1 + $0x224] sm:$0xf0]  ;;  %v5756_v46 = vor.u32 %v6402_v40, %v5753_v41  ;;  %v5212_v60 = vor.u32 %v6266_v48, %v5209_v49  ;;  %v6386_v6 = vld [vmem:[%s7236_s1 + $0x50c] sm:$0xf]  ;;  %v5436_v47 = vor.u32 %v6322_v1, %v5433_v3  ;;  %v5791_v1 = vld [vmem:[%s7236_s1 + $0x5d0] sm:$0xf] }
 0x3b5   : > { %v5559_v12 = vld [vmem:[%s7236_s1 + $0x408] sm:$0xf]  ;;  %v5304_v26 = vor.u32 %v6294_v7, %v5303_v16  ;;  %v5689_v59 = vld [vmem:[%s7236_s1 + $0x528] sm:$0xf0] }
 0x3b6   : > { %3893 = vmatpush.bf16.msra.mxu3 %v5912_v31  ;;  %3868 = vmatpush.bf16.msra.mxu1 %v5368_v63  ;;  %v6358_v9 = vld [vmem:[%s7236_s1 + $0x424] sm:$0xf0]  ;;  %v6012_v31 = vor.u32 %v6466_v42, %v6009_v43  ;;  %v5468_v63 = vor.u32 %v6330_v50, %v5465_v51  ;;  %v6450_v4 = vld [vmem:[%s7236_s1 + $0x70c] sm:$0xf]  ;;  %v5692_v13 = vor.u32 %v6386_v6, %v5689_v59  ;;  %v6047_v59 = vld [vmem:[%s7236_s1 + $0x7d0] sm:$0xf] }
 0x3b7   : > { %v5815_v18 = vld [vmem:[%s7236_s1 + $0x608] sm:$0xf]  ;;  %v5560_v27 = vor.u32 %v6358_v9, %v5559_v12  ;;  %v5945_v8 = vld [vmem:[%s7236_s1 + $0x728] sm:$0xf0] }
 0x3b8   : > { %3881 = vmatpush.bf16.msra.mxu2 %v5624_v0  ;;  %v6422_v19 = vld [vmem:[%s7236_s1 + $0x624] sm:$0xf0]  ;;  %3856 = vmatpush.bf16.msra.mxu0 %v5080_v25  ;;  %v5724_v0 = vor.u32 %v6394_v52, %v5721_v53  ;;  %v5180_v25 = vor.u32 %v6258_v10, %v5177_v11  ;;  %v6314_v16 = vld [vmem:[%s7236_s1 + $0x2cc] sm:$0xf]  ;;  %v5948_v7 = vor.u32 %v6450_v4, %v5945_v8  ;;  %v6351_v11 = vld [vmem:[%s7236_s1 + $0x3ec] sm:$0xf0] }
 0x3b9   : > { %v5816_v30 = vor.u32 %v6422_v19, %v5815_v18  ;;  %v5401_v12 = vld [vmem:[%s7236_s1 + $0x2e8] sm:$0xf0]  ;;  %v6479_v4 = vld [vmem:[%s7236_s1 + $0x7ec] sm:$0xf0] }
 0x3ba   : > { %3894 = vmatpush.bf16.msra.mxu3 %v5880_v2  ;;  %3869 = vmatpush.bf16.msra.mxu1 %v5336_v14  ;;  %v5980_v2 = vor.u32 %v6458_v55, %v5977_v56  ;;  %v6250_v14 = vld [vmem:[%s7236_s1 + $0xcc] sm:$0xf]  ;;  %v5404_v54 = vor.u32 %v6314_v16, %v5401_v12  ;;  %v5503_v16 = vld [vmem:[%s7236_s1 + $0x390] sm:$0xf] }
 0x3bb   : > { %v5657_v9 = vld [vmem:[%s7236_s1 + $0x4e8] sm:$0xf0]  ;;  %v6343_v12 = vld [vmem:[%s7236_s1 + $0x3ac] sm:$0xf0] }
 0x3bc   : > { %3882 = vmatpush.bf16.msra.mxu2 %v5592_v15  ;;  %3857 = vmatpush.bf16.msra.mxu0 %v5048_v22  ;;  %v5145_v15 = vld [vmem:[%s7236_s1 + $0xe8] sm:$0xf0] }
 0x3bd   : > { %v6442_v18 = vld [vmem:[%s7236_s1 + $0x6cc] sm:$0xf]  ;;  %v5148_v20 = vor.u32 %v6250_v14, %v5145_v15  ;;  %v5247_v14 = vld [vmem:[%s7236_s1 + $0x190] sm:$0xf] }
 0x3be   : > { %3895 = vmatpush.bf16.msra.mxu3 %v5848_v5  ;;  %3870 = vmatpush.bf16.msra.mxu1 %v5304_v26  ;;  %v6378_v5 = vld [vmem:[%s7236_s1 + $0x4cc] sm:$0xf]  ;;  %v6279_v15 = vld [vmem:[%s7236_s1 + $0x1ac] sm:$0xf0] }
 0x3bf   : > { %3858 = vmatmul.bf16.vlgmr.msra.gmra.mxu0 %v7500_v58  ;;  %v5913_v19 = vld [vmem:[%s7236_s1 + $0x6e8] sm:$0xf0]  ;;  %v5660_v21 = vor.u32 %v6378_v5, %v5657_v9  ;;  %v5759_v5 = vld [vmem:[%s7236_s1 + $0x590] sm:$0xf] }
 0x3c0   : > { %3883 = vmatpush.bf16.msra.mxu2 %v5560_v27  ;;  %3902 = vmatpush.bf16.msrb.mxu0 %v5276_v32  ;;  %v6242_v22 = vld [vmem:[%s7236_s1 + $0x8c] sm:$0xf]  ;;  %v5916_v24 = vor.u32 %v6442_v18, %v5913_v19  ;;  %v6407_v9 = vld [vmem:[%s7236_s1 + $0x5ac] sm:$0xf0] }
 0x3c1   : > { %3871 = vmatmul.bf16.vlgmr.msra.gmra.mxu1 %v7505_v62  ;;  %v5113_v23 = vld [vmem:[%s7236_s1 + $0xa8] sm:$0xf0]  ;;  %v6015_v18 = vld [vmem:[%s7236_s1 + $0x790] sm:$0xf] }
 0x3c2   : > { %3896 = vmatpush.bf16.msra.mxu3 %v5816_v30  ;;  %3915 = vmatpush.bf16.msrb.mxu1 %v5532_v33  ;;  %v6306_v17 = vld [vmem:[%s7236_s1 + $0x28c] sm:$0xf]  ;;  %v5116_v32 = vor.u32 %v6242_v22, %v5113_v23  ;;  %v6471_v19 = vld [vmem:[%s7236_s1 + $0x7ac] sm:$0xf0] }
 0x3c3   : > { %3884 = vmatmul.bf16.vlgmr.msra.gmra.mxu2 %v7498_v57  ;;  %v5369_v26 = vld [vmem:[%s7236_s1 + $0x2a8] sm:$0xf0]  ;;  %v5215_v22 = vld [vmem:[%s7236_s1 + $0x150] sm:$0xf] }
 0x3c4   : > { %3928 = vmatpush.bf16.msrb.mxu2 %v5788_v34  ;;  %3903 = vmatpush.bf16.msrb.mxu0 %v5244_v44  ;;  %v6370_v27 = vld [vmem:[%s7236_s1 + $0x48c] sm:$0xf]  ;;  %v5372_v33 = vor.u32 %v6306_v17, %v5369_v26  ;;  %v6271_v23 = vld [vmem:[%s7236_s1 + $0x16c] sm:$0xf0] }
 0x3c5   : > { %3897 = vmatmul.bf16.vlgmr.msra.gmra.mxu3 %v7503_v61  ;;  %v5625_v28 = vld [vmem:[%s7236_s1 + $0x4a8] sm:$0xf0]  ;;  %v5471_v17 = vld [vmem:[%s7236_s1 + $0x350] sm:$0xf] }
 0x3c6   : > { %3941 = vmatpush.bf16.msrb.mxu3 %v6044_v38  ;;  %3916 = vmatpush.bf16.msrb.mxu1 %v5500_v45  ;;  %v6434_v29 = vld [vmem:[%s7236_s1 + $0x68c] sm:$0xf]  ;;  %v5628_v34 = vor.u32 %v6370_v27, %v5625_v28  ;;  %v6335_v26 = vld [vmem:[%s7236_s1 + $0x36c] sm:$0xf0] }
 0x3c7   : > { %v5881_v30 = vld [vmem:[%s7236_s1 + $0x6a8] sm:$0xf0]  ;;  %v5727_v27 = vld [vmem:[%s7236_s1 + $0x550] sm:$0xf] }
 0x3c8   : > { %3929 = vmatpush.bf16.msrb.mxu2 %v5756_v46  ;;  %3904 = vmatpush.bf16.msrb.mxu0 %v5212_v60  ;;  %v6234_v35 = vld [vmem:[%s7236_s1 + $0x4c] sm:$0xf]  ;;  %v5884_v38 = vor.u32 %v6434_v29, %v5881_v30  ;;  %v5279_v60 = vld [vmem:[%s7236_s1 + $0x1d0] sm:$0xf] }
 0x3c9   : > { %v5081_v36 = vld [vmem:[%s7236_s1 + $0x68] sm:$0xf0]  ;;  %v6399_v28 = vld [vmem:[%s7236_s1 + $0x56c] sm:$0xf0] }
 0x3ca   : > { %3942 = vmatpush.bf16.msrb.mxu3 %v6012_v31  ;;  %3917 = vmatpush.bf16.msrb.mxu1 %v5468_v63  ;;  %v6298_v37 = vld [vmem:[%s7236_s1 + $0x24c] sm:$0xf]  ;;  %v5084_v44 = vor.u32 %v6234_v35, %v5081_v36  ;;  %v6287_v63 = vld [vmem:[%s7236_s1 + $0x1ec] sm:$0xf0] }
 0x3cb   : > { %v5337_v39 = vld [vmem:[%s7236_s1 + $0x268] sm:$0xf0]  ;;  %v5983_v29 = vld [vmem:[%s7236_s1 + $0x750] sm:$0xf] }
 0x3cc   : > { %3930 = vmatpush.bf16.msrb.mxu2 %v5724_v0  ;;  %3905 = vmatpush.bf16.msrb.mxu0 %v5180_v25  ;;  %v6362_v40 = vld [vmem:[%s7236_s1 + $0x44c] sm:$0xf]  ;;  %v5340_v48 = vor.u32 %v6298_v37, %v5337_v39  ;;  %v5535_v0 = vld [vmem:[%s7236_s1 + $0x3d0] sm:$0xf]  ;;  %v5280_v25 = vor.u32 %v6287_v63, %v5279_v60 }
 0x3cd   : > { %v5593_v41 = vld [vmem:[%s7236_s1 + $0x468] sm:$0xf0]  ;;  %v6463_v30 = vld [vmem:[%s7236_s1 + $0x76c] sm:$0xf0] }
 0x3ce   : > { %3943 = vmatpush.bf16.msrb.mxu3 %v5980_v2  ;;  %3918 = vmatpush.bf16.msrb.mxu1 %v5436_v47  ;;  %v6426_v42 = vld [vmem:[%s7236_s1 + $0x64c] sm:$0xf]  ;;  %v5596_v49 = vor.u32 %v6362_v40, %v5593_v41  ;;  %v6415_v2 = vld [vmem:[%s7236_s1 + $0x5ec] sm:$0xf0]  ;;  %v5536_v47 = vor.u32 %v6351_v11, %v5535_v0 }
 0x3cf   : > { %v5849_v43 = vld [vmem:[%s7236_s1 + $0x668] sm:$0xf0]  ;;  %v5439_v35 = vld [vmem:[%s7236_s1 + $0x310] sm:$0xf] }
 0x3d0   : > { %3931 = vmatpush.bf16.msrb.mxu2 %v5692_v13  ;;  %3906 = vmatpush.bf16.msrb.mxu0 %v5148_v20  ;;  %v6226_v45 = vld [vmem:[%s7236_s1 + $0xc] sm:$0xf]  ;;  %v5852_v52 = vor.u32 %v6426_v42, %v5849_v43  ;;  %v5792_v13 = vor.u32 %v6415_v2, %v5791_v1  ;;  %v5248_v20 = vor.u32 %v6279_v15, %v5247_v14  ;;  %v6327_v36 = vld [vmem:[%s7236_s1 + $0x32c] sm:$0xf0] }
 0x3d1   : > { %v5049_v46 = vld [vmem:[%s7236_s1 + $0x28] sm:$0xf0]  ;;  %v5695_v37 = vld [vmem:[%s7236_s1 + $0x510] sm:$0xf]  ;;  %v5440_v41 = vor.u32 %v6327_v36, %v5439_v35  ;;  %v6475_v35 = vld [vmem:[%s7236_s1 + $0x7d4] sm:$0xf] }
 0x3d2   : > { %3944 = vmatpush.bf16.msrb.mxu3 %v5948_v7  ;;  %3919 = vmatpush.bf16.msrb.mxu1 %v5404_v54  ;;  %v6290_v50 = vld [vmem:[%s7236_s1 + $0x20c] sm:$0xf]  ;;  %v5052_v10 = vor.u32 %v6226_v45, %v5049_v46  ;;  %v6048_v7 = vor.u32 %v6479_v4, %v6047_v59  ;;  %v5504_v54 = vor.u32 %v6343_v12, %v5503_v16  ;;  %v6455_v39 = vld [vmem:[%s7236_s1 + $0x72c] sm:$0xf0] }
 0x3d3   : > { %v5305_v31 = vld [vmem:[%s7236_s1 + $0x228] sm:$0xf0]  ;;  %v5151_v43 = vld [vmem:[%s7236_s1 + $0xd0] sm:$0xf] }
 0x3d4   : > { %3932 = vmatpush.bf16.msrb.mxu2 %v5660_v21  ;;  %3907 = vmatpush.bf16.msrb.mxu0 %v5116_v32  ;;  %v6354_v51 = vld [vmem:[%s7236_s1 + $0x40c] sm:$0xf]  ;;  %v5308_v3 = vor.u32 %v6290_v50, %v5305_v31  ;;  %v5760_v21 = vor.u32 %v6407_v9, %v5759_v5  ;;  %v5472_v32 = vor.u32 %v6335_v26, %v5471_v17  ;;  %v5407_v45 = vld [vmem:[%s7236_s1 + $0x2d0] sm:$0xf] }
 0x3d5   : > { %v5561_v53 = vld [vmem:[%s7236_s1 + $0x428] sm:$0xf0]  ;;  %v6383_v50 = vld [vmem:[%s7236_s1 + $0x4ec] sm:$0xf0] }
 0x3d6   : > { %3945 = vmatpush.bf16.msrb.mxu3 %v5916_v24  ;;  %3920 = vmatpush.bf16.msrb.mxu1 %v5372_v33  ;;  %v6418_v55 = vld [vmem:[%s7236_s1 + $0x60c] sm:$0xf]  ;;  %v5564_v6 = vor.u32 %v6354_v51, %v5561_v53  ;;  %v6016_v24 = vor.u32 %v6471_v19, %v6015_v18  ;;  %v5728_v33 = vor.u32 %v6399_v28, %v5727_v27  ;;  %v5919_v31 = vld [vmem:[%s7236_s1 + $0x6d0] sm:$0xf]  ;;  %v6283_v27 = vld [vmem:[%s7236_s1 + $0x1d4] sm:$0xf] }
 0x3d7   : > { %v5817_v56 = vld [vmem:[%s7236_s1 + $0x628] sm:$0xf0]  ;;  %v6447_v51 = vld [vmem:[%s7236_s1 + $0x6ec] sm:$0xf0]  ;;  %v5281_v28 = vld [vmem:[%s7236_s1 + $0x1f0] sm:$0xf0] }
 0x3d8   : > { %3933 = vmatpush.bf16.msrb.mxu2 %v5628_v34  ;;  %3908 = vmatpush.bf16.msrb.mxu0 %v5084_v44  ;;  %v5820_v8 = vor.u32 %v6418_v55, %v5817_v56  ;;  %v5183_v34 = vld [vmem:[%s7236_s1 + $0x110] sm:$0xf]  ;;  %v5920_v0 = vor.u32 %v6447_v51, %v5919_v31  ;;  %v6267_v51 = vld [vmem:[%s7236_s1 + $0x154] sm:$0xf] }
 0x3d9   : > { %v6255_v44 = vld [vmem:[%s7236_s1 + $0xec] sm:$0xf0] }
 0x3da   : > { %3946 = vmatpush.bf16.msrb.mxu3 %v5884_v38  ;;  %3921 = vmatpush.bf16.msrb.mxu1 %v5340_v48  ;;  %v6391_v38 = vld [vmem:[%s7236_s1 + $0x52c] sm:$0xf0] }
 0x3db   : > { %v5696_v42 = vor.u32 %v6391_v38, %v5695_v37  ;;  %v6319_v48 = vld [vmem:[%s7236_s1 + $0x2ec] sm:$0xf0]  ;;  %v5284_v37 = vor.u32 %v6283_v27, %v5281_v28  ;;  %v5921_v27 = vld [vmem:[%s7236_s1 + $0x6f0] sm:$0xf0] }
 0x3dc   : > { %3934 = vmatpush.bf16.msrb.mxu2 %v5596_v49  ;;  %3909 = vmatpush.bf16.msrb.mxu0 %v5052_v10  ;;  %v5663_v49 = vld [vmem:[%s7236_s1 + $0x4d0] sm:$0xf]  ;;  %v5408_v53 = vor.u32 %v6319_v48, %v5407_v45  ;;  %v5761_v45 = vld [vmem:[%s7236_s1 + $0x5b0] sm:$0xf0] }
 0x3dd   : > { %v5664_v55 = vor.u32 %v6383_v50, %v5663_v49  ;;  %v5119_v56 = vld [vmem:[%s7236_s1 + $0x90] sm:$0xf]  ;;  %v6017_v48 = vld [vmem:[%s7236_s1 + $0x7b0] sm:$0xf0] }
 0x3de   : > { %3947 = vmatpush.bf16.msrb.mxu3 %v5852_v52  ;;  %3922 = vmatpush.bf16.msrb.mxu1 %v5308_v3  ;;  %v5152_v52 = vor.u32 %v6255_v44, %v5151_v43  ;;  %v6247_v60 = vld [vmem:[%s7236_s1 + $0xac] sm:$0xf0]  ;;  %v5505_v43 = vld [vmem:[%s7236_s1 + $0x3b0] sm:$0xf0] }
 0x3df   : > { %3910 = vmatmul.bf16.vlgmr.msrb.gmra.mxu0 %v7500_v58  ;;  %v6263_v58 = vld [vmem:[%s7236_s1 + $0x12c] sm:$0xf0]  ;;  %v6403_v44 = vld [vmem:[%s7236_s1 + $0x594] sm:$0xf] }
 0x3e0   : > { %3935 = vmatpush.bf16.msrb.mxu2 %v5564_v6  ;;  %3954 = vmatpush.bf16.msra.mxu0 %v5280_v25  ;;  %v5184_v40 = vor.u32 %v6263_v58, %v5183_v34  ;;  %v5375_v63 = vld [vmem:[%s7236_s1 + $0x290] sm:$0xf]  ;;  %v5120_v6 = vor.u32 %v6247_v60, %v5119_v56  ;;  %v5764_v31 = vor.u32 %v6403_v44, %v5761_v45  ;;  %v5473_v56 = vld [vmem:[%s7236_s1 + $0x370] sm:$0xf0] }
 0x3e1   : > { %3923 = vmatmul.bf16.vlgmr.msrb.gmra.mxu1 %v7505_v62  ;;  %v5951_v62 = vld [vmem:[%s7236_s1 + $0x710] sm:$0xf]  ;;  %v6395_v60 = vld [vmem:[%s7236_s1 + $0x554] sm:$0xf] }
 0x3e2   : > { %3948 = vmatpush.bf16.msrb.mxu3 %v5820_v8  ;;  %3967 = vmatpush.bf16.msra.mxu1 %v5536_v47  ;;  %v5952_v46 = vor.u32 %v6455_v39, %v5951_v62  ;;  %v6311_v10 = vld [vmem:[%s7236_s1 + $0x2ac] sm:$0xf0]  ;;  %v6275_v39 = vld [vmem:[%s7236_s1 + $0x194] sm:$0xf] }
 0x3e3   : > { %3936 = vmatmul.bf16.vlgmr.msrb.gmra.mxu2 %v7498_v57  ;;  %v5216_v57 = vor.u32 %v6271_v23, %v5215_v22  ;;  %v5631_v11 = vld [vmem:[%s7236_s1 + $0x490] sm:$0xf]  ;;  %v5376_v59 = vor.u32 %v6311_v10, %v5375_v63  ;;  %v5729_v63 = vld [vmem:[%s7236_s1 + $0x570] sm:$0xf0] }
 0x3e4   : > { %3980 = vmatpush.bf16.msra.mxu2 %v5792_v13  ;;  %3955 = vmatpush.bf16.msra.mxu0 %v5248_v20  ;;  %v6375_v1 = vld [vmem:[%s7236_s1 + $0x4ac] sm:$0xf0]  ;;  %v6459_v10 = vld [vmem:[%s7236_s1 + $0x754] sm:$0xf] }
 0x3e5   : > { %3949 = vmatmul.bf16.vlgmr.msrb.gmra.mxu3 %v7503_v61  ;;  %v5984_v61 = vor.u32 %v6463_v30, %v5983_v29  ;;  %v5887_v2 = vld [vmem:[%s7236_s1 + $0x690] sm:$0xf]  ;;  %v5632_v4 = vor.u32 %v6375_v1, %v5631_v11  ;;  %v6347_v29 = vld [vmem:[%s7236_s1 + $0x3d4] sm:$0xf]  ;;  %v7773_v1 = vld [vmem:[#allocation1] sm:$0xff] }
 0x3e6   : > { %3993 = vmatpush.bf16.msra.mxu3 %v6048_v7  ;;  %3968 = vmatpush.bf16.msra.mxu1 %v5504_v54  ;;  %v6439_v3 = vld [vmem:[%s7236_s1 + $0x6ac] sm:$0xf0]  ;;  %v5985_v11 = vld [vmem:[%s7236_s1 + $0x770] sm:$0xf0] }
 0x3e7   : > { %v5087_v8 = vld [vmem:[%s7236_s1 + $0x50] sm:$0xf]  ;;  %v5888_v13 = vor.u32 %v6439_v3, %v5887_v2  ;;  %v7776_v2 = vld [vmem:[#allocation1 + $0x1b] sm:$0xff]  ;;  %v6235_v44 = vld [vmem:[%s7236_s1 + $0x54] sm:$0xf] }
 0x3e8   : > { %3981 = vmatpush.bf16.msra.mxu2 %v5760_v21  ;;  %3956 = vmatpush.bf16.msra.mxu0 %v5216_v57  ;;  %v6239_v25 = vld [vmem:[%s7236_s1 + $0x6c] sm:$0xf0]  ;;  %v5537_v57 = vld [vmem:[%s7236_s1 + $0x3f0] sm:$0xf0] }
 0x3e9   : > { %v5343_v47 = vld [vmem:[%s7236_s1 + $0x250] sm:$0xf]  ;;  %v5088_v5 = vor.u32 %v6239_v25, %v5087_v8  ;;  %v5540_v38 = vor.u32 %v6347_v29, %v5537_v57  ;;  %v6259_v8 = vld [vmem:[%s7236_s1 + $0x114] sm:$0xf] }
 0x3ea   : > { %3994 = vmatpush.bf16.msra.mxu3 %v6016_v24  ;;  %3969 = vmatpush.bf16.msra.mxu1 %v5472_v32  ;;  %v6303_v14 = vld [vmem:[%s7236_s1 + $0x26c] sm:$0xf0]  ;;  %v6411_v32 = vld [vmem:[%s7236_s1 + $0x5d4] sm:$0xf] }
 0x3eb   : > { %v5599_v15 = vld [vmem:[%s7236_s1 + $0x450] sm:$0xf]  ;;  %v5344_v19 = vor.u32 %v6303_v14, %v5343_v47  ;;  %v5185_v25 = vld [vmem:[%s7236_s1 + $0x130] sm:$0xf0] }
 0x3ec   : > { %3982 = vmatpush.bf16.msra.mxu2 %v5728_v33  ;;  %3957 = vmatpush.bf16.msra.mxu0 %v5184_v40  ;;  %v6367_v16 = vld [vmem:[%s7236_s1 + $0x46c] sm:$0xf0]  ;;  %v5793_v33 = vld [vmem:[%s7236_s1 + $0x5f0] sm:$0xf0] }
 0x3ed   : > { %v5855_v7 = vld [vmem:[%s7236_s1 + $0x650] sm:$0xf]  ;;  %v5600_v20 = vor.u32 %v6367_v16, %v5599_v15  ;;  %v5796_v62 = vor.u32 %v6411_v32, %v5793_v33  ;;  %v5249_v40 = vld [vmem:[%s7236_s1 + $0x1b0] sm:$0xf0] }
 0x3ee   : > { %3995 = vmatpush.bf16.msra.mxu3 %v5984_v61  ;;  %3970 = vmatpush.bf16.msra.mxu1 %v5440_v41  ;;  %v6431_v12 = vld [vmem:[%s7236_s1 + $0x66c] sm:$0xf0]  ;;  %v6049_v61 = vld [vmem:[%s7236_s1 + $0x7f0] sm:$0xf0]  ;;  %v5252_v49 = vor.u32 %v6275_v39, %v5249_v40 }
 0x3ef   : > { %v5055_v9 = vld [vmem:[%s7236_s1 + $0x10] sm:$0xf]  ;;  %v5856_v23 = vor.u32 %v6431_v12, %v5855_v7  ;;  %v6339_v41 = vld [vmem:[%s7236_s1 + $0x394] sm:$0xf] }
 0x3f0   : > { %3983 = vmatpush.bf16.msra.mxu2 %v5696_v42  ;;  %3958 = vmatpush.bf16.msra.mxu0 %v5152_v52  ;;  %v6231_v18 = vld [vmem:[%s7236_s1 + $0x2c] sm:$0xf0]  ;;  %v6052_v42 = vor.u32 %v6475_v35, %v6049_v61  ;;  %v5508_v50 = vor.u32 %v6339_v41, %v5505_v43  ;;  %v5217_v52 = vld [vmem:[%s7236_s1 + $0x170] sm:$0xf0] }
 0x3f1   : > { %v5311_v54 = vld [vmem:[%s7236_s1 + $0x210] sm:$0xf]  ;;  %v5056_v30 = vor.u32 %v6231_v18, %v5055_v9  ;;  %v5220_v3 = vor.u32 %v6267_v51, %v5217_v52  ;;  %v6323_v47 = vld [vmem:[%s7236_s1 + $0x314] sm:$0xf] }
 0x3f2   : > { %3996 = vmatpush.bf16.msra.mxu3 %v5952_v46  ;;  %3971 = vmatpush.bf16.msra.mxu1 %v5408_v53  ;;  %v6295_v21 = vld [vmem:[%s7236_s1 + $0x22c] sm:$0xf0]  ;;  %v6467_v46 = vld [vmem:[%s7236_s1 + $0x794] sm:$0xf] }
 0x3f3   : > { %v5567_v22 = vld [vmem:[%s7236_s1 + $0x410] sm:$0xf]  ;;  %v5312_v34 = vor.u32 %v6295_v21, %v5311_v54  ;;  %v6331_v53 = vld [vmem:[%s7236_s1 + $0x354] sm:$0xf]  ;;  %v7795_v21 = vld [vmem:[%s517_s26] sm:$0xff] }
 0x3f4   : > { %3984 = vmatpush.bf16.msra.mxu2 %v5664_v55  ;;  %3959 = vmatpush.bf16.msra.mxu0 %v5120_v6  ;;  %v6359_v17 = vld [vmem:[%s7236_s1 + $0x42c] sm:$0xf0]  ;;  %v6020_v55 = vor.u32 %v6467_v46, %v6017_v48  ;;  %v5441_v14 = vld [vmem:[%s7236_s1 + $0x330] sm:$0xf0]  ;;  %v2440_v29 = vperm.slane %v7795_v21, 0 }
 0x3f5   : > { %v5823_v24 = vld [vmem:[%s7236_s1 + $0x610] sm:$0xf]  ;;  %v5568_v58 = vor.u32 %v6359_v17, %v5567_v22  ;;  %v6387_v15 = vld [vmem:[%s7236_s1 + $0x514] sm:$0xf]  ;;  %v5444_v18 = vor.u32 %v6323_v47, %v5441_v14 }
 0x3f6   : > { %3997 = vmatpush.bf16.msra.mxu3 %v5920_v0  ;;  %3972 = vmatpush.bf16.msra.mxu1 %v5376_v59  ;;  %v6423_v26 = vld [vmem:[%s7236_s1 + $0x62c] sm:$0xf0]  ;;  %v7768_v0 = vld [vmem:[#allocation1 + $0x12] sm:$0xff]  ;;  %v5476_v59 = vor.u32 %v6331_v53, %v5473_v56 }
 0x3f7   : > { %v5824_v36 = vor.u32 %v6423_v26, %v5823_v24  ;;  %v7779_v6 = vld [vmem:[#allocation1 + $0x9] sm:$0xff]  ;;  %v5697_v16 = vld [vmem:[%s7236_s1 + $0x530] sm:$0xf0] }
 0x3f8   : > { %3985 = vmatpush.bf16.msra.mxu2 %v5632_v4  ;;  %3960 = vmatpush.bf16.msra.mxu0 %v5088_v5  ;;  %v5732_v4 = vor.u32 %v6395_v60, %v5729_v63  ;;  %v6451_v7 = vld [vmem:[%s7236_s1 + $0x714] sm:$0xf]  ;;  %v5188_v5 = vor.u32 %v6259_v8, %v5185_v25 }
 0x3f9   : > { %v5953_v12 = vld [vmem:[%s7236_s1 + $0x730] sm:$0xf0] }
 0x3fa   : > { %3998 = vmatpush.bf16.msra.mxu3 %v5888_v13  ;;  %3973 = vmatpush.bf16.msra.mxu1 %v5344_v19  ;;  %v5988_v13 = vor.u32 %v6459_v10, %v5985_v11  ;;  %v6251_v9 = vld [vmem:[%s7236_s1 + $0xd4] sm:$0xf]  ;;  %v5700_v19 = vor.u32 %v6387_v15, %v5697_v16  ;;  %v5956_v22 = vor.u32 %v6451_v7, %v5953_v12  ;;  %v5287_v16 = vld [vmem:[%s7236_s1 + $0x1d8] sm:$0xf] }
 0x3fb   : > { %v6315_v54 = vld [vmem:[%s7236_s1 + $0x2d4] sm:$0xf]  ;;  %v6288_v7 = vld [vmem:[%s7236_s1 + $0x1f4] sm:$0xf0] }
 0x3fc   : > { %3986 = vmatpush.bf16.msra.mxu2 %v5600_v20  ;;  %3961 = vmatpush.bf16.msra.mxu0 %v5056_v30  ;;  %v5153_v20 = vld [vmem:[%s7236_s1 + $0xf0] sm:$0xf0]  ;;  %v5543_v12 = vld [vmem:[%s7236_s1 + $0x3d8] sm:$0xf] }
 0x3fd   : > { %v6379_v17 = vld [vmem:[%s7236_s1 + $0x4d4] sm:$0xf]  ;;  %v5156_v28 = vor.u32 %v6251_v9, %v5153_v20  ;;  %v5799_v20 = vld [vmem:[%s7236_s1 + $0x5d8] sm:$0xf] }
 0x3fe   : > { %3999 = vmatpush.bf16.msra.mxu3 %v5856_v23  ;;  %3974 = vmatpush.bf16.msra.mxu1 %v5312_v34  ;;  %v5409_v23 = vld [vmem:[%s7236_s1 + $0x2f0] sm:$0xf0]  ;;  %v3768_v41 = vpop.f32.mrf.mxu1 }
 0x3ff   : > { %3962 = vmatmul.bf16.vlgmr.msra.gmra.mxu0 %v7773_v1  ;;  %v5665_v24 = vld [vmem:[%s7236_s1 + $0x4f0] sm:$0xf0]  ;;  %v5412_v30 = vor.u32 %v6315_v54, %v5409_v23  ;;  %v6416_v54 = vld [vmem:[%s7236_s1 + $0x5f4] sm:$0xf0] }
 0x400   : > { %3987 = vmatpush.bf16.msra.mxu2 %v5568_v58  ;;  %4006 = vmatpush.bf16.msrb.mxu0 %v5284_v37  ;;  %v6443_v26 = vld [vmem:[%s7236_s1 + $0x6d4] sm:$0xf]  ;;  %v5668_v57 = vor.u32 %v6379_v17, %v5665_v24  ;;  %v6055_v24 = vld [vmem:[%s7236_s1 + $0x7d8] sm:$0xf] }
 0x401   : > { %3975 = vmatmul.bf16.vlgmr.msra.gmra.mxu1 %v7779_v6  ;;  %v6243_v32 = vld [vmem:[%s7236_s1 + $0x94] sm:$0xf]  ;;  %v5924_v58 = vor.u32 %v6443_v26, %v5921_v27  ;;  %v6480_v26 = vld [vmem:[%s7236_s1 + $0x7f4] sm:$0xf0] }
 0x402   : > { %4000 = vmatpush.bf16.msra.mxu3 %v5824_v36  ;;  %4019 = vmatpush.bf16.msrb.mxu1 %v5540_v38  ;;  %v5121_v33 = vld [vmem:[%s7236_s1 + $0xb0] sm:$0xf0] }
 0x403   : > { %3988 = vmatmul.bf16.vlgmr.msra.gmra.mxu2 %v7768_v0  ;;  %v6307_v34 = vld [vmem:[%s7236_s1 + $0x294] sm:$0xf]  ;;  %v5124_v39 = vor.u32 %v6243_v32, %v5121_v33  ;;  %v6280_v32 = vld [vmem:[%s7236_s1 + $0x1b4] sm:$0xf0] }
 0x404   : > { %4032 = vmatpush.bf16.msrb.mxu2 %v5796_v62  ;;  %4007 = vmatpush.bf16.msrb.mxu0 %v5252_v49  ;;  %v5377_v35 = vld [vmem:[%s7236_s1 + $0x2b0] sm:$0xf0]  ;;  %v3755_v62 = vpop.f32.mrf.mxu0  ;;  %v5511_v33 = vld [vmem:[%s7236_s1 + $0x398] sm:$0xf] }
 0x405   : > { %4001 = vmatmul.bf16.vlgmr.msra.gmra.mxu3 %v7776_v2  ;;  %v6371_v61 = vld [vmem:[%s7236_s1 + $0x494] sm:$0xf]  ;;  %v3756_v40 = vadd.f32 %v3755_v62, %v2440_v29 }
 0x406   : > { %4045 = vmatpush.bf16.msrb.mxu3 %v6052_v42  ;;  %4020 = vmatpush.bf16.msrb.mxu1 %v5508_v50  ;;  %v5633_v36 = vld [vmem:[%s7236_s1 + $0x4b0] sm:$0xf0]  ;;  %v5380_v42 = vor.u32 %v6307_v34, %v5377_v35  ;;  %v6344_v35 = vld [vmem:[%s7236_s1 + $0x3b4] sm:$0xf0] }
 0x407   : > { %v6435_v37 = vld [vmem:[%s7236_s1 + $0x694] sm:$0xf]  ;;  %v5636_v43 = vor.u32 %v6371_v61, %v5633_v36  ;;  %v3769_v51 = vadd.f32 %v3768_v41, %v3756_v40  ;;  %v5767_v61 = vld [vmem:[%s7236_s1 + $0x598] sm:$0xf]  ;;  %v5512_v40 = vor.u32 %v6344_v35, %v5511_v33 }
 0x408   : > { %4033 = vmatpush.bf16.msrb.mxu2 %v5764_v31  ;;  %4008 = vmatpush.bf16.msrb.mxu0 %v5220_v3  ;;  %v5889_v38 = vld [vmem:[%s7236_s1 + $0x6b0] sm:$0xf0]  ;;  %v3794_v15 = vpop.f32.mrf.mxu3  ;;  %v6408_v36 = vld [vmem:[%s7236_s1 + $0x5b4] sm:$0xf0] }
 0x409   : > { %v5089_v45 = vld [vmem:[%s7236_s1 + $0x70] sm:$0xf0]  ;;  %v5892_v48 = vor.u32 %v6435_v37, %v5889_v38  ;;  %v6023_v37 = vld [vmem:[%s7236_s1 + $0x798] sm:$0xf]  ;;  %v5768_v41 = vor.u32 %v6408_v36, %v5767_v61 }
 0x40a   : > { %4046 = vmatpush.bf16.msrb.mxu3 %v6020_v55  ;;  %4021 = vmatpush.bf16.msrb.mxu1 %v5476_v59  ;;  %v6299_v46 = vld [vmem:[%s7236_s1 + $0x254] sm:$0xf]  ;;  %v3781_v55 = vpop.f32.mrf.mxu2  ;;  %v5092_v56 = vor.u32 %v6235_v44, %v5089_v45  ;;  %v6472_v38 = vld [vmem:[%s7236_s1 + $0x7b4] sm:$0xf0] }
 0x40b   : > { %v5345_v49 = vld [vmem:[%s7236_s1 + $0x270] sm:$0xf0]  ;;  %v3782_v10 = vadd.f32 %v3781_v55, %v3769_v51  ;;  %v5479_v44 = vld [vmem:[%s7236_s1 + $0x358] sm:$0xf]  ;;  %v6024_v45 = vor.u32 %v6472_v38, %v6023_v37 }
 0x40c   : > { %4034 = vmatpush.bf16.msrb.mxu2 %v5732_v4  ;;  %4009 = vmatpush.bf16.msrb.mxu0 %v5188_v5  ;;  %v6363_v50 = vld [vmem:[%s7236_s1 + $0x454] sm:$0xf]  ;;  %v5348_v11 = vor.u32 %v6299_v46, %v5345_v49  ;;  %v3757_v9 = vpop.f32.mrf.mxu0  ;;  %v6336_v46 = vld [vmem:[%s7236_s1 + $0x374] sm:$0xf0] }
 0x40d   : > { %v5601_v31 = vld [vmem:[%s7236_s1 + $0x470] sm:$0xf0]  ;;  %v7830_v5 = vadd.f32 %v3794_v15, %v3782_v10  ;;  %v6400_v49 = vld [vmem:[%s7236_s1 + $0x574] sm:$0xf0] }
 0x40e   : > { %4047 = vmatpush.bf16.msrb.mxu3 %v5988_v13  ;;  %4022 = vmatpush.bf16.msrb.mxu1 %v5444_v18  ;;  %v6427_v52 = vld [vmem:[%s7236_s1 + $0x654] sm:$0xf]  ;;  %v5604_v3 = vor.u32 %v6363_v50, %v5601_v31  ;;  %v5991_v50 = vld [vmem:[%s7236_s1 + $0x758] sm:$0xf] }
 0x40f   : > { %v5857_v53 = vld [vmem:[%s7236_s1 + $0x670] sm:$0xf0]  ;;  %v6464_v31 = vld [vmem:[%s7236_s1 + $0x774] sm:$0xf0] }
 0x410   : > { %4035 = vmatpush.bf16.msrb.mxu2 %v5700_v19  ;;  %4010 = vmatpush.bf16.msrb.mxu0 %v5156_v28  ;;  %v6227_v60 = vld [vmem:[%s7236_s1 + $0x14] sm:$0xf]  ;;  %v5860_v25 = vor.u32 %v6427_v52, %v5857_v53  ;;  %v6352_v19 = vld [vmem:[%s7236_s1 + $0x3f4] sm:$0xf0]  ;;  %v5288_v28 = vor.u32 %v6288_v7, %v5287_v16  ;;  %v5480_v52 = vor.u32 %v6336_v46, %v5479_v44 }
 0x411   : > { %v5057_v63 = vld [vmem:[%s7236_s1 + $0x30] sm:$0xf0]  ;;  %v5544_v29 = vor.u32 %v6352_v19, %v5543_v12  ;;  %v5191_v55 = vld [vmem:[%s7236_s1 + $0x118] sm:$0xf] }
 0x412   : > { %4048 = vmatpush.bf16.msrb.mxu3 %v5956_v22  ;;  %4023 = vmatpush.bf16.msrb.mxu1 %v5412_v30  ;;  %v6291_v59 = vld [vmem:[%s7236_s1 + $0x214] sm:$0xf]  ;;  %v5060_v18 = vor.u32 %v6227_v60, %v5057_v63  ;;  %v3770_v22 = vpop.f32.mrf.mxu1  ;;  %v5800_v30 = vor.u32 %v6416_v54, %v5799_v20  ;;  %v3783_v34 = vpop.f32.mrf.mxu2  ;;  %v5447_v60 = vld [vmem:[%s7236_s1 + $0x318] sm:$0xf]  ;;  %v5992_v63 = vor.u32 %v6464_v31, %v5991_v50 }
 0x413   : > { %v5313_v4 = vld [vmem:[%s7236_s1 + $0x230] sm:$0xf0]  ;;  %v6328_v10 = vld [vmem:[%s7236_s1 + $0x334] sm:$0xf0] }
 0x414   : > { %4036 = vmatpush.bf16.msrb.mxu2 %v5668_v57  ;;  %4011 = vmatpush.bf16.msrb.mxu0 %v5124_v39  ;;  %v6355_v8 = vld [vmem:[%s7236_s1 + $0x414] sm:$0xf]  ;;  %v5316_v23 = vor.u32 %v6291_v59, %v5313_v4  ;;  %v5255_v57 = vld [vmem:[%s7236_s1 + $0x198] sm:$0xf]  ;;  %v3796_v39 = vpop.f32.mrf.mxu3 }
 0x415   : > { %v5569_v47 = vld [vmem:[%s7236_s1 + $0x430] sm:$0xf0]  ;;  %v5256_v62 = vor.u32 %v6280_v32, %v5255_v57  ;;  %v5959_v59 = vld [vmem:[%s7236_s1 + $0x718] sm:$0xf] }
 0x416   : > { %4049 = vmatpush.bf16.msrb.mxu3 %v5924_v58  ;;  %4024 = vmatpush.bf16.msrb.mxu1 %v5380_v42  ;;  %v6419_v13 = vld [vmem:[%s7236_s1 + $0x614] sm:$0xf]  ;;  %v5572_v17 = vor.u32 %v6355_v8, %v5569_v47  ;;  %v6056_v58 = vor.u32 %v6480_v26, %v6055_v24  ;;  %v5223_v42 = vld [vmem:[%s7236_s1 + $0x158] sm:$0xf]  ;;  %v5448_v47 = vor.u32 %v6328_v10, %v5447_v60 }
 0x417   : > { %v5825_v14 = vld [vmem:[%s7236_s1 + $0x630] sm:$0xf0]  ;;  %v6456_v4 = vld [vmem:[%s7236_s1 + $0x734] sm:$0xf0] }
 0x418   : > { %4037 = vmatpush.bf16.msrb.mxu2 %v5636_v43  ;;  %4012 = vmatpush.bf16.msrb.mxu0 %v5092_v56  ;;  %v5828_v27 = vor.u32 %v6419_v13, %v5825_v14  ;;  %v6272_v43 = vld [vmem:[%s7236_s1 + $0x174] sm:$0xf0]  ;;  %v5960_v12 = vor.u32 %v6456_v4, %v5959_v59  ;;  %v6284_v59 = vld [vmem:[%s7236_s1 + $0x1dc] sm:$0xf] }
 0x419   : > { %v5224_v51 = vor.u32 %v6272_v43, %v5223_v42  ;;  %v6264_v56 = vld [vmem:[%s7236_s1 + $0x134] sm:$0xf0]  ;;  %v5289_v4 = vld [vmem:[%s7236_s1 + $0x1f8] sm:$0xf0] }
 0x41a   : > { %4050 = vmatpush.bf16.msrb.mxu3 %v5892_v48  ;;  %4025 = vmatpush.bf16.msrb.mxu1 %v5348_v11  ;;  %v5735_v48 = vld [vmem:[%s7236_s1 + $0x558] sm:$0xf]  ;;  %v5192_v8 = vor.u32 %v6264_v56, %v5191_v55 }
 0x41b   : > { %v5736_v53 = vor.u32 %v6400_v49, %v5735_v48  ;;  %v5703_v11 = vld [vmem:[%s7236_s1 + $0x518] sm:$0xf] }
 0x41c   : > { %4038 = vmatpush.bf16.msrb.mxu2 %v5604_v3  ;;  %4013 = vmatpush.bf16.msrb.mxu0 %v5060_v18  ;;  %v6392_v3 = vld [vmem:[%s7236_s1 + $0x534] sm:$0xf0] }
 0x41d   : > { %v5704_v13 = vor.u32 %v6392_v3, %v5703_v11  ;;  %v5159_v15 = vld [vmem:[%s7236_s1 + $0xd8] sm:$0xf] }
 0x41e   : > { %4051 = vmatpush.bf16.msrb.mxu3 %v5860_v25  ;;  %4026 = vmatpush.bf16.msrb.mxu1 %v5316_v23  ;;  %v7865_v25 = vpop.f32.mrf.mxu0  ;;  %v7867_v14 = vpop.f32.mrf.mxu1  ;;  %v6256_v16 = vld [vmem:[%s7236_s1 + $0xf4] sm:$0xf0] }
 0x41f   : > { %4014 = vmatmul.bf16.vlgmr.msrb.gmra.mxu0 %v7773_v1  ;;  %v5415_v7 = vld [vmem:[%s7236_s1 + $0x2d8] sm:$0xf]  ;;  %v5160_v22 = vor.u32 %v6256_v16, %v5159_v15  ;;  %v6412_v15 = vld [vmem:[%s7236_s1 + $0x5dc] sm:$0xf] }
 0x420   : > { %4039 = vmatpush.bf16.msrb.mxu2 %v5572_v17  ;;  %4058 = vmatpush.bf16.msra.mxu0 %v5288_v28  ;;  %v6320_v9 = vld [vmem:[%s7236_s1 + $0x2f4] sm:$0xf0]  ;;  %v5801_v16 = vld [vmem:[%s7236_s1 + $0x5f8] sm:$0xf0] }
 0x421   : > { %4027 = vmatmul.bf16.vlgmr.msrb.gmra.mxu1 %v7779_v6  ;;  %v5671_v18 = vld [vmem:[%s7236_s1 + $0x4d8] sm:$0xf]  ;;  %v5416_v23 = vor.u32 %v6320_v9, %v5415_v7  ;;  %v6476_v9 = vld [vmem:[%s7236_s1 + $0x7dc] sm:$0xf] }
 0x422   : > { %4052 = vmatpush.bf16.msrb.mxu3 %v5828_v27  ;;  %4071 = vmatpush.bf16.msra.mxu1 %v5544_v29  ;;  %v6384_v19 = vld [vmem:[%s7236_s1 + $0x4f4] sm:$0xf0] }
 0x423   : > { %4040 = vmatmul.bf16.vlgmr.msrb.gmra.mxu2 %v7768_v0  ;;  %v5927_v20 = vld [vmem:[%s7236_s1 + $0x6d8] sm:$0xf]  ;;  %v5672_v17 = vor.u32 %v6384_v19, %v5671_v18  ;;  %v6057_v18 = vld [vmem:[%s7236_s1 + $0x7f8] sm:$0xf0] }
 0x424   : > { %4084 = vmatpush.bf16.msra.mxu2 %v5800_v30  ;;  %4059 = vmatpush.bf16.msra.mxu0 %v5256_v62  ;;  %v6448_v54 = vld [vmem:[%s7236_s1 + $0x6f4] sm:$0xf0] }
 0x425   : > { %4053 = vmatmul.bf16.vlgmr.msrb.gmra.mxu3 %v7776_v2  ;;  %v5127_v26 = vld [vmem:[%s7236_s1 + $0x98] sm:$0xf]  ;;  %v5928_v29 = vor.u32 %v6448_v54, %v5927_v20  ;;  %v5292_v20 = vor.u32 %v6284_v59, %v5289_v4  ;;  %v6316_v59 = vld [vmem:[%s7236_s1 + $0x2dc] sm:$0xf] }
 0x426   : > { %4097 = vmatpush.bf16.msra.mxu3 %v6056_v58  ;;  %4072 = vmatpush.bf16.msra.mxu1 %v5512_v40  ;;  %v7877_v24 = vpop.f32.mrf.mxu2  ;;  %v6248_v27 = vld [vmem:[%s7236_s1 + $0xb4] sm:$0xf0]  ;;  %v3809_v61 = vpop.f32.mrf.mxu0 }
 0x427   : > { %v5383_v28 = vld [vmem:[%s7236_s1 + $0x298] sm:$0xf]  ;;  %v5128_v35 = vor.u32 %v6248_v27, %v5127_v26  ;;  %v3822_v40 = vpop.f32.mrf.mxu1  ;;  %v6340_v26 = vld [vmem:[%s7236_s1 + $0x39c] sm:$0xf]  ;;  %v6060_v27 = vor.u32 %v6476_v9, %v6057_v18 }
 0x428   : > { %4085 = vmatpush.bf16.msra.mxu2 %v5768_v41  ;;  %4060 = vmatpush.bf16.msra.mxu0 %v5224_v51  ;;  %v7882_v30 = vpop.f32.mrf.mxu3  ;;  %v6312_v57 = vld [vmem:[%s7236_s1 + $0x2b4] sm:$0xf0]  ;;  %v6268_v61 = vld [vmem:[%s7236_s1 + $0x15c] sm:$0xf] }
 0x429   : > { %v5639_v32 = vld [vmem:[%s7236_s1 + $0x498] sm:$0xf]  ;;  %v5384_v36 = vor.u32 %v6312_v57, %v5383_v28  ;;  %v5513_v28 = vld [vmem:[%s7236_s1 + $0x3b8] sm:$0xf0] }
 0x42a   : > { %4098 = vmatpush.bf16.msra.mxu3 %v6024_v45  ;;  %4073 = vmatpush.bf16.msra.mxu1 %v5480_v52  ;;  %v6376_v33 = vld [vmem:[%s7236_s1 + $0x4b4] sm:$0xf0]  ;;  %v5769_v57 = vld [vmem:[%s7236_s1 + $0x5b8] sm:$0xf0] }
 0x42b   : > { %v5895_v34 = vld [vmem:[%s7236_s1 + $0x698] sm:$0xf]  ;;  %v5640_v37 = vor.u32 %v6376_v33, %v5639_v32  ;;  %v6468_v32 = vld [vmem:[%s7236_s1 + $0x79c] sm:$0xf] }
 0x42c   : > { %4086 = vmatpush.bf16.msra.mxu2 %v5736_v53  ;;  %4061 = vmatpush.bf16.msra.mxu0 %v5192_v8  ;;  %v6440_v58 = vld [vmem:[%s7236_s1 + $0x6b4] sm:$0xf0]  ;;  %v6348_v8 = vld [vmem:[%s7236_s1 + $0x3dc] sm:$0xf] }
 0x42d   : > { %v5095_v38 = vld [vmem:[%s7236_s1 + $0x58] sm:$0xf]  ;;  %v5896_v41 = vor.u32 %v6440_v58, %v5895_v34  ;;  %v6025_v33 = vld [vmem:[%s7236_s1 + $0x7b8] sm:$0xf0]  ;;  %v5516_v58 = vor.u32 %v6340_v26, %v5513_v28 }
 0x42e   : > { %4099 = vmatpush.bf16.msra.mxu3 %v5992_v63  ;;  %4074 = vmatpush.bf16.msra.mxu1 %v5448_v47  ;;  %v6240_v62 = vld [vmem:[%s7236_s1 + $0x74] sm:$0xf0]  ;;  %v3835_v56 = vpop.f32.mrf.mxu2  ;;  %v5737_v40 = vld [vmem:[%s7236_s1 + $0x578] sm:$0xf0] }
 0x42f   : > { %v5351_v39 = vld [vmem:[%s7236_s1 + $0x258] sm:$0xf]  ;;  %v5096_v48 = vor.u32 %v6240_v62, %v5095_v38  ;;  %v6028_v38 = vor.u32 %v6468_v32, %v6025_v33  ;;  %v5481_v62 = vld [vmem:[%s7236_s1 + $0x378] sm:$0xf0] }
 0x430   : > { %4087 = vmatpush.bf16.msra.mxu2 %v5704_v13  ;;  %4062 = vmatpush.bf16.msra.mxu0 %v5160_v22  ;;  %v6304_v42 = vld [vmem:[%s7236_s1 + $0x274] sm:$0xf0]  ;;  %v3848_v3 = vpop.f32.mrf.mxu3  ;;  %v5545_v13 = vld [vmem:[%s7236_s1 + $0x3f8] sm:$0xf0]  ;;  %v5804_v22 = vor.u32 %v6412_v15, %v5801_v16 }
 0x431   : > { %v5607_v43 = vld [vmem:[%s7236_s1 + $0x458] sm:$0xf]  ;;  %v5352_v31 = vor.u32 %v6304_v42, %v5351_v39  ;;  %v5548_v54 = vor.u32 %v6348_v8, %v5545_v13  ;;  %v6396_v39 = vld [vmem:[%s7236_s1 + $0x55c] sm:$0xf] }
 0x432   : > { %4100 = vmatpush.bf16.msra.mxu3 %v5960_v12  ;;  %4075 = vmatpush.bf16.msra.mxu1 %v5416_v23  ;;  %v6368_v44 = vld [vmem:[%s7236_s1 + $0x474] sm:$0xf0]  ;;  %v6276_v23 = vld [vmem:[%s7236_s1 + $0x19c] sm:$0xf] }
 0x433   : > { %v5863_v45 = vld [vmem:[%s7236_s1 + $0x658] sm:$0xf]  ;;  %v5608_v51 = vor.u32 %v6368_v44, %v5607_v43  ;;  %v5993_v42 = vld [vmem:[%s7236_s1 + $0x778] sm:$0xf0] }
 0x434   : > { %4088 = vmatpush.bf16.msra.mxu2 %v5672_v17  ;;  %v6432_v46 = vld [vmem:[%s7236_s1 + $0x674] sm:$0xf0]  ;;  %4063 = vmatpush.bf16.msra.mxu0 %v5128_v35  ;;  %v5257_v17 = vld [vmem:[%s7236_s1 + $0x1b8] sm:$0xf0] }
 0x435   : > { %v5063_v49 = vld [vmem:[%s7236_s1 + $0x18] sm:$0xf]  ;;  %v5864_v60 = vor.u32 %v6432_v46, %v5863_v45  ;;  %v5260_v34 = vor.u32 %v6276_v23, %v5257_v17  ;;  %v5740_v45 = vor.u32 %v6396_v39, %v5737_v40  ;;  %v6260_v46 = vld [vmem:[%s7236_s1 + $0x11c] sm:$0xf] }
 0x436   : > { %4101 = vmatpush.bf16.msra.mxu3 %v5928_v29  ;;  %v6232_v50 = vld [vmem:[%s7236_s1 + $0x34] sm:$0xf0]  ;;  %4076 = vmatpush.bf16.msra.mxu1 %v5384_v36  ;;  %v6404_v29 = vld [vmem:[%s7236_s1 + $0x59c] sm:$0xf] }
 0x437   : > { %v5319_v52 = vld [vmem:[%s7236_s1 + $0x218] sm:$0xf]  ;;  %v5064_v47 = vor.u32 %v6232_v50, %v5063_v49  ;;  %v5772_v35 = vor.u32 %v6404_v29, %v5769_v57  ;;  %v5225_v36 = vld [vmem:[%s7236_s1 + $0x178] sm:$0xf0] }
 0x438   : > { %4089 = vmatpush.bf16.msra.mxu2 %v5640_v37  ;;  %v6296_v53 = vld [vmem:[%s7236_s1 + $0x234] sm:$0xf0]  ;;  %4064 = vmatpush.bf16.msra.mxu0 %v5096_v48  ;;  %v6332_v37 = vld [vmem:[%s7236_s1 + $0x35c] sm:$0xf]  ;;  %v5228_v43 = vor.u32 %v6268_v61, %v5225_v36 }
 0x439   : > { %v5575_v55 = vld [vmem:[%s7236_s1 + $0x418] sm:$0xf]  ;;  %v5320_v7 = vor.u32 %v6296_v53, %v5319_v52  ;;  %v5484_v44 = vor.u32 %v6332_v37, %v5481_v62  ;;  %v5193_v48 = vld [vmem:[%s7236_s1 + $0x138] sm:$0xf0] }
 0x43a   : > { %4102 = vmatpush.bf16.msra.mxu3 %v5896_v41  ;;  %v6360_v63 = vld [vmem:[%s7236_s1 + $0x434] sm:$0xf0]  ;;  %4077 = vmatpush.bf16.msra.mxu1 %v5352_v31  ;;  %v6460_v41 = vld [vmem:[%s7236_s1 + $0x75c] sm:$0xf]  ;;  %v5196_v56 = vor.u32 %v6260_v46, %v5193_v48 }
 0x43b   : > { %v5831_v10 = vld [vmem:[%s7236_s1 + $0x618] sm:$0xf]  ;;  %v5576_v12 = vor.u32 %v6360_v63, %v5575_v55  ;;  %v6324_v49 = vld [vmem:[%s7236_s1 + $0x31c] sm:$0xf]  ;;  %v5996_v50 = vor.u32 %v6460_v41, %v5993_v42 }
 0x43c   : > { %v6424_v11 = vld [vmem:[%s7236_s1 + $0x634] sm:$0xf0]  ;;  %4090 = vmatpush.bf16.msra.mxu2 %v5608_v51  ;;  %4065 = vmatpush.bf16.msra.mxu0 %v5064_v47  ;;  %v5449_v31 = vld [vmem:[%s7236_s1 + $0x338] sm:$0xf0] }
 0x43d   : > { %v5832_v19 = vor.u32 %v6424_v11, %v5831_v10  ;;  %v6388_v51 = vld [vmem:[%s7236_s1 + $0x51c] sm:$0xf]  ;;  %v5452_v63 = vor.u32 %v6324_v49, %v5449_v31 }
 0x43e   : > { %4103 = vmatpush.bf16.msra.mxu3 %v5864_v60  ;;  %4078 = vmatpush.bf16.msra.mxu1 %v5320_v7  ;;  %v5705_v52 = vld [vmem:[%s7236_s1 + $0x538] sm:$0xf0]  ;;  %v7941_v60 = vpop.f32.mrf.mxu0  ;;  %v7946_v4 = vpop.f32.mrf.mxu1 }
 0x43f   : > { %4066 = vmatmul.bf16.vlgmr.msra.gmra.mxu0 %v7773_v1  ;;  %v6452_v53 = vld [vmem:[%s7236_s1 + $0x71c] sm:$0xf]  ;;  %v5708_v10 = vor.u32 %v6388_v51, %v5705_v52 }
 0x440   : > { %4091 = vmatpush.bf16.msra.mxu2 %v5576_v12  ;;  %4110 = vmatpush.bf16.msrb.mxu0 %v5292_v20  ;;  %v5961_v55 = vld [vmem:[%s7236_s1 + $0x738] sm:$0xf0] }
 0x441   : > { %4079 = vmatmul.bf16.vlgmr.msra.gmra.mxu1 %v7779_v6  ;;  %v6252_v11 = vld [vmem:[%s7236_s1 + $0xdc] sm:$0xf]  ;;  %v5964_v8 = vor.u32 %v6452_v53, %v5961_v55 }
 0x442   : > { %4104 = vmatpush.bf16.msra.mxu3 %v5832_v19  ;;  %4123 = vmatpush.bf16.msrb.mxu1 %v5548_v54  ;;  %v5161_v3 = vld [vmem:[%s7236_s1 + $0xf8] sm:$0xf0] }
 0x443   : > { %4092 = vmatmul.bf16.vlgmr.msra.gmra.mxu2 %v7768_v0  ;;  %v5417_v47 = vld [vmem:[%s7236_s1 + $0x2f8] sm:$0xf0]  ;;  %v5164_v12 = vor.u32 %v6252_v11, %v5161_v3 }
 0x444   : > { %4136 = vmatpush.bf16.msrb.mxu2 %v5804_v22  ;;  %4111 = vmatpush.bf16.msrb.mxu0 %v5260_v34  ;;  %v6380_v13 = vld [vmem:[%s7236_s1 + $0x4dc] sm:$0xf]  ;;  %v5420_v9 = vor.u32 %v6316_v59, %v5417_v47  ;;  %v2441_v59 = vperm.slane %v7795_v21, 1  ;;  %v2442_v47 = vperm.slane %v7795_v21, 2 }
 0x445   : > { %4105 = vmatmul.bf16.vlgmr.msra.gmra.mxu3 %v7776_v2  ;;  %v5673_v15 = vld [vmem:[%s7236_s1 + $0x4f8] sm:$0xf0] }
 0x446   : > { %4149 = vmatpush.bf16.msrb.mxu3 %v6060_v27  ;;  %4124 = vmatpush.bf16.msrb.mxu1 %v5516_v58  ;;  %v6444_v16 = vld [vmem:[%s7236_s1 + $0x6dc] sm:$0xf]  ;;  %v5676_v18 = vor.u32 %v6380_v13, %v5673_v15  ;;  %v7956_v22 = vpop.f32.mrf.mxu2  ;;  %v3861_v33 = vpop.f32.mrf.mxu0  ;;  %v3808_v13 = vadd.f32 %v7865_v25, %v2441_v59  ;;  %v3860_v15 = vadd.f32 %v7941_v60, %v2442_v47  ;;  %v2447_v59 = vperm.slane %v7795_v21, 7 }
 0x447   : > { %v5929_v7 = vld [vmem:[%s7236_s1 + $0x6f8] sm:$0xf0]  ;;  %v3874_v37 = vpop.f32.mrf.mxu1 }
 0x448   : > { %4137 = vmatpush.bf16.msrb.mxu2 %v5772_v35  ;;  %4112 = vmatpush.bf16.msrb.mxu0 %v5228_v43  ;;  %v6244_v19 = vld [vmem:[%s7236_s1 + $0x9c] sm:$0xf]  ;;  %v5932_v23 = vor.u32 %v6444_v16, %v5929_v7  ;;  %v7961_v28 = vpop.f32.mrf.mxu3  ;;  %v3821_v16 = vadd.f32 %v7867_v14, %v3808_v13  ;;  %v2443_v7 = vperm.slane %v7795_v21, 3 }
 0x449   : > { %v5129_v20 = vld [vmem:[%s7236_s1 + $0xb8] sm:$0xf0] }
 0x44a   : > { %4150 = vmatpush.bf16.msrb.mxu3 %v6028_v38  ;;  %4125 = vmatpush.bf16.msrb.mxu1 %v5484_v44  ;;  %v6308_v54 = vld [vmem:[%s7236_s1 + $0x29c] sm:$0xf]  ;;  %v5132_v32 = vor.u32 %v6244_v19, %v5129_v20 }
 0x44b   : > { %v5385_v17 = vld [vmem:[%s7236_s1 + $0x2b8] sm:$0xf0] }
 0x44c   : > { %4138 = vmatpush.bf16.msrb.mxu2 %v5740_v45  ;;  %4113 = vmatpush.bf16.msrb.mxu0 %v5196_v56  ;;  %v6372_v26 = vld [vmem:[%s7236_s1 + $0x49c] sm:$0xf]  ;;  %v5388_v34 = vor.u32 %v6308_v54, %v5385_v17 }
 0x44d   : > { %v5641_v27 = vld [vmem:[%s7236_s1 + $0x4b8] sm:$0xf0] }
 0x44e   : > { %4151 = vmatpush.bf16.msrb.mxu3 %v5996_v50  ;;  %4126 = vmatpush.bf16.msrb.mxu1 %v5452_v63  ;;  %v6436_v29 = vld [vmem:[%s7236_s1 + $0x69c] sm:$0xf]  ;;  %v5644_v58 = vor.u32 %v6372_v26, %v5641_v27  ;;  %v3887_v50 = vpop.f32.mrf.mxu2 }
 0x44f   : > { %v5897_v57 = vld [vmem:[%s7236_s1 + $0x6b8] sm:$0xf0] }
 0x450   : > { %4139 = vmatpush.bf16.msrb.mxu2 %v5708_v10  ;;  %4114 = vmatpush.bf16.msrb.mxu0 %v5164_v12  ;;  %v6236_v35 = vld [vmem:[%s7236_s1 + $0x5c] sm:$0xf]  ;;  %v5900_v38 = vor.u32 %v6436_v29, %v5897_v57  ;;  %v3900_v55 = vpop.f32.mrf.mxu3  ;;  %v3873_v12 = vadd.f32 %v7946_v4, %v3860_v15  ;;  %v2444_v57 = vperm.slane %v7795_v21, 4 }
 0x451   : > { %v5097_v61 = vld [vmem:[%s7236_s1 + $0x78] sm:$0xf0] }
 0x452   : > { %4152 = vmatpush.bf16.msrb.mxu3 %v5964_v8  ;;  %4127 = vmatpush.bf16.msrb.mxu1 %v5420_v9  ;;  %v6300_v36 = vld [vmem:[%s7236_s1 + $0x25c] sm:$0xf]  ;;  %v5100_v43 = vor.u32 %v6236_v35, %v5097_v61  ;;  %v3834_v9 = vadd.f32 %v7877_v24, %v3821_v16 }
 0x453   : > { %v5353_v62 = vld [vmem:[%s7236_s1 + $0x278] sm:$0xf0] }
 0x454   : > { %4140 = vmatpush.bf16.msrb.mxu2 %v5676_v18  ;;  %v6364_v39 = vld [vmem:[%s7236_s1 + $0x45c] sm:$0xf]  ;;  %4115 = vmatpush.bf16.msrb.mxu0 %v5132_v32  ;;  %v5356_v44 = vor.u32 %v6300_v36, %v5353_v62 }
 0x455   : > { %v5609_v40 = vld [vmem:[%s7236_s1 + $0x478] sm:$0xf0] }
 0x456   : > { %4153 = vmatpush.bf16.msrb.mxu3 %v5932_v23  ;;  %v6428_v41 = vld [vmem:[%s7236_s1 + $0x65c] sm:$0xf]  ;;  %4128 = vmatpush.bf16.msrb.mxu1 %v5388_v34  ;;  %v5612_v45 = vor.u32 %v6364_v39, %v5609_v40 }
 0x457   : > { %v5865_v42 = vld [vmem:[%s7236_s1 + $0x678] sm:$0xf0] }
 0x458   : > { %4141 = vmatpush.bf16.msrb.mxu2 %v5644_v58  ;;  %v6228_v46 = vld [vmem:[%s7236_s1 + $0x1c] sm:$0xf]  ;;  %v5868_v31 = vor.u32 %v6428_v41, %v5865_v42  ;;  %4116 = vmatpush.bf16.msrb.mxu0 %v5100_v43 }
 0x459   : > { %v5065_v48 = vld [vmem:[%s7236_s1 + $0x38] sm:$0xf0] }
 0x45a   : > { %v6292_v49 = vld [vmem:[%s7236_s1 + $0x21c] sm:$0xf]  ;;  %4154 = vmatpush.bf16.msrb.mxu3 %v5900_v38  ;;  %v5068_v10 = vor.u32 %v6228_v46, %v5065_v48  ;;  %4129 = vmatpush.bf16.msrb.mxu1 %v5356_v44 }
 0x45b   : > { %v5321_v51 = vld [vmem:[%s7236_s1 + $0x238] sm:$0xf0] }
 0x45c   : > { %v6356_v52 = vld [vmem:[%s7236_s1 + $0x41c] sm:$0xf]  ;;  %4142 = vmatpush.bf16.msrb.mxu2 %v5612_v45  ;;  %v5324_v11 = vor.u32 %v6292_v49, %v5321_v51  ;;  %4117 = vmatpush.bf16.msrb.mxu0 %v5068_v10  ;;  %v3911_v25 = vpop.f32.mrf.mxu0  ;;  %v2446_v10 = vperm.slane %v7795_v21, 6 }
 0x45d   : > { %v5577_v53 = vld [vmem:[%s7236_s1 + $0x438] sm:$0xf0]  ;;  %v3912_v18 = vadd.f32 %v3911_v25, %v2443_v7 }
 0x45e   : > { %v6420_v56 = vld [vmem:[%s7236_s1 + $0x61c] sm:$0xf]  ;;  %v5580_v3 = vor.u32 %v6356_v52, %v5577_v53  ;;  %4155 = vmatpush.bf16.msrb.mxu3 %v5868_v31  ;;  %4130 = vmatpush.bf16.msrb.mxu1 %v5324_v11  ;;  %v3924_v19 = vpop.f32.mrf.mxu1 }
 0x45f   : > { %v5833_v63 = vld [vmem:[%s7236_s1 + $0x638] sm:$0xf0]  ;;  %4118 = vmatmul.bf16.vlgmr.msrb.gmra.mxu0 %v7773_v1  ;;  %v3886_v1 = vadd.f32 %v7956_v22, %v3873_v12  ;;  %v3925_v60 = vadd.f32 %v3924_v19, %v3912_v18 }
 0x460   : > { %v5836_v8 = vor.u32 %v6420_v56, %v5833_v63  ;;  %4143 = vmatpush.bf16.msrb.mxu2 %v5580_v3  ;;  %v2445_v63 = vperm.slane %v7795_v21, 5 }
 0x461   : > { %4131 = vmatmul.bf16.vlgmr.msrb.gmra.mxu1 %v7779_v6  ;;  %v3847_v6 = vadd.f32 %v7882_v30, %v3834_v9 }
 0x462   : > { %4156 = vmatpush.bf16.msrb.mxu3 %v5836_v8 }
 0x463   : > { %4144 = vmatmul.bf16.vlgmr.msrb.gmra.mxu2 %v7768_v0  ;;  %v3899_v0 = vadd.f32 %v7961_v28, %v3886_v1  ;;  %v4170_v54 = vrot.slane %v3847_v6, 6 }
 0x464   : > { %v3913_v17 = vpop.f32.mrf.mxu0 }
 0x465   : > { %4157 = vmatmul.bf16.vlgmr.msrb.gmra.mxu3 %v7776_v2  ;;  %v4171_v4 = vrot.slane %v3899_v0, 4  ;;  %v4177_v22 = vsel %vm4176_vm11, %v7830_v5, %v4170_v54 }
 0x466   : > { %v3937_v20 = vpop.f32.mrf.mxu2  ;;  %v3926_v24 = vpop.f32.mrf.mxu1 }
 0x467   : > { %v3938_v2 = vadd.f32 %v3937_v20, %v3925_v60 }
 0x468   : > { %v3950_v14 = vpop.f32.mrf.mxu3 }
 0x469   : > { %v3951_v23 = vadd.f32 %v3950_v14, %v3938_v2 }
 0x46b   : > { %v4172_v26 = vrot.slane %v3951_v23, 2 }
 0x46d   : > { %v4179_v30 = vsel %vm4178_vm12, %v4171_v4, %v4172_v26 }
 0x46e   : > { %v4181_v27 = vsel %vm4180_vm13, %v4177_v22, %v4179_v30  ;;  %v3939_v28 = vpop.f32.mrf.mxu2 }
 0x46f   : > { %4187 = vst [vmem:[%s7248_s28] sm:$0xff] %v4181_v27 }
 0x470   : > { %v3952_v29 = vpop.f32.mrf.mxu3 }
 0x47c   : > { %v3963_v32 = vpop.f32.mrf.mxu0 }
 0x47d   : > { %v3964_v33 = vadd.f32 %v3963_v32, %v2444_v57 }
 0x47e   : > { %v3976_v34 = vpop.f32.mrf.mxu1 }
 0x47f   : > { %v3977_v58 = vadd.f32 %v3976_v34, %v3964_v33 }
 0x484   : > { %v3965_v38 = vpop.f32.mrf.mxu0 }
 0x486   : > { %v3989_v35 = vpop.f32.mrf.mxu2  ;;  %v3978_v62 = vpop.f32.mrf.mxu1 }
 0x487   : > { %v3990_v61 = vadd.f32 %v3989_v35, %v3977_v58 }
 0x488   : > { %v4002_v36 = vpop.f32.mrf.mxu3 }
 0x489   : > { %v4003_v37 = vadd.f32 %v4002_v36, %v3990_v61 }
 0x48e   : > { %v3991_v5 = vpop.f32.mrf.mxu2 }
 0x490   : > { %v4004_v39 = vpop.f32.mrf.mxu3 }
 0x49c   : > { %v4015_v40 = vpop.f32.mrf.mxu0 }
 0x49d   : > { %v4016_v11 = vadd.f32 %v4015_v40, %v2445_v63 }
 0x49e   : > { %v4028_v41 = vpop.f32.mrf.mxu1 }
 0x49f   : > { %v4029_v8 = vadd.f32 %v4028_v41, %v4016_v11 }
 0x4a4   : > { %v4017_v44 = vpop.f32.mrf.mxu0 }
 0x4a6   : > { %v4041_v42 = vpop.f32.mrf.mxu2  ;;  %v4030_v45 = vpop.f32.mrf.mxu1 }
 0x4a7   : > { %v4042_v7 = vadd.f32 %v4041_v42, %v4029_v8 }
 0x4a8   : > { %v4054_v43 = vpop.f32.mrf.mxu3 }
 0x4a9   : > { %v4055_v25 = vadd.f32 %v4054_v43, %v4042_v7 }
 0x4ab   : > { %v4173_v0 = vrot.slane %v4055_v25, 6 }
 0x4ad   : > { %v4182_v54 = vsel %vm4176_vm11, %v4003_v37, %v4173_v0 }
 0x4ae   : > { %v4043_v46 = vpop.f32.mrf.mxu2 }
 0x4b0   : > { %v4056_v48 = vpop.f32.mrf.mxu3 }
 0x4bc   : > { %v4067_v49 = vpop.f32.mrf.mxu0 }
 0x4bd   : > { %v4068_v3 = vadd.f32 %v4067_v49, %v2446_v10 }
 0x4be   : > { %v4080_v50 = vpop.f32.mrf.mxu1 }
 0x4bf   : > { %v4081_v47 = vadd.f32 %v4080_v50, %v4068_v3 }
 0x4c4   : > { %v4069_v52 = vpop.f32.mrf.mxu0 }
 0x4c6   : > { %v4093_v31 = vpop.f32.mrf.mxu2  ;;  %v4082_v53 = vpop.f32.mrf.mxu1 }
 0x4c7   : > { %v4094_v12 = vadd.f32 %v4093_v31, %v4081_v47 }
 0x4c8   : > { %v4106_v51 = vpop.f32.mrf.mxu3 }
 0x4c9   : > { %v4107_v19 = vadd.f32 %v4106_v51, %v4094_v12 }
 0x4cb   : > { %v4174_v14 = vrot.slane %v4107_v19, 4 }
 0x4ce   : > { %v4095_v55 = vpop.f32.mrf.mxu2 }
 0x4d0   : > { %v4108_v56 = vpop.f32.mrf.mxu3 }
 0x4dc   : > { %v4119_v13 = vpop.f32.mrf.mxu0 }
 0x4dd   : > { %v4120_v15 = vadd.f32 %v4119_v13, %v2447_v59 }
 0x4de   : > { %v4132_v16 = vpop.f32.mrf.mxu1 }
 0x4df   : > { %v4133_v9 = vadd.f32 %v4132_v16, %v4120_v15 }
 0x4e4   : > { %v4121_v6 = vpop.f32.mrf.mxu0 }
 0x4e6   : > { %v4145_v18 = vpop.f32.mrf.mxu2  ;;  %v4134_v20 = vpop.f32.mrf.mxu1 }
 0x4e7   : > { %v4146_v1 = vadd.f32 %v4145_v18, %v4133_v9 }
 0x4e8   : > { %v4158_v60 = vpop.f32.mrf.mxu3 }
 0x4e9   : > { %v4159_v2 = vadd.f32 %v4158_v60, %v4146_v1 }
 0x4eb   : > { %v4175_v21 = vrot.slane %v4159_v2, 2 }
 0x4ed   : > { %v4183_v23 = vsel %vm4178_vm12, %v4174_v14, %v4175_v21 }
 0x4ee   : > { %v4184_v17 = vsel %vm4180_vm13, %v4182_v54, %v4183_v23  ;;  %v4147_v24 = vpop.f32.mrf.mxu2 }
 0x4ef   : > { %4188 = vst [vmem:[%s7248_s28 + $0x8] sm:$0xff] %v4184_v17 }
 0x4f0   : > { %v4160_v4 = vpop.f32.mrf.mxu3 }
 0x4f1 PF: > { %s8062_s20 = sld [smem:[#allocation24_spill]]  ;;  %s8064_s17 = smov %s6970_s18 }
 0x4f2   : > { %s8063_s1 = sld [smem:[#allocation25_spill]]  ;;  %s8065_s18 = smov %s6974_s19 }
 0x4f7   : > { %p23_p3 = scmp.ge.s32.totalorder %s8062_s20, 6  }
 0x4f8   : > { %s8066_s19 = smov %s8063_s1 }
 0x4f9   :  { %25 = sbr.rel (!%p23_p3) target bundleno = 13 (0xd), region = 150 }
 0x4fe   :  { %4211 = vsyncpa [#allocation4], 1 }
 0x4ff   :  { %4213 = vsyncpa [#allocation4 + $0x1], 1 }
 0x500   :  { %4214 = vsyncpa [#allocation6], 1 }
 0x501   :  { %4215 = vsyncpa [#allocation9], 1 }
 0x502   :  { %4216 = vsyncpa [#allocation12], 1 }
 0x503   :  { %4217 = vsyncpa [#allocation15], 1 }

</bundles_post_ra>
